<compile_context>
chip_gen: v7x
topology: tpu7x:2x2x1
jax: 0.10.0
libtpu: 0.0.40
codegen_flags: <defaults>
</compile_context>

<pallas_src>
import functools

import jax
import jax.numpy as jnp
from jax import lax
from jax.experimental import pallas as pl
from jax.experimental.pallas import tpu as pltpu


# -----------------------------------------------------------------------------
# in-kernel helpers
# -----------------------------------------------------------------------------
def _layer_norm(x, g, b, eps=1e-5):
    mu = jnp.mean(x, axis=-1, keepdims=True)
    var = jnp.mean((x - mu) ** 2, axis=-1, keepdims=True)
    return (x - mu) * lax.rsqrt(var + eps) * g + b


def _mm(a, b):
    """MXU matmul: bf16 inputs, f32 accumulation."""
    return jnp.dot(a.astype(jnp.bfloat16), b.astype(jnp.bfloat16),
                   preferred_element_type=jnp.float32)


# -----------------------------------------------------------------------------
# Pallas kernels
# -----------------------------------------------------------------------------
def encoder_stack_kernel(*refs, num_heads, num_layers, causal, masked, bb, seq_len):
    """Full NL-layer post-LN transformer encoder on a (bb, T, D) batch block.

    Weight refs carry a leading NL axis; the layer loop is fully unrolled and
    the activation is carried as a (bb*T, D) f32 value (no HBM round trip).
    """
    if masked:
        x_ref, mask_ref = refs[0], refs[1]
        w_refs = refs[2:13]
        o_ref = refs[13]
    else:
        x_ref, mask_ref = refs[0], None
        w_refs = refs[1:12]
        o_ref = refs[12]
    (wqkv_ref, wo_ref, bo_ref, w1_ref, b1_ref, w2_ref, b2_ref,
     ln1g_ref, ln1b_ref, ln2g_ref, ln2b_ref) = w_refs

    T = seq_len
    D = x_ref.shape[-1]
    hd = D // num_heads
    M = bb * T                                               # batch-folded rows

    x = x_ref[...].astype(jnp.float32).reshape(M, D)
    if masked:
        mask = mask_ref[...].astype(jnp.float32).reshape(M, 1)
        x = x * mask

    if causal:
        row = lax.broadcasted_iota(jnp.int32, (T, T), 0)
        col = lax.broadcasted_iota(jnp.int32, (T, T), 1)
        causal_mask = (col <= row)[None]                     # (1, T, T)

    # Layer loop fully unrolled (num_layers static, small).
    for l in range(num_layers):
        # ---- fused QKV projection (softmax scale folded into Wq), M-fill ----
        qkv = _mm(x, wqkv_ref[l])                            # (M, 3D) f32
        wo_l = wo_ref[l]                                     # (D, D) bf16

        # ---- attention: batched (over bb) scores/context per head; the head
        #      output is pushed through the head's (hd, D) slice of Wo and
        #      accumulated -> full-D lane-dense output, no concat ----
        attn = None
        for h in range(num_heads):
            lo = h * hd
            q = qkv[:, lo:lo + hd].reshape(bb, T, hd)
            k = qkv[:, D + lo:D + lo + hd].reshape(bb, T, hd)
            v = qkv[:, 2 * D + lo:2 * D + lo + hd].reshape(bb, T, hd)
            s = lax.dot_general(q.astype(jnp.bfloat16), k.astype(jnp.bfloat16),
                                (((2,), (2,)), ((0,), (0,))),
                                preferred_element_type=jnp.float32)   # (bb,T,T)
            if causal:
                s = jnp.where(causal_mask, s, -1e9)
            s = s - jnp.max(s, axis=-1, keepdims=True)
            p = jnp.exp(s)
            p = p * pl.reciprocal(jnp.sum(p, axis=-1, keepdims=True), approx=True)
            ctx = lax.dot_general(p.astype(jnp.bfloat16), v.astype(jnp.bfloat16),
                                  (((2,), (1,)), ((0,), (0,))),
                                  preferred_element_type=jnp.float32)  # (bb,T,hd)
            head_out = _mm(ctx.reshape(M, hd), wo_l[lo:lo + hd, :])    # (M, D)
            attn = head_out if attn is None else attn + head_out
        attn = attn + bo_ref[l]

        h1 = _layer_norm(x + attn, ln1g_ref[l], ln1b_ref[l])

        # ---- ReLU FFN ----
        f = jnp.maximum(_mm(h1, w1_ref[l]) + b1_ref[l], 0.0)
        f = _mm(f, w2_ref[l]) + b2_ref[l]
        x = _layer_norm(h1 + f, ln2g_ref[l], ln2b_ref[l])
        if masked:
            x = x * mask

    o_ref[...] = x.reshape(bb, T, D).astype(o_ref.dtype)


def tokens_kernel(variety_ref, user_ref, wv_ref, bv_ref, wu_ref, bu_ref, o_ref, *, bb):
    """Variate-token embedding (contraction over L, transpose folded into the
    dot_general) fused with the static/user token embedding and the concat."""
    wv = wv_ref[...].astype(jnp.bfloat16)                    # (L, D)
    bv = bv_ref[...]                                         # (1, D) f32
    vt_rows = []
    for i in range(bb):
        var_i = variety_ref[i].astype(jnp.bfloat16)          # (L, V)
        vt_rows.append(
            lax.dot_general(var_i, wv, (((0,), (0,)), ((), ())),
                            preferred_element_type=jnp.float32) + bv)  # (V, D)
    vt = jnp.stack(vt_rows, axis=0)                          # (bb, V, D)

    u = user_ref[...].astype(jnp.float32)                    # (bb, S)
    ut = u[:, :, None] * wu_ref[...][None] + bu_ref[...][None]          # (bb, S, D)

    o_ref[...] = jnp.concatenate([vt, ut], axis=1).astype(o_ref.dtype)  # (bb,V+S,D)


def var_proj_kernel(tok_ref, wp_ref, bp_ref, o_ref, *, bb, num_var):
    """Project variate tokens back to sequence length; the (V,L)->(L,V)
    transpose happens in VMEM (no HBM swapaxes pass)."""
    wp = wp_ref[...].astype(jnp.bfloat16)                    # (D, L)
    bp = bp_ref[...]                                         # (1, L) f32
    rows = []
    for i in range(bb):
        t_i = tok_ref[i].astype(jnp.bfloat16)[:num_var, :]   # (V, D)
        r_i = jnp.dot(t_i, wp, preferred_element_type=jnp.float32) + bp  # (V, L)
        rows.append(r_i.T)                                   # (L, V)
    o_ref[...] = jnp.stack(rows, axis=0).astype(o_ref.dtype)  # (bb, L, V)


def loss_kernel(feat_ref, tout_ref, disc_ref, inv_ref, bias_ref, mask_ref,
                num_ref, den_ref, *, alpha):
    """Fused logits + masked BCE over one batch block (pos/neg stacked on axis 0).
    Emits partial numerator / denominator; final divide happens in XLA."""
    feat = feat_ref[...].astype(jnp.float32)                 # (2, bb, L, D)
    tout = tout_ref[...].astype(jnp.float32)                 # (bb, L, D)
    disc = disc_ref[...].astype(jnp.float32)                 # (2, bb, L, V)
    inv = inv_ref[...].astype(jnp.float32)                   # (bb, L, V)
    bias = bias_ref[...].astype(jnp.float32)                 # (2, bb, L)
    m = mask_ref[...].astype(jnp.float32)                    # (bb, L)

    logits = (bias
              + alpha * jnp.sum(feat * tout[None], axis=-1)
              + (1.0 - alpha) * jnp.sum(disc * inv[None], axis=-1))  # (2, bb, L)

    # index 0 = pos, index 1 = neg;  -log(1 - sigmoid(x) + eps) == -log(sigmoid(-x) + eps)
    sgn = jnp.where(lax.broadcasted_iota(jnp.int32, logits.shape, 0) == 0, 1.0, -1.0)
    sig = 1.0 / (1.0 + jnp.exp(-sgn * logits))
    per = -jnp.log(sig + 1e-24) * m[None]

    num_ref[...] = jnp.full((1, 1, 1), jnp.sum(per), jnp.float32)
    den_ref[...] = jnp.full((1, 1, 1), jnp.sum(m), jnp.float32)


# -----------------------------------------------------------------------------
# Pallas wrappers (batch-block grids, weights resident; parallel semantics)
# -----------------------------------------------------------------------------
_STACK_KEYS = ('wqkv', 'wo', 'bo', 'w1', 'b1', 'w2', 'b2',
               'ln1g', 'ln1b', 'ln2g', 'ln2b')

_VMEM_LIMIT = 64 * 1024 * 1024


def _stack_layer_params(layers, num_heads):
    """Stack per-layer params along a leading NL axis; fold 1/sqrt(hd) into Wq;
    store matmul weights in bf16 (halves weight DMA)."""
    D = layers[0]['wq'].shape[0]
    hd = D // num_heads
    scale = 1.0 / (hd ** 0.5)

    def s(fn, dtype=None):
        arr = jnp.stack([fn(lp) for lp in layers], axis=0)
        return arr.astype(dtype) if dtype is not None else arr

    return dict(
        wqkv=s(lambda lp: jnp.concatenate(
            [lp['wq'] * scale, lp['wk'], lp['wv']], axis=-1), jnp.bfloat16),
        wo=s(lambda lp: lp['wo'], jnp.bfloat16),
        bo=s(lambda lp: lp['bo']),
        w1=s(lambda lp: lp['w1'], jnp.bfloat16),
        b1=s(lambda lp: lp['b1']),
        w2=s(lambda lp: lp['w2'], jnp.bfloat16),
        b2=s(lambda lp: lp['b2']),
        ln1g=s(lambda lp: lp['ln1g']), ln1b=s(lambda lp: lp['ln1b']),
        ln2g=s(lambda lp: lp['ln2g']), ln2b=s(lambda lp: lp['ln2b']),
    )


def _full_spec(arr):
    nd = arr.ndim
    return pl.BlockSpec(arr.shape, lambda b, _nd=nd: (0,) * _nd)


def _encoder_block_b(B, T, target_rows=256):
    """Largest divisor of B giving >= ~target_rows folded rows per grid step
    (MXU M-fill on v6e/v7x; >=128 already saturates v5e)."""
    bb = min(B, max(1, -(-target_rows // T)))
    while B % bb:
        bb -= 1
    return bb


def _sublane_block_b(B):
    """Batch block for kernels whose block sublane dim is the batch axis:
    must be a multiple of 8 or equal to B."""
    if B % 8 == 0 and B > 8:
        return 8
    return B


def run_encoder_stack(x, mask, stacked, *, causal, num_heads, masked,
                      out_dtype=jnp.bfloat16, block_b=None):
    B, T, D = x.shape
    assert D % num_heads == 0
    num_layers = stacked['wqkv'].shape[0]
    bb = block_b or _encoder_block_b(B, T)
    assert B % bb == 0
    weight_args = tuple(stacked[k] for k in _STACK_KEYS)

    in_specs = [pl.BlockSpec((bb, T, D), lambda b: (b, 0, 0))]
    args = [x]
    if masked:
        in_specs.append(pl.BlockSpec((bb, T, 1), lambda b: (b, 0, 0)))
        args.append(mask)
    in_specs += [_full_spec(a) for a in weight_args]
    args += list(weight_args)

    # TODO(synk): on v7x, mark the 11 grid-invariant weight specs with
    # pipeline_mode=pl.Buffered(1) to halve their VMEM footprint at large D/DFF/NL.
    return pl.pallas_call(
        functools.partial(encoder_stack_kernel, num_heads=num_heads,
                          num_layers=num_layers, causal=causal, masked=masked,
                          bb=bb, seq_len=T),
        grid=(B // bb,),
        out_shape=jax.ShapeDtypeStruct((B, T, D), out_dtype),
        in_specs=in_specs,
        out_specs=pl.BlockSpec((bb, T, D), lambda b: (b, 0, 0)),
        compiler_params=pltpu.CompilerParams(dimension_semantics=("parallel",),
                                             vmem_limit_bytes=_VMEM_LIMIT),
    )(*args)


def run_tokens(variety, user_features, wv, bv, wu, bu,
               *, out_dtype=jnp.bfloat16, block_b=None):
    B, L, V = variety.shape
    S = user_features.shape[1]
    D = wv.shape[1]
    bb = block_b or _sublane_block_b(B)
    assert B % bb == 0
    return pl.pallas_call(
        functools.partial(tokens_kernel, bb=bb),
        grid=(B // bb,),
        out_shape=jax.ShapeDtypeStruct((B, V + S, D), out_dtype),
        in_specs=[pl.BlockSpec((bb, L, V), lambda b: (b, 0, 0)),
                  pl.BlockSpec((bb, S), lambda b: (b, 0)),
                  _full_spec(wv), _full_spec(bv), _full_spec(wu), _full_spec(bu)],
        out_specs=pl.BlockSpec((bb, V + S, D), lambda b: (b, 0, 0)),
        compiler_params=pltpu.CompilerParams(dimension_semantics=("parallel",),
                                             vmem_limit_bytes=_VMEM_LIMIT),
    )(variety, user_features, wv, bv, wu, bu)


def run_var_proj(tokens, wp, bp, *, num_var, out_dtype=jnp.bfloat16, block_b=None):
    B, TOK, D = tokens.shape
    L = wp.shape[1]
    bb = block_b or _sublane_block_b(B)
    assert B % bb == 0
    return pl.pallas_call(
        functools.partial(var_proj_kernel, bb=bb, num_var=num_var),
        grid=(B // bb,),
        out_shape=jax.ShapeDtypeStruct((B, L, num_var), out_dtype),
        in_specs=[pl.BlockSpec((bb, TOK, D), lambda b: (b, 0, 0)),
                  _full_spec(wp), _full_spec(bp)],
        out_specs=pl.BlockSpec((bb, L, num_var), lambda b: (b, 0, 0)),
        compiler_params=pltpu.CompilerParams(dimension_semantics=("parallel",),
                                             vmem_limit_bytes=_VMEM_LIMIT),
    )(tokens, wp, bp)


def run_loss(feat, tout, disc, inv, bias, mask, *, alpha, block_b=None):
    _, B, L, D = feat.shape
    V = disc.shape[-1]
    bb = block_b or _sublane_block_b(B)
    assert B % bb == 0
    nb = B // bb

    num_p, den_p = pl.pallas_call(
        functools.partial(loss_kernel, alpha=alpha),
        grid=(nb,),
        out_shape=(jax.ShapeDtypeStruct((nb, 1, 1), jnp.float32),
                   jax.ShapeDtypeStruct((nb, 1, 1), jnp.float32)),
        in_specs=[pl.BlockSpec((2, bb, L, D), lambda i: (0, i, 0, 0)),
                  pl.BlockSpec((bb, L, D), lambda i: (i, 0, 0)),
                  pl.BlockSpec((2, bb, L, V), lambda i: (0, i, 0, 0)),
                  pl.BlockSpec((bb, L, V), lambda i: (i, 0, 0)),
                  pl.BlockSpec((2, bb, L), lambda i: (0, i, 0)),
                  pl.BlockSpec((bb, L), lambda i: (i, 0))],
        out_specs=(pl.BlockSpec((1, 1, 1), lambda i: (i, 0, 0)),
                   pl.BlockSpec((1, 1, 1), lambda i: (i, 0, 0))),
        compiler_params=pltpu.CompilerParams(dimension_semantics=("parallel",),
                                             vmem_limit_bytes=_VMEM_LIMIT),
    )(feat, tout, disc, inv, bias, mask)

    return jnp.sum(num_p) / (jnp.sum(den_p) + 1e-24)


# -----------------------------------------------------------------------------
# TCTRec forward (glue + Pallas hot paths)
# -----------------------------------------------------------------------------
def tctrec_forward(params, user_ids, user_discrete_data, input_seq,
                   seq_item_discrete_data, pos_seq, pos_item_discrete_data,
                   neg_seq, neg_item_discrete_data, ratings, timestamps,
                   *, alpha, num_heads):
    # user_features = cat(user_ids.unsqueeze(-1), user_discrete_data)  -> (B, S)
    if user_discrete_data is not None:
        user_features = jnp.concatenate(
            [user_ids[:, None].astype(jnp.float32),
             user_discrete_data.astype(jnp.float32)], axis=-1)
    else:
        user_features = user_ids[:, None].astype(jnp.float32)
    # variety = cat([seq_item_discrete_data, timestamps, ratings])     -> (B, L, V)
    variety = jnp.concatenate(
        [seq_item_discrete_data, timestamps[..., None], ratings[..., None]], axis=-1)
    mask = (input_seq != 0).astype(jnp.float32)[..., None]              # (B, L, 1)

    item_emb = params['item_embedding']

    # ---- temporal (sequence-dim) transformer branch -> (B, L, D) ----
    # TODO(synk): at production vocab sizes, move these embedding gathers into a
    # scalar-prefetch Pallas gather feeding the encoder/loss kernels directly.
    temporal_stacked = _stack_layer_params(params['temporal_layers'], num_heads)
    x = item_emb[input_seq] + params['pos_embedding'][None, :, :]
    transformer_output = run_encoder_stack(
        x, mask, temporal_stacked, causal=True, num_heads=num_heads, masked=True)

    # ---- inverted (variate-dim) transformer branch -> (B, L, V) ----
    invert_stacked = _stack_layer_params(params['invert_layers'], num_heads)
    tokens_in = run_tokens(variety, user_features,
                           params['var_embed_w'], params['var_embed_b'],
                           params['user_embed_w'], params['user_embed_b'])
    tokens = run_encoder_stack(
        tokens_in, None, invert_stacked, causal=False, num_heads=num_heads,
        masked=False)
    invert_transformer_output = run_var_proj(
        tokens, params['var_proj_w'], params['var_proj_b'],
        num_var=variety.shape[-1])                                       # (B, L, V)

    # ---- fused logits + masked BCE loss (Pallas, tiled over B), pos/neg stacked ----
    item_feat = jnp.stack([item_emb[pos_seq], item_emb[neg_seq]], axis=0)     # (2,B,L,D)
    disc = jnp.stack([pos_item_discrete_data, neg_item_discrete_data], axis=0)
    bias = jnp.stack([params['item_bias'][pos_seq],
                      params['item_bias'][neg_seq]], axis=0)                  # (2,B,L)
    return run_loss(item_feat, transformer_output, disc,
                    invert_transformer_output, bias, mask[..., 0], alpha=alpha)


# -----------------------------------------------------------------------------
# Deterministic parameter init
# -----------------------------------------------------------------------------
def init_params(key, *, num_items, L, D, DFF, S, NL):
    keys = iter(jax.random.split(key, 128))

    def nrm(shape, scale=0.02):
        return (scale * jax.random.normal(next(keys), shape)).astype(jnp.float32)

    def layer():
        return dict(
            wq=nrm((D, D)), wk=nrm((D, D)), wv=nrm((D, D)), wo=nrm((D, D)),
            bo=jnp.zeros((1, D), jnp.float32),
            w1=nrm((D, DFF)), b1=jnp.zeros((1, DFF), jnp.float32),
            w2=nrm((DFF, D)), b2=jnp.zeros((1, D), jnp.float32),
            ln1g=jnp.ones((1, D), jnp.float32), ln1b=jnp.zeros((1, D), jnp.float32),
            ln2g=jnp.ones((1, D), jnp.float32), ln2b=jnp.zeros((1, D), jnp.float32),
        )

    return dict(
        item_embedding=nrm((num_items, D)),
        pos_embedding=nrm((L, D)),
        item_bias=jnp.zeros((num_items,), jnp.float32),     # nn.Parameter(zeros)
        var_embed_w=nrm((L, D)), var_embed_b=jnp.zeros((1, D), jnp.float32),
        user_embed_w=nrm((S, D)), user_embed_b=jnp.zeros((S, D), jnp.float32),
        var_proj_w=nrm((D, L)), var_proj_b=jnp.zeros((1, L), jnp.float32),
        temporal_layers=[layer() for _ in range(NL)],
        invert_layers=[layer() for _ in range(NL)],
    )


# -----------------------------------------------------------------------------
# Example run
# -----------------------------------------------------------------------------
if __name__ == "__main__":
    B, L, D, H, DFF, NL = 2, 8, 32, 2, 32, 2
    NUM_ITEMS = 20 + 1                 # args.num_items + 1
    DIM_USER_DISCRETE = [3, 5]         # -> static_size S = 3
    S = len(DIM_USER_DISCRETE) + 1
    D_ITEM_DISC = 3
    V = D_ITEM_DISC + 2                # variety = item-discrete + timestamp + rating
    ALPHA = 0.5

    root = jax.random.PRNGKey(0)
    kp, k0, k1, k2, k3, k4, k5, k6, k7, k8, k9 = jax.random.split(root, 11)

    params = init_params(kp, num_items=NUM_ITEMS, L=L, D=D, DFF=DFF, S=S, NL=NL)

    user_ids = jax.random.randint(k0, (B,), 1, 10).astype(jnp.int32)
    user_discrete_data = jnp.stack(
        [jax.random.randint(k1, (B,), 0, DIM_USER_DISCRETE[0]),
         jax.random.randint(k2, (B,), 0, DIM_USER_DISCRETE[1])], axis=-1).astype(jnp.int32)
    input_seq = jax.random.randint(k3, (B, L), 0, NUM_ITEMS).astype(jnp.int32)
    seq_item_discrete_data = jax.random.normal(k4, (B, L, D_ITEM_DISC), jnp.float32)
    pos_seq = jax.random.randint(k5, (B, L), 1, NUM_ITEMS).astype(jnp.int32)
    neg_seq = jax.random.randint(k6, (B, L), 1, NUM_ITEMS).astype(jnp.int32)
    # last dim V so it matches invert_transformer_output (see TODO at top).
    pos_item_discrete_data = jax.random.normal(k7, (B, L, V), jnp.float32)
    neg_item_discrete_data = jax.random.normal(k8, (B, L, V), jnp.float32)
    ratings = jax.random.uniform(k9, (B, L), jnp.float32, 1.0, 5.0)
    timestamps = jnp.tile(jnp.arange(L, dtype=jnp.float32)[None, :], (B, 1)) / L

    fwd = jax.jit(functools.partial(tctrec_forward, alpha=ALPHA, num_heads=H))
    loss = fwd(params, user_ids, user_discrete_data, input_seq,
               seq_item_discrete_data, pos_seq, pos_item_discrete_data,
               neg_seq, neg_item_discrete_data, ratings, timestamps)
    loss = jax.block_until_ready(loss)
    assert jnp.isfinite(loss), f"non-finite loss: {loss}"
    print("KERNEL_OK")
</pallas_src>

<mosaic_0001>
module attributes {stable_mosaic.version = 11 : i64} {
  func.func @encoder_stack_kernel(%arg0: i32, %arg1: memref<2x8x32xf32, #tpu.memory_space<vmem>>, %arg2: memref<2x8x1xf32, #tpu.memory_space<vmem>>, %arg3: memref<2x32x96xbf16, #tpu.memory_space<vmem>>, %arg4: memref<2x32x32xbf16, #tpu.memory_space<vmem>>, %arg5: memref<2x1x32xf32, #tpu.memory_space<vmem>>, %arg6: memref<2x32x32xbf16, #tpu.memory_space<vmem>>, %arg7: memref<2x1x32xf32, #tpu.memory_space<vmem>>, %arg8: memref<2x32x32xbf16, #tpu.memory_space<vmem>>, %arg9: memref<2x1x32xf32, #tpu.memory_space<vmem>>, %arg10: memref<2x1x32xf32, #tpu.memory_space<vmem>>, %arg11: memref<2x1x32xf32, #tpu.memory_space<vmem>>, %arg12: memref<2x1x32xf32, #tpu.memory_space<vmem>>, %arg13: memref<2x1x32xf32, #tpu.memory_space<vmem>>, %arg14: memref<2x8x32xbf16, #tpu.memory_space<vmem>>) attributes {dimension_semantics = [#tpu.dimension_semantics<parallel>], iteration_bounds = array<i64: 1>, scalar_prefetch = 0 : i64, scratch_operands = 0 : i64, tpu.core_type = #tpu.core_type<tc>, window_params = [{transform_indices = @transform_0, window_bounds = array<i64: 2, 8, 32>}, {transform_indices = @transform_1, window_bounds = array<i64: 2, 8, 1>}, {pipeline_mode = #tpu.pipeline_mode<synchronous>, transform_indices = @transform_2, window_bounds = array<i64: 2, 32, 96>}, {pipeline_mode = #tpu.pipeline_mode<synchronous>, transform_indices = @transform_3, window_bounds = array<i64: 2, 32, 32>}, {pipeline_mode = #tpu.pipeline_mode<synchronous>, transform_indices = @transform_4, window_bounds = array<i64: 2, 1, 32>}, {pipeline_mode = #tpu.pipeline_mode<synchronous>, transform_indices = @transform_5, window_bounds = array<i64: 2, 32, 32>}, {pipeline_mode = #tpu.pipeline_mode<synchronous>, transform_indices = @transform_6, window_bounds = array<i64: 2, 1, 32>}, {pipeline_mode = #tpu.pipeline_mode<synchronous>, transform_indices = @transform_7, window_bounds = array<i64: 2, 32, 32>}, {pipeline_mode = #tpu.pipeline_mode<synchronous>, transform_indices = @transform_8, window_bounds = array<i64: 2, 1, 32>}, {pipeline_mode = #tpu.pipeline_mode<synchronous>, transform_indices = @transform_9, window_bounds = array<i64: 2, 1, 32>}, {pipeline_mode = #tpu.pipeline_mode<synchronous>, transform_indices = @transform_10, window_bounds = array<i64: 2, 1, 32>}, {pipeline_mode = #tpu.pipeline_mode<synchronous>, transform_indices = @transform_11, window_bounds = array<i64: 2, 1, 32>}, {pipeline_mode = #tpu.pipeline_mode<synchronous>, transform_indices = @transform_12, window_bounds = array<i64: 2, 1, 32>}, {transform_indices = @transform_13, window_bounds = array<i64: 2, 8, 32>}]} {
    %c0 = arith.constant 0 : index
    %c0_0 = arith.constant 0 : index
    %c0_1 = arith.constant 0 : index
    %0 = vector.load %arg1[%c0, %c0_0, %c0_1] : memref<2x8x32xf32, #tpu.memory_space<vmem>>, vector<2x8x32xf32>
    %1 = vector.shape_cast %0 : vector<2x8x32xf32> to vector<16x32xf32>
    %c0_2 = arith.constant 0 : index
    %c0_3 = arith.constant 0 : index
    %c0_4 = arith.constant 0 : index
    %2 = vector.load %arg2[%c0_2, %c0_3, %c0_4] : memref<2x8x1xf32, #tpu.memory_space<vmem>>, vector<2x8x1xf32>
    %3 = vector.shape_cast %2 : vector<2x8x1xf32> to vector<16x1xf32>
    %4 = vector.broadcast %3 : vector<16x1xf32> to vector<16x32xf32>
    %5 = arith.mulf %1, %4 : vector<16x32xf32>
    %6 = tpu.iota {dimensions = array<i32: 0>} : vector<8x8xi32>
    %7 = tpu.iota {dimensions = array<i32: 1>} : vector<8x8xi32>
    %8 = arith.cmpi sle, %7, %6 : vector<8x8xi32>
    %9 = vector.shape_cast %8 : vector<8x8xi1> to vector<1x8x8xi1>
    %c0_5 = arith.constant 0 : index
    %c0_6 = arith.constant 0 : index
    %c0_7 = arith.constant 0 : index
    %10 = vector.load %arg3[%c0_5, %c0_6, %c0_7] : memref<2x32x96xbf16, #tpu.memory_space<vmem>>, vector<1x32x96xbf16>
    %11 = vector.shape_cast %10 : vector<1x32x96xbf16> to vector<32x96xbf16>
    %12 = arith.truncf %5 : vector<16x32xf32> to vector<16x32xbf16>
    %cst = arith.constant dense<0.000000e+00> : vector<16x96xf32>
    %13 = tpu.matmul %12, %11, %cst {dimension_numbers = #tpu.dot_dimension_numbers<[1], [0], [0], [1], [0, 0, 1, 1], [], []>} : vector<16x32xbf16>, vector<32x96xbf16>, vector<16x96xf32> -> vector<16x96xf32>
    %c0_8 = arith.constant 0 : index
    %c0_9 = arith.constant 0 : index
    %c0_10 = arith.constant 0 : index
    %14 = vector.load %arg4[%c0_8, %c0_9, %c0_10] : memref<2x32x32xbf16, #tpu.memory_space<vmem>>, vector<1x32x32xbf16>
    %15 = vector.shape_cast %14 : vector<1x32x32xbf16> to vector<32x32xbf16>
    %16 = vector.extract_strided_slice %13 {offsets = [0, 0], sizes = [16, 16], strides = [1, 1]} : vector<16x96xf32> to vector<16x16xf32>
    %17 = vector.shape_cast %16 : vector<16x16xf32> to vector<2x8x16xf32>
    %18 = vector.extract_strided_slice %13 {offsets = [0, 32], sizes = [16, 16], strides = [1, 1]} : vector<16x96xf32> to vector<16x16xf32>
    %19 = vector.shape_cast %18 : vector<16x16xf32> to vector<2x8x16xf32>
    %20 = vector.extract_strided_slice %13 {offsets = [0, 64], sizes = [16, 16], strides = [1, 1]} : vector<16x96xf32> to vector<16x16xf32>
    %21 = vector.shape_cast %20 : vector<16x16xf32> to vector<2x8x16xf32>
    %22 = arith.truncf %17 : vector<2x8x16xf32> to vector<2x8x16xbf16>
    %23 = arith.truncf %19 : vector<2x8x16xf32> to vector<2x8x16xbf16>
    %cst_11 = arith.constant dense<0.000000e+00> : vector<2x8x8xf32>
    %24 = tpu.matmul %22, %23, %cst_11 {dimension_numbers = #tpu.dot_dimension_numbers<[2], [2], [1], [1], [0, 0, 0, 1, 1, 1], [0], [0]>} : vector<2x8x16xbf16>, vector<2x8x16xbf16>, vector<2x8x8xf32> -> vector<2x8x8xf32>
    %cst_12 = arith.constant -1.000000e+09 : f32
    %25 = vector.shape_cast %9 : vector<1x8x8xi1> to vector<1x8x8xi1>
    %26 = vector.broadcast %25 : vector<1x8x8xi1> to vector<2x8x8xi1>
    %27 = vector.broadcast %cst_12 : f32 to vector<2x8x8xf32>
    %28 = arith.select %26, %24, %27 : vector<2x8x8xi1>, vector<2x8x8xf32>
    %cst_13 = arith.constant dense<0xFF800000> : vector<2x8xf32>
    %29 = vector.multi_reduction <maximumf>, %28, %cst_13 [2] : vector<2x8x8xf32> to vector<2x8xf32>
    %30 = vector.shape_cast %29 : vector<2x8xf32> to vector<2x8x1xf32>
    %31 = vector.broadcast %30 : vector<2x8x1xf32> to vector<2x8x8xf32>
    %32 = arith.subf %28, %31 : vector<2x8x8xf32>
    %33 = math.exp %32 : vector<2x8x8xf32>
    %cst_14 = arith.constant dense<0.000000e+00> : vector<2x8xf32>
    %34 = vector.multi_reduction <add>, %33, %cst_14 [2] : vector<2x8x8xf32> to vector<2x8xf32>
    %35 = vector.shape_cast %34 : vector<2x8xf32> to vector<2x8x1xf32>
    %36 = tpu.reciprocal %35 {approx = true} : vector<2x8x1xf32> -> vector<2x8x1xf32>
    %37 = vector.broadcast %36 : vector<2x8x1xf32> to vector<2x8x8xf32>
    %38 = arith.mulf %33, %37 : vector<2x8x8xf32>
    %39 = arith.truncf %38 : vector<2x8x8xf32> to vector<2x8x8xbf16>
    %40 = arith.truncf %21 : vector<2x8x16xf32> to vector<2x8x16xbf16>
    %cst_15 = arith.constant dense<0.000000e+00> : vector<2x8x16xf32>
    %41 = tpu.matmul %39, %40, %cst_15 {dimension_numbers = #tpu.dot_dimension_numbers<[2], [1], [1], [2], [0, 0, 0, 1, 1, 2], [0], [0]>} : vector<2x8x8xbf16>, vector<2x8x16xbf16>, vector<2x8x16xf32> -> vector<2x8x16xf32>
    %42 = vector.shape_cast %41 : vector<2x8x16xf32> to vector<16x16xf32>
    %43 = vector.extract_strided_slice %15 {offsets = [0, 0], sizes = [16, 32], strides = [1, 1]} : vector<32x32xbf16> to vector<16x32xbf16>
    %44 = arith.truncf %42 : vector<16x16xf32> to vector<16x16xbf16>
    %cst_16 = arith.constant dense<0.000000e+00> : vector<16x32xf32>
    %45 = tpu.matmul %44, %43, %cst_16 {dimension_numbers = #tpu.dot_dimension_numbers<[1], [0], [0], [1], [0, 0, 1, 1], [], []>} : vector<16x16xbf16>, vector<16x32xbf16>, vector<16x32xf32> -> vector<16x32xf32>
    %46 = vector.extract_strided_slice %13 {offsets = [0, 16], sizes = [16, 16], strides = [1, 1]} : vector<16x96xf32> to vector<16x16xf32>
    %47 = vector.shape_cast %46 : vector<16x16xf32> to vector<2x8x16xf32>
    %48 = vector.extract_strided_slice %13 {offsets = [0, 48], sizes = [16, 16], strides = [1, 1]} : vector<16x96xf32> to vector<16x16xf32>
    %49 = vector.shape_cast %48 : vector<16x16xf32> to vector<2x8x16xf32>
    %50 = vector.extract_strided_slice %13 {offsets = [0, 80], sizes = [16, 16], strides = [1, 1]} : vector<16x96xf32> to vector<16x16xf32>
    %51 = vector.shape_cast %50 : vector<16x16xf32> to vector<2x8x16xf32>
    %52 = arith.truncf %47 : vector<2x8x16xf32> to vector<2x8x16xbf16>
    %53 = arith.truncf %49 : vector<2x8x16xf32> to vector<2x8x16xbf16>
    %cst_17 = arith.constant dense<0.000000e+00> : vector<2x8x8xf32>
    %54 = tpu.matmul %52, %53, %cst_17 {dimension_numbers = #tpu.dot_dimension_numbers<[2], [2], [1], [1], [0, 0, 0, 1, 1, 1], [0], [0]>} : vector<2x8x16xbf16>, vector<2x8x16xbf16>, vector<2x8x8xf32> -> vector<2x8x8xf32>
    %cst_18 = arith.constant -1.000000e+09 : f32
    %55 = vector.shape_cast %9 : vector<1x8x8xi1> to vector<1x8x8xi1>
    %56 = vector.broadcast %55 : vector<1x8x8xi1> to vector<2x8x8xi1>
    %57 = vector.broadcast %cst_18 : f32 to vector<2x8x8xf32>
    %58 = arith.select %56, %54, %57 : vector<2x8x8xi1>, vector<2x8x8xf32>
    %cst_19 = arith.constant dense<0xFF800000> : vector<2x8xf32>
    %59 = vector.multi_reduction <maximumf>, %58, %cst_19 [2] : vector<2x8x8xf32> to vector<2x8xf32>
    %60 = vector.shape_cast %59 : vector<2x8xf32> to vector<2x8x1xf32>
    %61 = vector.broadcast %60 : vector<2x8x1xf32> to vector<2x8x8xf32>
    %62 = arith.subf %58, %61 : vector<2x8x8xf32>
    %63 = math.exp %62 : vector<2x8x8xf32>
    %cst_20 = arith.constant dense<0.000000e+00> : vector<2x8xf32>
    %64 = vector.multi_reduction <add>, %63, %cst_20 [2] : vector<2x8x8xf32> to vector<2x8xf32>
    %65 = vector.shape_cast %64 : vector<2x8xf32> to vector<2x8x1xf32>
    %66 = tpu.reciprocal %65 {approx = true} : vector<2x8x1xf32> -> vector<2x8x1xf32>
    %67 = vector.broadcast %66 : vector<2x8x1xf32> to vector<2x8x8xf32>
    %68 = arith.mulf %63, %67 : vector<2x8x8xf32>
    %69 = arith.truncf %68 : vector<2x8x8xf32> to vector<2x8x8xbf16>
    %70 = arith.truncf %51 : vector<2x8x16xf32> to vector<2x8x16xbf16>
    %cst_21 = arith.constant dense<0.000000e+00> : vector<2x8x16xf32>
    %71 = tpu.matmul %69, %70, %cst_21 {dimension_numbers = #tpu.dot_dimension_numbers<[2], [1], [1], [2], [0, 0, 0, 1, 1, 2], [0], [0]>} : vector<2x8x8xbf16>, vector<2x8x16xbf16>, vector<2x8x16xf32> -> vector<2x8x16xf32>
    %72 = vector.shape_cast %71 : vector<2x8x16xf32> to vector<16x16xf32>
    %73 = vector.extract_strided_slice %15 {offsets = [16, 0], sizes = [16, 32], strides = [1, 1]} : vector<32x32xbf16> to vector<16x32xbf16>
    %74 = arith.truncf %72 : vector<16x16xf32> to vector<16x16xbf16>
    %cst_22 = arith.constant dense<0.000000e+00> : vector<16x32xf32>
    %75 = tpu.matmul %74, %73, %cst_22 {dimension_numbers = #tpu.dot_dimension_numbers<[1], [0], [0], [1], [0, 0, 1, 1], [], []>} : vector<16x16xbf16>, vector<16x32xbf16>, vector<16x32xf32> -> vector<16x32xf32>
    %76 = arith.addf %45, %75 : vector<16x32xf32>
    %c0_23 = arith.constant 0 : index
    %c0_24 = arith.constant 0 : index
    %c0_25 = arith.constant 0 : index
    %77 = vector.load %arg5[%c0_23, %c0_24, %c0_25] : memref<2x1x32xf32, #tpu.memory_space<vmem>>, vector<1x1x32xf32>
    %78 = vector.shape_cast %77 : vector<1x1x32xf32> to vector<1x32xf32>
    %79 = vector.broadcast %78 : vector<1x32xf32> to vector<16x32xf32>
    %80 = arith.addf %76, %79 : vector<16x32xf32>
    %81 = arith.addf %5, %80 : vector<16x32xf32>
    %c0_26 = arith.constant 0 : index
    %c0_27 = arith.constant 0 : index
    %c0_28 = arith.constant 0 : index
    %82 = vector.load %arg10[%c0_26, %c0_27, %c0_28] : memref<2x1x32xf32, #tpu.memory_space<vmem>>, vector<1x1x32xf32>
    %83 = vector.shape_cast %82 : vector<1x1x32xf32> to vector<1x32xf32>
    %c0_29 = arith.constant 0 : index
    %c0_30 = arith.constant 0 : index
    %c0_31 = arith.constant 0 : index
    %84 = vector.load %arg11[%c0_29, %c0_30, %c0_31] : memref<2x1x32xf32, #tpu.memory_space<vmem>>, vector<1x1x32xf32>
    %85 = vector.shape_cast %84 : vector<1x1x32xf32> to vector<1x32xf32>
    %cst_32 = arith.constant dense<0.000000e+00> : vector<16xf32>
    %86 = vector.multi_reduction <add>, %81, %cst_32 [1] : vector<16x32xf32> to vector<16xf32>
    %87 = vector.shape_cast %86 : vector<16xf32> to vector<16x1xf32>
    %cst_33 = arith.constant 3.200000e+01 : f32
    %88 = vector.broadcast %cst_33 : f32 to vector<16x1xf32>
    %89 = arith.divf %87, %88 : vector<16x1xf32>
    %90 = vector.broadcast %89 : vector<16x1xf32> to vector<16x32xf32>
    %91 = arith.subf %81, %90 : vector<16x32xf32>
    %92 = arith.mulf %91, %91 : vector<16x32xf32>
    %cst_34 = arith.constant dense<0.000000e+00> : vector<16xf32>
    %93 = vector.multi_reduction <add>, %92, %cst_34 [1] : vector<16x32xf32> to vector<16xf32>
    %94 = vector.shape_cast %93 : vector<16xf32> to vector<16x1xf32>
    %cst_35 = arith.constant 3.200000e+01 : f32
    %95 = vector.broadcast %cst_35 : f32 to vector<16x1xf32>
    %96 = arith.divf %94, %95 : vector<16x1xf32>
    %97 = vector.broadcast %89 : vector<16x1xf32> to vector<16x32xf32>
    %98 = arith.subf %81, %97 : vector<16x32xf32>
    %cst_36 = arith.constant 9.99999974E-6 : f32
    %99 = vector.broadcast %cst_36 : f32 to vector<16x1xf32>
    %100 = arith.addf %96, %99 : vector<16x1xf32>
    %101 = math.rsqrt %100 : vector<16x1xf32>
    %102 = vector.broadcast %101 : vector<16x1xf32> to vector<16x32xf32>
    %103 = arith.mulf %98, %102 : vector<16x32xf32>
    %104 = vector.broadcast %83 : vector<1x32xf32> to vector<16x32xf32>
    %105 = arith.mulf %103, %104 : vector<16x32xf32>
    %106 = vector.broadcast %85 : vector<1x32xf32> to vector<16x32xf32>
    %107 = arith.addf %105, %106 : vector<16x32xf32>
    %c0_37 = arith.constant 0 : index
    %c0_38 = arith.constant 0 : index
    %c0_39 = arith.constant 0 : index
    %108 = vector.load %arg6[%c0_37, %c0_38, %c0_39] : memref<2x32x32xbf16, #tpu.memory_space<vmem>>, vector<1x32x32xbf16>
    %109 = vector.shape_cast %108 : vector<1x32x32xbf16> to vector<32x32xbf16>
    %110 = arith.truncf %107 : vector<16x32xf32> to vector<16x32xbf16>
    %cst_40 = arith.constant dense<0.000000e+00> : vector<16x32xf32>
    %111 = tpu.matmul %110, %109, %cst_40 {dimension_numbers = #tpu.dot_dimension_numbers<[1], [0], [0], [1], [0, 0, 1, 1], [], []>} : vector<16x32xbf16>, vector<32x32xbf16>, vector<16x32xf32> -> vector<16x32xf32>
    %c0_41 = arith.constant 0 : index
    %c0_42 = arith.constant 0 : index
    %c0_43 = arith.constant 0 : index
    %112 = vector.load %arg7[%c0_41, %c0_42, %c0_43] : memref<2x1x32xf32, #tpu.memory_space<vmem>>, vector<1x1x32xf32>
    %113 = vector.shape_cast %112 : vector<1x1x32xf32> to vector<1x32xf32>
    %114 = vector.broadcast %113 : vector<1x32xf32> to vector<16x32xf32>
    %115 = arith.addf %111, %114 : vector<16x32xf32>
    %cst_44 = arith.constant 0.000000e+00 : f32
    %116 = vector.broadcast %cst_44 : f32 to vector<16x32xf32>
    %117 = arith.maximumf %115, %116 : vector<16x32xf32>
    %c0_45 = arith.constant 0 : index
    %c0_46 = arith.constant 0 : index
    %c0_47 = arith.constant 0 : index
    %118 = vector.load %arg8[%c0_45, %c0_46, %c0_47] : memref<2x32x32xbf16, #tpu.memory_space<vmem>>, vector<1x32x32xbf16>
    %119 = vector.shape_cast %118 : vector<1x32x32xbf16> to vector<32x32xbf16>
    %120 = arith.truncf %117 : vector<16x32xf32> to vector<16x32xbf16>
    %cst_48 = arith.constant dense<0.000000e+00> : vector<16x32xf32>
    %121 = tpu.matmul %120, %119, %cst_48 {dimension_numbers = #tpu.dot_dimension_numbers<[1], [0], [0], [1], [0, 0, 1, 1], [], []>} : vector<16x32xbf16>, vector<32x32xbf16>, vector<16x32xf32> -> vector<16x32xf32>
    %c0_49 = arith.constant 0 : index
    %c0_50 = arith.constant 0 : index
    %c0_51 = arith.constant 0 : index
    %122 = vector.load %arg9[%c0_49, %c0_50, %c0_51] : memref<2x1x32xf32, #tpu.memory_space<vmem>>, vector<1x1x32xf32>
    %123 = vector.shape_cast %122 : vector<1x1x32xf32> to vector<1x32xf32>
    %124 = vector.broadcast %123 : vector<1x32xf32> to vector<16x32xf32>
    %125 = arith.addf %121, %124 : vector<16x32xf32>
    %126 = arith.addf %107, %125 : vector<16x32xf32>
    %c0_52 = arith.constant 0 : index
    %c0_53 = arith.constant 0 : index
    %c0_54 = arith.constant 0 : index
    %127 = vector.load %arg12[%c0_52, %c0_53, %c0_54] : memref<2x1x32xf32, #tpu.memory_space<vmem>>, vector<1x1x32xf32>
    %128 = vector.shape_cast %127 : vector<1x1x32xf32> to vector<1x32xf32>
    %c0_55 = arith.constant 0 : index
    %c0_56 = arith.constant 0 : index
    %c0_57 = arith.constant 0 : index
    %129 = vector.load %arg13[%c0_55, %c0_56, %c0_57] : memref<2x1x32xf32, #tpu.memory_space<vmem>>, vector<1x1x32xf32>
    %130 = vector.shape_cast %129 : vector<1x1x32xf32> to vector<1x32xf32>
    %cst_58 = arith.constant dense<0.000000e+00> : vector<16xf32>
    %131 = vector.multi_reduction <add>, %126, %cst_58 [1] : vector<16x32xf32> to vector<16xf32>
    %132 = vector.shape_cast %131 : vector<16xf32> to vector<16x1xf32>
    %cst_59 = arith.constant 3.200000e+01 : f32
    %133 = vector.broadcast %cst_59 : f32 to vector<16x1xf32>
    %134 = arith.divf %132, %133 : vector<16x1xf32>
    %135 = vector.broadcast %134 : vector<16x1xf32> to vector<16x32xf32>
    %136 = arith.subf %126, %135 : vector<16x32xf32>
    %137 = arith.mulf %136, %136 : vector<16x32xf32>
    %cst_60 = arith.constant dense<0.000000e+00> : vector<16xf32>
    %138 = vector.multi_reduction <add>, %137, %cst_60 [1] : vector<16x32xf32> to vector<16xf32>
    %139 = vector.shape_cast %138 : vector<16xf32> to vector<16x1xf32>
    %cst_61 = arith.constant 3.200000e+01 : f32
    %140 = vector.broadcast %cst_61 : f32 to vector<16x1xf32>
    %141 = arith.divf %139, %140 : vector<16x1xf32>
    %142 = vector.broadcast %134 : vector<16x1xf32> to vector<16x32xf32>
    %143 = arith.subf %126, %142 : vector<16x32xf32>
    %cst_62 = arith.constant 9.99999974E-6 : f32
    %144 = vector.broadcast %cst_62 : f32 to vector<16x1xf32>
    %145 = arith.addf %141, %144 : vector<16x1xf32>
    %146 = math.rsqrt %145 : vector<16x1xf32>
    %147 = vector.broadcast %146 : vector<16x1xf32> to vector<16x32xf32>
    %148 = arith.mulf %143, %147 : vector<16x32xf32>
    %149 = vector.broadcast %128 : vector<1x32xf32> to vector<16x32xf32>
    %150 = arith.mulf %148, %149 : vector<16x32xf32>
    %151 = vector.broadcast %130 : vector<1x32xf32> to vector<16x32xf32>
    %152 = arith.addf %150, %151 : vector<16x32xf32>
    %153 = vector.broadcast %3 : vector<16x1xf32> to vector<16x32xf32>
    %154 = arith.mulf %152, %153 : vector<16x32xf32>
    %c1 = arith.constant 1 : index
    %c0_63 = arith.constant 0 : index
    %c0_64 = arith.constant 0 : index
    %155 = vector.load %arg3[%c1, %c0_63, %c0_64] : memref<2x32x96xbf16, #tpu.memory_space<vmem>>, vector<1x32x96xbf16>
    %156 = vector.shape_cast %155 : vector<1x32x96xbf16> to vector<32x96xbf16>
    %157 = arith.truncf %154 : vector<16x32xf32> to vector<16x32xbf16>
    %cst_65 = arith.constant dense<0.000000e+00> : vector<16x96xf32>
    %158 = tpu.matmul %157, %156, %cst_65 {dimension_numbers = #tpu.dot_dimension_numbers<[1], [0], [0], [1], [0, 0, 1, 1], [], []>} : vector<16x32xbf16>, vector<32x96xbf16>, vector<16x96xf32> -> vector<16x96xf32>
    %c1_66 = arith.constant 1 : index
    %c0_67 = arith.constant 0 : index
    %c0_68 = arith.constant 0 : index
    %159 = vector.load %arg4[%c1_66, %c0_67, %c0_68] : memref<2x32x32xbf16, #tpu.memory_space<vmem>>, vector<1x32x32xbf16>
    %160 = vector.shape_cast %159 : vector<1x32x32xbf16> to vector<32x32xbf16>
    %161 = vector.extract_strided_slice %158 {offsets = [0, 0], sizes = [16, 16], strides = [1, 1]} : vector<16x96xf32> to vector<16x16xf32>
    %162 = vector.shape_cast %161 : vector<16x16xf32> to vector<2x8x16xf32>
    %163 = vector.extract_strided_slice %158 {offsets = [0, 32], sizes = [16, 16], strides = [1, 1]} : vector<16x96xf32> to vector<16x16xf32>
    %164 = vector.shape_cast %163 : vector<16x16xf32> to vector<2x8x16xf32>
    %165 = vector.extract_strided_slice %158 {offsets = [0, 64], sizes = [16, 16], strides = [1, 1]} : vector<16x96xf32> to vector<16x16xf32>
    %166 = vector.shape_cast %165 : vector<16x16xf32> to vector<2x8x16xf32>
    %167 = arith.truncf %162 : vector<2x8x16xf32> to vector<2x8x16xbf16>
    %168 = arith.truncf %164 : vector<2x8x16xf32> to vector<2x8x16xbf16>
    %cst_69 = arith.constant dense<0.000000e+00> : vector<2x8x8xf32>
    %169 = tpu.matmul %167, %168, %cst_69 {dimension_numbers = #tpu.dot_dimension_numbers<[2], [2], [1], [1], [0, 0, 0, 1, 1, 1], [0], [0]>} : vector<2x8x16xbf16>, vector<2x8x16xbf16>, vector<2x8x8xf32> -> vector<2x8x8xf32>
    %cst_70 = arith.constant -1.000000e+09 : f32
    %170 = vector.shape_cast %9 : vector<1x8x8xi1> to vector<1x8x8xi1>
    %171 = vector.broadcast %170 : vector<1x8x8xi1> to vector<2x8x8xi1>
    %172 = vector.broadcast %cst_70 : f32 to vector<2x8x8xf32>
    %173 = arith.select %171, %169, %172 : vector<2x8x8xi1>, vector<2x8x8xf32>
    %cst_71 = arith.constant dense<0xFF800000> : vector<2x8xf32>
    %174 = vector.multi_reduction <maximumf>, %173, %cst_71 [2] : vector<2x8x8xf32> to vector<2x8xf32>
    %175 = vector.shape_cast %174 : vector<2x8xf32> to vector<2x8x1xf32>
    %176 = vector.broadcast %175 : vector<2x8x1xf32> to vector<2x8x8xf32>
    %177 = arith.subf %173, %176 : vector<2x8x8xf32>
    %178 = math.exp %177 : vector<2x8x8xf32>
    %cst_72 = arith.constant dense<0.000000e+00> : vector<2x8xf32>
    %179 = vector.multi_reduction <add>, %178, %cst_72 [2] : vector<2x8x8xf32> to vector<2x8xf32>
    %180 = vector.shape_cast %179 : vector<2x8xf32> to vector<2x8x1xf32>
    %181 = tpu.reciprocal %180 {approx = true} : vector<2x8x1xf32> -> vector<2x8x1xf32>
    %182 = vector.broadcast %181 : vector<2x8x1xf32> to vector<2x8x8xf32>
    %183 = arith.mulf %178, %182 : vector<2x8x8xf32>
    %184 = arith.truncf %183 : vector<2x8x8xf32> to vector<2x8x8xbf16>
    %185 = arith.truncf %166 : vector<2x8x16xf32> to vector<2x8x16xbf16>
    %cst_73 = arith.constant dense<0.000000e+00> : vector<2x8x16xf32>
    %186 = tpu.matmul %184, %185, %cst_73 {dimension_numbers = #tpu.dot_dimension_numbers<[2], [1], [1], [2], [0, 0, 0, 1, 1, 2], [0], [0]>} : vector<2x8x8xbf16>, vector<2x8x16xbf16>, vector<2x8x16xf32> -> vector<2x8x16xf32>
    %187 = vector.shape_cast %186 : vector<2x8x16xf32> to vector<16x16xf32>
    %188 = vector.extract_strided_slice %160 {offsets = [0, 0], sizes = [16, 32], strides = [1, 1]} : vector<32x32xbf16> to vector<16x32xbf16>
    %189 = arith.truncf %187 : vector<16x16xf32> to vector<16x16xbf16>
    %cst_74 = arith.constant dense<0.000000e+00> : vector<16x32xf32>
    %190 = tpu.matmul %189, %188, %cst_74 {dimension_numbers = #tpu.dot_dimension_numbers<[1], [0], [0], [1], [0, 0, 1, 1], [], []>} : vector<16x16xbf16>, vector<16x32xbf16>, vector<16x32xf32> -> vector<16x32xf32>
    %191 = vector.extract_strided_slice %158 {offsets = [0, 16], sizes = [16, 16], strides = [1, 1]} : vector<16x96xf32> to vector<16x16xf32>
    %192 = vector.shape_cast %191 : vector<16x16xf32> to vector<2x8x16xf32>
    %193 = vector.extract_strided_slice %158 {offsets = [0, 48], sizes = [16, 16], strides = [1, 1]} : vector<16x96xf32> to vector<16x16xf32>
    %194 = vector.shape_cast %193 : vector<16x16xf32> to vector<2x8x16xf32>
    %195 = vector.extract_strided_slice %158 {offsets = [0, 80], sizes = [16, 16], strides = [1, 1]} : vector<16x96xf32> to vector<16x16xf32>
    %196 = vector.shape_cast %195 : vector<16x16xf32> to vector<2x8x16xf32>
    %197 = arith.truncf %192 : vector<2x8x16xf32> to vector<2x8x16xbf16>
    %198 = arith.truncf %194 : vector<2x8x16xf32> to vector<2x8x16xbf16>
    %cst_75 = arith.constant dense<0.000000e+00> : vector<2x8x8xf32>
    %199 = tpu.matmul %197, %198, %cst_75 {dimension_numbers = #tpu.dot_dimension_numbers<[2], [2], [1], [1], [0, 0, 0, 1, 1, 1], [0], [0]>} : vector<2x8x16xbf16>, vector<2x8x16xbf16>, vector<2x8x8xf32> -> vector<2x8x8xf32>
    %cst_76 = arith.constant -1.000000e+09 : f32
    %200 = vector.shape_cast %9 : vector<1x8x8xi1> to vector<1x8x8xi1>
    %201 = vector.broadcast %200 : vector<1x8x8xi1> to vector<2x8x8xi1>
    %202 = vector.broadcast %cst_76 : f32 to vector<2x8x8xf32>
    %203 = arith.select %201, %199, %202 : vector<2x8x8xi1>, vector<2x8x8xf32>
    %cst_77 = arith.constant dense<0xFF800000> : vector<2x8xf32>
    %204 = vector.multi_reduction <maximumf>, %203, %cst_77 [2] : vector<2x8x8xf32> to vector<2x8xf32>
    %205 = vector.shape_cast %204 : vector<2x8xf32> to vector<2x8x1xf32>
    %206 = vector.broadcast %205 : vector<2x8x1xf32> to vector<2x8x8xf32>
    %207 = arith.subf %203, %206 : vector<2x8x8xf32>
    %208 = math.exp %207 : vector<2x8x8xf32>
    %cst_78 = arith.constant dense<0.000000e+00> : vector<2x8xf32>
    %209 = vector.multi_reduction <add>, %208, %cst_78 [2] : vector<2x8x8xf32> to vector<2x8xf32>
    %210 = vector.shape_cast %209 : vector<2x8xf32> to vector<2x8x1xf32>
    %211 = tpu.reciprocal %210 {approx = true} : vector<2x8x1xf32> -> vector<2x8x1xf32>
    %212 = vector.broadcast %211 : vector<2x8x1xf32> to vector<2x8x8xf32>
    %213 = arith.mulf %208, %212 : vector<2x8x8xf32>
    %214 = arith.truncf %213 : vector<2x8x8xf32> to vector<2x8x8xbf16>
    %215 = arith.truncf %196 : vector<2x8x16xf32> to vector<2x8x16xbf16>
    %cst_79 = arith.constant dense<0.000000e+00> : vector<2x8x16xf32>
    %216 = tpu.matmul %214, %215, %cst_79 {dimension_numbers = #tpu.dot_dimension_numbers<[2], [1], [1], [2], [0, 0, 0, 1, 1, 2], [0], [0]>} : vector<2x8x8xbf16>, vector<2x8x16xbf16>, vector<2x8x16xf32> -> vector<2x8x16xf32>
    %217 = vector.shape_cast %216 : vector<2x8x16xf32> to vector<16x16xf32>
    %218 = vector.extract_strided_slice %160 {offsets = [16, 0], sizes = [16, 32], strides = [1, 1]} : vector<32x32xbf16> to vector<16x32xbf16>
    %219 = arith.truncf %217 : vector<16x16xf32> to vector<16x16xbf16>
    %cst_80 = arith.constant dense<0.000000e+00> : vector<16x32xf32>
    %220 = tpu.matmul %219, %218, %cst_80 {dimension_numbers = #tpu.dot_dimension_numbers<[1], [0], [0], [1], [0, 0, 1, 1], [], []>} : vector<16x16xbf16>, vector<16x32xbf16>, vector<16x32xf32> -> vector<16x32xf32>
    %221 = arith.addf %190, %220 : vector<16x32xf32>
    %c1_81 = arith.constant 1 : index
    %c0_82 = arith.constant 0 : index
    %c0_83 = arith.constant 0 : index
    %222 = vector.load %arg5[%c1_81, %c0_82, %c0_83] : memref<2x1x32xf32, #tpu.memory_space<vmem>>, vector<1x1x32xf32>
    %223 = vector.shape_cast %222 : vector<1x1x32xf32> to vector<1x32xf32>
    %224 = vector.broadcast %223 : vector<1x32xf32> to vector<16x32xf32>
    %225 = arith.addf %221, %224 : vector<16x32xf32>
    %226 = arith.addf %154, %225 : vector<16x32xf32>
    %c1_84 = arith.constant 1 : index
    %c0_85 = arith.constant 0 : index
    %c0_86 = arith.constant 0 : index
    %227 = vector.load %arg10[%c1_84, %c0_85, %c0_86] : memref<2x1x32xf32, #tpu.memory_space<vmem>>, vector<1x1x32xf32>
    %228 = vector.shape_cast %227 : vector<1x1x32xf32> to vector<1x32xf32>
    %c1_87 = arith.constant 1 : index
    %c0_88 = arith.constant 0 : index
    %c0_89 = arith.constant 0 : index
    %229 = vector.load %arg11[%c1_87, %c0_88, %c0_89] : memref<2x1x32xf32, #tpu.memory_space<vmem>>, vector<1x1x32xf32>
    %230 = vector.shape_cast %229 : vector<1x1x32xf32> to vector<1x32xf32>
    %cst_90 = arith.constant dense<0.000000e+00> : vector<16xf32>
    %231 = vector.multi_reduction <add>, %226, %cst_90 [1] : vector<16x32xf32> to vector<16xf32>
    %232 = vector.shape_cast %231 : vector<16xf32> to vector<16x1xf32>
    %cst_91 = arith.constant 3.200000e+01 : f32
    %233 = vector.broadcast %cst_91 : f32 to vector<16x1xf32>
    %234 = arith.divf %232, %233 : vector<16x1xf32>
    %235 = vector.broadcast %234 : vector<16x1xf32> to vector<16x32xf32>
    %236 = arith.subf %226, %235 : vector<16x32xf32>
    %237 = arith.mulf %236, %236 : vector<16x32xf32>
    %cst_92 = arith.constant dense<0.000000e+00> : vector<16xf32>
    %238 = vector.multi_reduction <add>, %237, %cst_92 [1] : vector<16x32xf32> to vector<16xf32>
    %239 = vector.shape_cast %238 : vector<16xf32> to vector<16x1xf32>
    %cst_93 = arith.constant 3.200000e+01 : f32
    %240 = vector.broadcast %cst_93 : f32 to vector<16x1xf32>
    %241 = arith.divf %239, %240 : vector<16x1xf32>
    %242 = vector.broadcast %234 : vector<16x1xf32> to vector<16x32xf32>
    %243 = arith.subf %226, %242 : vector<16x32xf32>
    %cst_94 = arith.constant 9.99999974E-6 : f32
    %244 = vector.broadcast %cst_94 : f32 to vector<16x1xf32>
    %245 = arith.addf %241, %244 : vector<16x1xf32>
    %246 = math.rsqrt %245 : vector<16x1xf32>
    %247 = vector.broadcast %246 : vector<16x1xf32> to vector<16x32xf32>
    %248 = arith.mulf %243, %247 : vector<16x32xf32>
    %249 = vector.broadcast %228 : vector<1x32xf32> to vector<16x32xf32>
    %250 = arith.mulf %248, %249 : vector<16x32xf32>
    %251 = vector.broadcast %230 : vector<1x32xf32> to vector<16x32xf32>
    %252 = arith.addf %250, %251 : vector<16x32xf32>
    %c1_95 = arith.constant 1 : index
    %c0_96 = arith.constant 0 : index
    %c0_97 = arith.constant 0 : index
    %253 = vector.load %arg6[%c1_95, %c0_96, %c0_97] : memref<2x32x32xbf16, #tpu.memory_space<vmem>>, vector<1x32x32xbf16>
    %254 = vector.shape_cast %253 : vector<1x32x32xbf16> to vector<32x32xbf16>
    %255 = arith.truncf %252 : vector<16x32xf32> to vector<16x32xbf16>
    %cst_98 = arith.constant dense<0.000000e+00> : vector<16x32xf32>
    %256 = tpu.matmul %255, %254, %cst_98 {dimension_numbers = #tpu.dot_dimension_numbers<[1], [0], [0], [1], [0, 0, 1, 1], [], []>} : vector<16x32xbf16>, vector<32x32xbf16>, vector<16x32xf32> -> vector<16x32xf32>
    %c1_99 = arith.constant 1 : index
    %c0_100 = arith.constant 0 : index
    %c0_101 = arith.constant 0 : index
    %257 = vector.load %arg7[%c1_99, %c0_100, %c0_101] : memref<2x1x32xf32, #tpu.memory_space<vmem>>, vector<1x1x32xf32>
    %258 = vector.shape_cast %257 : vector<1x1x32xf32> to vector<1x32xf32>
    %259 = vector.broadcast %258 : vector<1x32xf32> to vector<16x32xf32>
    %260 = arith.addf %256, %259 : vector<16x32xf32>
    %cst_102 = arith.constant 0.000000e+00 : f32
    %261 = vector.broadcast %cst_102 : f32 to vector<16x32xf32>
    %262 = arith.maximumf %260, %261 : vector<16x32xf32>
    %c1_103 = arith.constant 1 : index
    %c0_104 = arith.constant 0 : index
    %c0_105 = arith.constant 0 : index
    %263 = vector.load %arg8[%c1_103, %c0_104, %c0_105] : memref<2x32x32xbf16, #tpu.memory_space<vmem>>, vector<1x32x32xbf16>
    %264 = vector.shape_cast %263 : vector<1x32x32xbf16> to vector<32x32xbf16>
    %265 = arith.truncf %262 : vector<16x32xf32> to vector<16x32xbf16>
    %cst_106 = arith.constant dense<0.000000e+00> : vector<16x32xf32>
    %266 = tpu.matmul %265, %264, %cst_106 {dimension_numbers = #tpu.dot_dimension_numbers<[1], [0], [0], [1], [0, 0, 1, 1], [], []>} : vector<16x32xbf16>, vector<32x32xbf16>, vector<16x32xf32> -> vector<16x32xf32>
    %c1_107 = arith.constant 1 : index
    %c0_108 = arith.constant 0 : index
    %c0_109 = arith.constant 0 : index
    %267 = vector.load %arg9[%c1_107, %c0_108, %c0_109] : memref<2x1x32xf32, #tpu.memory_space<vmem>>, vector<1x1x32xf32>
    %268 = vector.shape_cast %267 : vector<1x1x32xf32> to vector<1x32xf32>
    %269 = vector.broadcast %268 : vector<1x32xf32> to vector<16x32xf32>
    %270 = arith.addf %266, %269 : vector<16x32xf32>
    %271 = arith.addf %252, %270 : vector<16x32xf32>
    %c1_110 = arith.constant 1 : index
    %c0_111 = arith.constant 0 : index
    %c0_112 = arith.constant 0 : index
    %272 = vector.load %arg12[%c1_110, %c0_111, %c0_112] : memref<2x1x32xf32, #tpu.memory_space<vmem>>, vector<1x1x32xf32>
    %273 = vector.shape_cast %272 : vector<1x1x32xf32> to vector<1x32xf32>
    %c1_113 = arith.constant 1 : index
    %c0_114 = arith.constant 0 : index
    %c0_115 = arith.constant 0 : index
    %274 = vector.load %arg13[%c1_113, %c0_114, %c0_115] : memref<2x1x32xf32, #tpu.memory_space<vmem>>, vector<1x1x32xf32>
    %275 = vector.shape_cast %274 : vector<1x1x32xf32> to vector<1x32xf32>
    %cst_116 = arith.constant dense<0.000000e+00> : vector<16xf32>
    %276 = vector.multi_reduction <add>, %271, %cst_116 [1] : vector<16x32xf32> to vector<16xf32>
    %277 = vector.shape_cast %276 : vector<16xf32> to vector<16x1xf32>
    %cst_117 = arith.constant 3.200000e+01 : f32
    %278 = vector.broadcast %cst_117 : f32 to vector<16x1xf32>
    %279 = arith.divf %277, %278 : vector<16x1xf32>
    %280 = vector.broadcast %279 : vector<16x1xf32> to vector<16x32xf32>
    %281 = arith.subf %271, %280 : vector<16x32xf32>
    %282 = arith.mulf %281, %281 : vector<16x32xf32>
    %cst_118 = arith.constant dense<0.000000e+00> : vector<16xf32>
    %283 = vector.multi_reduction <add>, %282, %cst_118 [1] : vector<16x32xf32> to vector<16xf32>
    %284 = vector.shape_cast %283 : vector<16xf32> to vector<16x1xf32>
    %cst_119 = arith.constant 3.200000e+01 : f32
    %285 = vector.broadcast %cst_119 : f32 to vector<16x1xf32>
    %286 = arith.divf %284, %285 : vector<16x1xf32>
    %287 = vector.broadcast %279 : vector<16x1xf32> to vector<16x32xf32>
    %288 = arith.subf %271, %287 : vector<16x32xf32>
    %cst_120 = arith.constant 9.99999974E-6 : f32
    %289 = vector.broadcast %cst_120 : f32 to vector<16x1xf32>
    %290 = arith.addf %286, %289 : vector<16x1xf32>
    %291 = math.rsqrt %290 : vector<16x1xf32>
    %292 = vector.broadcast %291 : vector<16x1xf32> to vector<16x32xf32>
    %293 = arith.mulf %288, %292 : vector<16x32xf32>
    %294 = vector.broadcast %273 : vector<1x32xf32> to vector<16x32xf32>
    %295 = arith.mulf %293, %294 : vector<16x32xf32>
    %296 = vector.broadcast %275 : vector<1x32xf32> to vector<16x32xf32>
    %297 = arith.addf %295, %296 : vector<16x32xf32>
    %298 = vector.broadcast %3 : vector<16x1xf32> to vector<16x32xf32>
    %299 = arith.mulf %297, %298 : vector<16x32xf32>
    %300 = vector.shape_cast %299 : vector<16x32xf32> to vector<2x8x32xf32>
    %301 = arith.truncf %300 : vector<2x8x32xf32> to vector<2x8x32xbf16>
    %c0_121 = arith.constant 0 : index
    %c0_122 = arith.constant 0 : index
    %c0_123 = arith.constant 0 : index
    %302 = vector.load %arg14[%c0_121, %c0_122, %c0_123] : memref<2x8x32xbf16, #tpu.memory_space<vmem>>, vector<2x8x32xbf16>
    tpu.vector_store %arg14[%c0_121, %c0_122, %c0_123], %301 {strides = array<i32>} : memref<2x8x32xbf16, #tpu.memory_space<vmem>>, vector<2x8x32xbf16>,
    return
  }
  func.func @transform_0(%arg0: i32) -> (i32, i32, i32) {
    %c0_i32 = arith.constant 0 : i32
    %c0_i32_0 = arith.constant 0 : i32
    %c0_i32_1 = arith.constant 0 : i32
    return %arg0, %c0_i32, %c0_i32_0 : i32, i32, i32
  }
  func.func @transform_1(%arg0: i32) -> (i32, i32, i32) {
    %c0_i32 = arith.constant 0 : i32
    %c0_i32_0 = arith.constant 0 : i32
    %c0_i32_1 = arith.constant 0 : i32
    return %arg0, %c0_i32, %c0_i32_0 : i32, i32, i32
  }
  func.func @transform_2(%arg0: i32) -> (i32, i32, i32) {
    %c0_i32 = arith.constant 0 : i32
    %c0_i32_0 = arith.constant 0 : i32
    %c0_i32_1 = arith.constant 0 : i32
    %c0_i32_2 = arith.constant 0 : i32
    return %c0_i32, %c0_i32_0, %c0_i32_1 : i32, i32, i32
  }
  func.func @transform_3(%arg0: i32) -> (i32, i32, i32) {
    %c0_i32 = arith.constant 0 : i32
    %c0_i32_0 = arith.constant 0 : i32
    %c0_i32_1 = arith.constant 0 : i32
    %c0_i32_2 = arith.constant 0 : i32
    return %c0_i32, %c0_i32_0, %c0_i32_1 : i32, i32, i32
  }
  func.func @transform_4(%arg0: i32) -> (i32, i32, i32) {
    %c0_i32 = arith.constant 0 : i32
    %c0_i32_0 = arith.constant 0 : i32
    %c0_i32_1 = arith.constant 0 : i32
    %c0_i32_2 = arith.constant 0 : i32
    return %c0_i32, %c0_i32_0, %c0_i32_1 : i32, i32, i32
  }
  func.func @transform_5(%arg0: i32) -> (i32, i32, i32) {
    %c0_i32 = arith.constant 0 : i32
    %c0_i32_0 = arith.constant 0 : i32
    %c0_i32_1 = arith.constant 0 : i32
    %c0_i32_2 = arith.constant 0 : i32
    return %c0_i32, %c0_i32_0, %c0_i32_1 : i32, i32, i32
  }
  func.func @transform_6(%arg0: i32) -> (i32, i32, i32) {
    %c0_i32 = arith.constant 0 : i32
    %c0_i32_0 = arith.constant 0 : i32
    %c0_i32_1 = arith.constant 0 : i32
    %c0_i32_2 = arith.constant 0 : i32
    return %c0_i32, %c0_i32_0, %c0_i32_1 : i32, i32, i32
  }
  func.func @transform_7(%arg0: i32) -> (i32, i32, i32) {
    %c0_i32 = arith.constant 0 : i32
    %c0_i32_0 = arith.constant 0 : i32
    %c0_i32_1 = arith.constant 0 : i32
    %c0_i32_2 = arith.constant 0 : i32
    return %c0_i32, %c0_i32_0, %c0_i32_1 : i32, i32, i32
  }
  func.func @transform_8(%arg0: i32) -> (i32, i32, i32) {
    %c0_i32 = arith.constant 0 : i32
    %c0_i32_0 = arith.constant 0 : i32
    %c0_i32_1 = arith.constant 0 : i32
    %c0_i32_2 = arith.constant 0 : i32
    return %c0_i32, %c0_i32_0, %c0_i32_1 : i32, i32, i32
  }
  func.func @transform_9(%arg0: i32) -> (i32, i32, i32) {
    %c0_i32 = arith.constant 0 : i32
    %c0_i32_0 = arith.constant 0 : i32
    %c0_i32_1 = arith.constant 0 : i32
    %c0_i32_2 = arith.constant 0 : i32
    return %c0_i32, %c0_i32_0, %c0_i32_1 : i32, i32, i32
  }
  func.func @transform_10(%arg0: i32) -> (i32, i32, i32) {
    %c0_i32 = arith.constant 0 : i32
    %c0_i32_0 = arith.constant 0 : i32
    %c0_i32_1 = arith.constant 0 : i32
    %c0_i32_2 = arith.constant 0 : i32
    return %c0_i32, %c0_i32_0, %c0_i32_1 : i32, i32, i32
  }
  func.func @transform_11(%arg0: i32) -> (i32, i32, i32) {
    %c0_i32 = arith.constant 0 : i32
    %c0_i32_0 = arith.constant 0 : i32
    %c0_i32_1 = arith.constant 0 : i32
    %c0_i32_2 = arith.constant 0 : i32
    return %c0_i32, %c0_i32_0, %c0_i32_1 : i32, i32, i32
  }
  func.func @transform_12(%arg0: i32) -> (i32, i32, i32) {
    %c0_i32 = arith.constant 0 : i32
    %c0_i32_0 = arith.constant 0 : i32
    %c0_i32_1 = arith.constant 0 : i32
    %c0_i32_2 = arith.constant 0 : i32
    return %c0_i32, %c0_i32_0, %c0_i32_1 : i32, i32, i32
  }
  func.func @transform_13(%arg0: i32) -> (i32, i32, i32) {
    %c0_i32 = arith.constant 0 : i32
    %c0_i32_0 = arith.constant 0 : i32
    %c0_i32_1 = arith.constant 0 : i32
    return %arg0, %c0_i32, %c0_i32_0 : i32, i32, i32
  }
}

module attributes {stable_mosaic.version = 11 : i64} {
  func.func @tokens_kernel(%arg0: i32, %arg1: memref<2x8x5xf32, #tpu.memory_space<vmem>>, %arg2: memref<2x3xf32, #tpu.memory_space<vmem>>, %arg3: memref<8x32xf32, #tpu.memory_space<vmem>>, %arg4: memref<1x32xf32, #tpu.memory_space<vmem>>, %arg5: memref<3x32xf32, #tpu.memory_space<vmem>>, %arg6: memref<3x32xf32, #tpu.memory_space<vmem>>, %arg7: memref<2x8x32xbf16, #tpu.memory_space<vmem>>) attributes {dimension_semantics = [#tpu.dimension_semantics<parallel>], iteration_bounds = array<i64: 1>, scalar_prefetch = 0 : i64, scratch_operands = 0 : i64, tpu.core_type = #tpu.core_type<tc>, window_params = [{transform_indices = @transform_0, window_bounds = array<i64: 2, 8, 5>}, {transform_indices = @transform_1, window_bounds = array<i64: 2, 3>}, {pipeline_mode = #tpu.pipeline_mode<synchronous>, transform_indices = @transform_2, window_bounds = array<i64: 8, 32>}, {pipeline_mode = #tpu.pipeline_mode<synchronous>, transform_indices = @transform_3, window_bounds = array<i64: 1, 32>}, {pipeline_mode = #tpu.pipeline_mode<synchronous>, transform_indices = @transform_4, window_bounds = array<i64: 3, 32>}, {pipeline_mode = #tpu.pipeline_mode<synchronous>, transform_indices = @transform_5, window_bounds = array<i64: 3, 32>}, {transform_indices = @transform_6, window_bounds = array<i64: 2, 8, 32>}]} {
    %c0 = arith.constant 0 : index
    %c0_0 = arith.constant 0 : index
    %0 = vector.load %arg3[%c0, %c0_0] : memref<8x32xf32, #tpu.memory_space<vmem>>, vector<8x32xf32>
    %1 = arith.truncf %0 : vector<8x32xf32> to vector<8x32xbf16>
    %c0_1 = arith.constant 0 : index
    %c0_2 = arith.constant 0 : index
    %2 = vector.load %arg4[%c0_1, %c0_2] : memref<1x32xf32, #tpu.memory_space<vmem>>, vector<1x32xf32>
    %c0_3 = arith.constant 0 : index
    %c0_4 = arith.constant 0 : index
    %c0_5 = arith.constant 0 : index
    %3 = vector.load %arg1[%c0_3, %c0_4, %c0_5] : memref<2x8x5xf32, #tpu.memory_space<vmem>>, vector<1x8x5xf32>
    %4 = vector.shape_cast %3 : vector<1x8x5xf32> to vector<8x5xf32>
    %5 = arith.truncf %4 : vector<8x5xf32> to vector<8x5xbf16>
    %cst = arith.constant dense<0.000000e+00> : vector<5x32xf32>
    %6 = tpu.matmul %5, %1, %cst {dimension_numbers = #tpu.dot_dimension_numbers<[0], [0], [1], [1], [0, 1, 1, 1], [], []>} : vector<8x5xbf16>, vector<8x32xbf16>, vector<5x32xf32> -> vector<5x32xf32>
    %7 = vector.broadcast %2 : vector<1x32xf32> to vector<5x32xf32>
    %8 = arith.addf %6, %7 : vector<5x32xf32>
    %c1 = arith.constant 1 : index
    %c0_6 = arith.constant 0 : index
    %c0_7 = arith.constant 0 : index
    %9 = vector.load %arg1[%c1, %c0_6, %c0_7] : memref<2x8x5xf32, #tpu.memory_space<vmem>>, vector<1x8x5xf32>
    %10 = vector.shape_cast %9 : vector<1x8x5xf32> to vector<8x5xf32>
    %11 = arith.truncf %10 : vector<8x5xf32> to vector<8x5xbf16>
    %cst_8 = arith.constant dense<0.000000e+00> : vector<5x32xf32>
    %12 = tpu.matmul %11, %1, %cst_8 {dimension_numbers = #tpu.dot_dimension_numbers<[0], [0], [1], [1], [0, 1, 1, 1], [], []>} : vector<8x5xbf16>, vector<8x32xbf16>, vector<5x32xf32> -> vector<5x32xf32>
    %13 = vector.broadcast %2 : vector<1x32xf32> to vector<5x32xf32>
    %14 = arith.addf %12, %13 : vector<5x32xf32>
    %15 = vector.shape_cast %8 : vector<5x32xf32> to vector<1x5x32xf32>
    %16 = vector.shape_cast %14 : vector<5x32xf32> to vector<1x5x32xf32>
    %17 = tpu.concatenate %15, %16 in 0 : vector<1x5x32xf32>, vector<1x5x32xf32> -> vector<2x5x32xf32>
    %c0_9 = arith.constant 0 : index
    %c0_10 = arith.constant 0 : index
    %18 = vector.load %arg2[%c0_9, %c0_10] : memref<2x3xf32, #tpu.memory_space<vmem>>, vector<2x3xf32>
    %19 = vector.shape_cast %18 : vector<2x3xf32> to vector<2x3x1xf32>
    %c0_11 = arith.constant 0 : index
    %c0_12 = arith.constant 0 : index
    %20 = vector.load %arg5[%c0_11, %c0_12] : memref<3x32xf32, #tpu.memory_space<vmem>>, vector<3x32xf32>
    %21 = vector.shape_cast %20 : vector<3x32xf32> to vector<1x3x32xf32>
    %22 = vector.broadcast %19 : vector<2x3x1xf32> to vector<2x3x32xf32>
    %23 = vector.broadcast %21 : vector<1x3x32xf32> to vector<2x3x32xf32>
    %24 = arith.mulf %22, %23 : vector<2x3x32xf32>
    %c0_13 = arith.constant 0 : index
    %c0_14 = arith.constant 0 : index
    %25 = vector.load %arg6[%c0_13, %c0_14] : memref<3x32xf32, #tpu.memory_space<vmem>>, vector<3x32xf32>
    %26 = vector.shape_cast %25 : vector<3x32xf32> to vector<1x3x32xf32>
    %27 = vector.broadcast %26 : vector<1x3x32xf32> to vector<2x3x32xf32>
    %28 = arith.addf %24, %27 : vector<2x3x32xf32>
    %29 = tpu.concatenate %17, %28 in 1 : vector<2x5x32xf32>, vector<2x3x32xf32> -> vector<2x8x32xf32>
    %30 = arith.truncf %29 : vector<2x8x32xf32> to vector<2x8x32xbf16>
    %c0_15 = arith.constant 0 : index
    %c0_16 = arith.constant 0 : index
    %c0_17 = arith.constant 0 : index
    %31 = vector.load %arg7[%c0_15, %c0_16, %c0_17] : memref<2x8x32xbf16, #tpu.memory_space<vmem>>, vector<2x8x32xbf16>
    tpu.vector_store %arg7[%c0_15, %c0_16, %c0_17], %30 {strides = array<i32>} : memref<2x8x32xbf16, #tpu.memory_space<vmem>>, vector<2x8x32xbf16>,
    return
  }
  func.func @transform_0(%arg0: i32) -> (i32, i32, i32) {
    %c0_i32 = arith.constant 0 : i32
    %c0_i32_0 = arith.constant 0 : i32
    %c0_i32_1 = arith.constant 0 : i32
    return %arg0, %c0_i32, %c0_i32_0 : i32, i32, i32
  }
  func.func @transform_1(%arg0: i32) -> (i32, i32) {
    %c0_i32 = arith.constant 0 : i32
    %c0_i32_0 = arith.constant 0 : i32
    return %arg0, %c0_i32 : i32, i32
  }
  func.func @transform_2(%arg0: i32) -> (i32, i32) {
    %c0_i32 = arith.constant 0 : i32
    %c0_i32_0 = arith.constant 0 : i32
    %c0_i32_1 = arith.constant 0 : i32
    return %c0_i32, %c0_i32_0 : i32, i32
  }
  func.func @transform_3(%arg0: i32) -> (i32, i32) {
    %c0_i32 = arith.constant 0 : i32
    %c0_i32_0 = arith.constant 0 : i32
    %c0_i32_1 = arith.constant 0 : i32
    return %c0_i32, %c0_i32_0 : i32, i32
  }
  func.func @transform_4(%arg0: i32) -> (i32, i32) {
    %c0_i32 = arith.constant 0 : i32
    %c0_i32_0 = arith.constant 0 : i32
    %c0_i32_1 = arith.constant 0 : i32
    return %c0_i32, %c0_i32_0 : i32, i32
  }
  func.func @transform_5(%arg0: i32) -> (i32, i32) {
    %c0_i32 = arith.constant 0 : i32
    %c0_i32_0 = arith.constant 0 : i32
    %c0_i32_1 = arith.constant 0 : i32
    return %c0_i32, %c0_i32_0 : i32, i32
  }
  func.func @transform_6(%arg0: i32) -> (i32, i32, i32) {
    %c0_i32 = arith.constant 0 : i32
    %c0_i32_0 = arith.constant 0 : i32
    %c0_i32_1 = arith.constant 0 : i32
    return %arg0, %c0_i32, %c0_i32_0 : i32, i32, i32
  }
}

module attributes {stable_mosaic.version = 11 : i64} {
  func.func @var_proj_kernel(%arg0: i32, %arg1: memref<2x8x32xbf16, #tpu.memory_space<vmem>>, %arg2: memref<32x8xf32, #tpu.memory_space<vmem>>, %arg3: memref<1x8xf32, #tpu.memory_space<vmem>>, %arg4: memref<2x8x5xbf16, #tpu.memory_space<vmem>>) attributes {dimension_semantics = [#tpu.dimension_semantics<parallel>], iteration_bounds = array<i64: 1>, scalar_prefetch = 0 : i64, scratch_operands = 0 : i64, tpu.core_type = #tpu.core_type<tc>, window_params = [{transform_indices = @transform_0, window_bounds = array<i64: 2, 8, 32>}, {pipeline_mode = #tpu.pipeline_mode<synchronous>, transform_indices = @transform_1, window_bounds = array<i64: 32, 8>}, {pipeline_mode = #tpu.pipeline_mode<synchronous>, transform_indices = @transform_2, window_bounds = array<i64: 1, 8>}, {transform_indices = @transform_3, window_bounds = array<i64: 2, 8, 5>}]} {
    %c0 = arith.constant 0 : index
    %c0_0 = arith.constant 0 : index
    %0 = vector.load %arg2[%c0, %c0_0] : memref<32x8xf32, #tpu.memory_space<vmem>>, vector<32x8xf32>
    %1 = arith.truncf %0 : vector<32x8xf32> to vector<32x8xbf16>
    %c0_1 = arith.constant 0 : index
    %c0_2 = arith.constant 0 : index
    %2 = vector.load %arg3[%c0_1, %c0_2] : memref<1x8xf32, #tpu.memory_space<vmem>>, vector<1x8xf32>
    %c0_3 = arith.constant 0 : index
    %c0_4 = arith.constant 0 : index
    %c0_5 = arith.constant 0 : index
    %3 = vector.load %arg1[%c0_3, %c0_4, %c0_5] : memref<2x8x32xbf16, #tpu.memory_space<vmem>>, vector<1x8x32xbf16>
    %4 = vector.shape_cast %3 : vector<1x8x32xbf16> to vector<8x32xbf16>
    %5 = vector.extract_strided_slice %4 {offsets = [0, 0], sizes = [5, 32], strides = [1, 1]} : vector<8x32xbf16> to vector<5x32xbf16>
    %cst = arith.constant dense<0.000000e+00> : vector<5x8xf32>
    %6 = tpu.matmul %5, %1, %cst {dimension_numbers = #tpu.dot_dimension_numbers<[1], [0], [0], [1], [0, 0, 1, 1], [], []>} : vector<5x32xbf16>, vector<32x8xbf16>, vector<5x8xf32> -> vector<5x8xf32>
    %7 = vector.broadcast %2 : vector<1x8xf32> to vector<5x8xf32>
    %8 = arith.addf %6, %7 : vector<5x8xf32>
    %9 = tpu.transpose %8, [1, 0] : vector<5x8xf32> -> vector<8x5xf32>
    %c1 = arith.constant 1 : index
    %c0_6 = arith.constant 0 : index
    %c0_7 = arith.constant 0 : index
    %10 = vector.load %arg1[%c1, %c0_6, %c0_7] : memref<2x8x32xbf16, #tpu.memory_space<vmem>>, vector<1x8x32xbf16>
    %11 = vector.shape_cast %10 : vector<1x8x32xbf16> to vector<8x32xbf16>
    %12 = vector.extract_strided_slice %11 {offsets = [0, 0], sizes = [5, 32], strides = [1, 1]} : vector<8x32xbf16> to vector<5x32xbf16>
    %cst_8 = arith.constant dense<0.000000e+00> : vector<5x8xf32>
    %13 = tpu.matmul %12, %1, %cst_8 {dimension_numbers = #tpu.dot_dimension_numbers<[1], [0], [0], [1], [0, 0, 1, 1], [], []>} : vector<5x32xbf16>, vector<32x8xbf16>, vector<5x8xf32> -> vector<5x8xf32>
    %14 = vector.broadcast %2 : vector<1x8xf32> to vector<5x8xf32>
    %15 = arith.addf %13, %14 : vector<5x8xf32>
    %16 = tpu.transpose %15, [1, 0] : vector<5x8xf32> -> vector<8x5xf32>
    %17 = vector.shape_cast %9 : vector<8x5xf32> to vector<1x8x5xf32>
    %18 = vector.shape_cast %16 : vector<8x5xf32> to vector<1x8x5xf32>
    %19 = tpu.concatenate %17, %18 in 0 : vector<1x8x5xf32>, vector<1x8x5xf32> -> vector<2x8x5xf32>
    %20 = arith.truncf %19 : vector<2x8x5xf32> to vector<2x8x5xbf16>
    %c0_9 = arith.constant 0 : index
    %c0_10 = arith.constant 0 : index
    %c0_11 = arith.constant 0 : index
    %21 = vector.load %arg4[%c0_9, %c0_10, %c0_11] : memref<2x8x5xbf16, #tpu.memory_space<vmem>>, vector<2x8x5xbf16>
    tpu.vector_store %arg4[%c0_9, %c0_10, %c0_11], %20 {strides = array<i32>} : memref<2x8x5xbf16, #tpu.memory_space<vmem>>, vector<2x8x5xbf16>,
    return
  }
  func.func @transform_0(%arg0: i32) -> (i32, i32, i32) {
    %c0_i32 = arith.constant 0 : i32
    %c0_i32_0 = arith.constant 0 : i32
    %c0_i32_1 = arith.constant 0 : i32
    return %arg0, %c0_i32, %c0_i32_0 : i32, i32, i32
  }
  func.func @transform_1(%arg0: i32) -> (i32, i32) {
    %c0_i32 = arith.constant 0 : i32
    %c0_i32_0 = arith.constant 0 : i32
    %c0_i32_1 = arith.constant 0 : i32
    return %c0_i32, %c0_i32_0 : i32, i32
  }
  func.func @transform_2(%arg0: i32) -> (i32, i32) {
    %c0_i32 = arith.constant 0 : i32
    %c0_i32_0 = arith.constant 0 : i32
    %c0_i32_1 = arith.constant 0 : i32
    return %c0_i32, %c0_i32_0 : i32, i32
  }
  func.func @transform_3(%arg0: i32) -> (i32, i32, i32) {
    %c0_i32 = arith.constant 0 : i32
    %c0_i32_0 = arith.constant 0 : i32
    %c0_i32_1 = arith.constant 0 : i32
    return %arg0, %c0_i32, %c0_i32_0 : i32, i32, i32
  }
}

module attributes {stable_mosaic.version = 11 : i64} {
  func.func @encoder_stack_kernel(%arg0: i32, %arg1: memref<2x8x32xbf16, #tpu.memory_space<vmem>>, %arg2: memref<2x32x96xbf16, #tpu.memory_space<vmem>>, %arg3: memref<2x32x32xbf16, #tpu.memory_space<vmem>>, %arg4: memref<2x1x32xf32, #tpu.memory_space<vmem>>, %arg5: memref<2x32x32xbf16, #tpu.memory_space<vmem>>, %arg6: memref<2x1x32xf32, #tpu.memory_space<vmem>>, %arg7: memref<2x32x32xbf16, #tpu.memory_space<vmem>>, %arg8: memref<2x1x32xf32, #tpu.memory_space<vmem>>, %arg9: memref<2x1x32xf32, #tpu.memory_space<vmem>>, %arg10: memref<2x1x32xf32, #tpu.memory_space<vmem>>, %arg11: memref<2x1x32xf32, #tpu.memory_space<vmem>>, %arg12: memref<2x1x32xf32, #tpu.memory_space<vmem>>, %arg13: memref<2x8x32xbf16, #tpu.memory_space<vmem>>) attributes {dimension_semantics = [#tpu.dimension_semantics<parallel>], iteration_bounds = array<i64: 1>, scalar_prefetch = 0 : i64, scratch_operands = 0 : i64, tpu.core_type = #tpu.core_type<tc>, window_params = [{transform_indices = @transform_0, window_bounds = array<i64: 2, 8, 32>}, {pipeline_mode = #tpu.pipeline_mode<synchronous>, transform_indices = @transform_1, window_bounds = array<i64: 2, 32, 96>}, {pipeline_mode = #tpu.pipeline_mode<synchronous>, transform_indices = @transform_2, window_bounds = array<i64: 2, 32, 32>}, {pipeline_mode = #tpu.pipeline_mode<synchronous>, transform_indices = @transform_3, window_bounds = array<i64: 2, 1, 32>}, {pipeline_mode = #tpu.pipeline_mode<synchronous>, transform_indices = @transform_4, window_bounds = array<i64: 2, 32, 32>}, {pipeline_mode = #tpu.pipeline_mode<synchronous>, transform_indices = @transform_5, window_bounds = array<i64: 2, 1, 32>}, {pipeline_mode = #tpu.pipeline_mode<synchronous>, transform_indices = @transform_6, window_bounds = array<i64: 2, 32, 32>}, {pipeline_mode = #tpu.pipeline_mode<synchronous>, transform_indices = @transform_7, window_bounds = array<i64: 2, 1, 32>}, {pipeline_mode = #tpu.pipeline_mode<synchronous>, transform_indices = @transform_8, window_bounds = array<i64: 2, 1, 32>}, {pipeline_mode = #tpu.pipeline_mode<synchronous>, transform_indices = @transform_9, window_bounds = array<i64: 2, 1, 32>}, {pipeline_mode = #tpu.pipeline_mode<synchronous>, transform_indices = @transform_10, window_bounds = array<i64: 2, 1, 32>}, {pipeline_mode = #tpu.pipeline_mode<synchronous>, transform_indices = @transform_11, window_bounds = array<i64: 2, 1, 32>}, {transform_indices = @transform_12, window_bounds = array<i64: 2, 8, 32>}]} {
    %c0 = arith.constant 0 : index
    %c0_0 = arith.constant 0 : index
    %c0_1 = arith.constant 0 : index
    %0 = vector.load %arg1[%c0, %c0_0, %c0_1] : memref<2x8x32xbf16, #tpu.memory_space<vmem>>, vector<2x8x32xbf16>
    %1 = arith.extf %0 : vector<2x8x32xbf16> to vector<2x8x32xf32>
    %2 = vector.shape_cast %1 : vector<2x8x32xf32> to vector<16x32xf32>
    %c0_2 = arith.constant 0 : index
    %c0_3 = arith.constant 0 : index
    %c0_4 = arith.constant 0 : index
    %3 = vector.load %arg2[%c0_2, %c0_3, %c0_4] : memref<2x32x96xbf16, #tpu.memory_space<vmem>>, vector<1x32x96xbf16>
    %4 = vector.shape_cast %3 : vector<1x32x96xbf16> to vector<32x96xbf16>
    %5 = arith.truncf %2 : vector<16x32xf32> to vector<16x32xbf16>
    %cst = arith.constant dense<0.000000e+00> : vector<16x96xf32>
    %6 = tpu.matmul %5, %4, %cst {dimension_numbers = #tpu.dot_dimension_numbers<[1], [0], [0], [1], [0, 0, 1, 1], [], []>} : vector<16x32xbf16>, vector<32x96xbf16>, vector<16x96xf32> -> vector<16x96xf32>
    %c0_5 = arith.constant 0 : index
    %c0_6 = arith.constant 0 : index
    %c0_7 = arith.constant 0 : index
    %7 = vector.load %arg3[%c0_5, %c0_6, %c0_7] : memref<2x32x32xbf16, #tpu.memory_space<vmem>>, vector<1x32x32xbf16>
    %8 = vector.shape_cast %7 : vector<1x32x32xbf16> to vector<32x32xbf16>
    %9 = vector.extract_strided_slice %6 {offsets = [0, 0], sizes = [16, 16], strides = [1, 1]} : vector<16x96xf32> to vector<16x16xf32>
    %10 = vector.shape_cast %9 : vector<16x16xf32> to vector<2x8x16xf32>
    %11 = vector.extract_strided_slice %6 {offsets = [0, 32], sizes = [16, 16], strides = [1, 1]} : vector<16x96xf32> to vector<16x16xf32>
    %12 = vector.shape_cast %11 : vector<16x16xf32> to vector<2x8x16xf32>
    %13 = vector.extract_strided_slice %6 {offsets = [0, 64], sizes = [16, 16], strides = [1, 1]} : vector<16x96xf32> to vector<16x16xf32>
    %14 = vector.shape_cast %13 : vector<16x16xf32> to vector<2x8x16xf32>
    %15 = arith.truncf %10 : vector<2x8x16xf32> to vector<2x8x16xbf16>
    %16 = arith.truncf %12 : vector<2x8x16xf32> to vector<2x8x16xbf16>
    %cst_8 = arith.constant dense<0.000000e+00> : vector<2x8x8xf32>
    %17 = tpu.matmul %15, %16, %cst_8 {dimension_numbers = #tpu.dot_dimension_numbers<[2], [2], [1], [1], [0, 0, 0, 1, 1, 1], [0], [0]>} : vector<2x8x16xbf16>, vector<2x8x16xbf16>, vector<2x8x8xf32> -> vector<2x8x8xf32>
    %cst_9 = arith.constant dense<0xFF800000> : vector<2x8xf32>
    %18 = vector.multi_reduction <maximumf>, %17, %cst_9 [2] : vector<2x8x8xf32> to vector<2x8xf32>
    %19 = vector.shape_cast %18 : vector<2x8xf32> to vector<2x8x1xf32>
    %20 = vector.broadcast %19 : vector<2x8x1xf32> to vector<2x8x8xf32>
    %21 = arith.subf %17, %20 : vector<2x8x8xf32>
    %22 = math.exp %21 : vector<2x8x8xf32>
    %cst_10 = arith.constant dense<0.000000e+00> : vector<2x8xf32>
    %23 = vector.multi_reduction <add>, %22, %cst_10 [2] : vector<2x8x8xf32> to vector<2x8xf32>
    %24 = vector.shape_cast %23 : vector<2x8xf32> to vector<2x8x1xf32>
    %25 = tpu.reciprocal %24 {approx = true} : vector<2x8x1xf32> -> vector<2x8x1xf32>
    %26 = vector.broadcast %25 : vector<2x8x1xf32> to vector<2x8x8xf32>
    %27 = arith.mulf %22, %26 : vector<2x8x8xf32>
    %28 = arith.truncf %27 : vector<2x8x8xf32> to vector<2x8x8xbf16>
    %29 = arith.truncf %14 : vector<2x8x16xf32> to vector<2x8x16xbf16>
    %cst_11 = arith.constant dense<0.000000e+00> : vector<2x8x16xf32>
    %30 = tpu.matmul %28, %29, %cst_11 {dimension_numbers = #tpu.dot_dimension_numbers<[2], [1], [1], [2], [0, 0, 0, 1, 1, 2], [0], [0]>} : vector<2x8x8xbf16>, vector<2x8x16xbf16>, vector<2x8x16xf32> -> vector<2x8x16xf32>
    %31 = vector.shape_cast %30 : vector<2x8x16xf32> to vector<16x16xf32>
    %32 = vector.extract_strided_slice %8 {offsets = [0, 0], sizes = [16, 32], strides = [1, 1]} : vector<32x32xbf16> to vector<16x32xbf16>
    %33 = arith.truncf %31 : vector<16x16xf32> to vector<16x16xbf16>
    %cst_12 = arith.constant dense<0.000000e+00> : vector<16x32xf32>
    %34 = tpu.matmul %33, %32, %cst_12 {dimension_numbers = #tpu.dot_dimension_numbers<[1], [0], [0], [1], [0, 0, 1, 1], [], []>} : vector<16x16xbf16>, vector<16x32xbf16>, vector<16x32xf32> -> vector<16x32xf32>
    %35 = vector.extract_strided_slice %6 {offsets = [0, 16], sizes = [16, 16], strides = [1, 1]} : vector<16x96xf32> to vector<16x16xf32>
    %36 = vector.shape_cast %35 : vector<16x16xf32> to vector<2x8x16xf32>
    %37 = vector.extract_strided_slice %6 {offsets = [0, 48], sizes = [16, 16], strides = [1, 1]} : vector<16x96xf32> to vector<16x16xf32>
    %38 = vector.shape_cast %37 : vector<16x16xf32> to vector<2x8x16xf32>
    %39 = vector.extract_strided_slice %6 {offsets = [0, 80], sizes = [16, 16], strides = [1, 1]} : vector<16x96xf32> to vector<16x16xf32>
    %40 = vector.shape_cast %39 : vector<16x16xf32> to vector<2x8x16xf32>
    %41 = arith.truncf %36 : vector<2x8x16xf32> to vector<2x8x16xbf16>
    %42 = arith.truncf %38 : vector<2x8x16xf32> to vector<2x8x16xbf16>
    %cst_13 = arith.constant dense<0.000000e+00> : vector<2x8x8xf32>
    %43 = tpu.matmul %41, %42, %cst_13 {dimension_numbers = #tpu.dot_dimension_numbers<[2], [2], [1], [1], [0, 0, 0, 1, 1, 1], [0], [0]>} : vector<2x8x16xbf16>, vector<2x8x16xbf16>, vector<2x8x8xf32> -> vector<2x8x8xf32>
    %cst_14 = arith.constant dense<0xFF800000> : vector<2x8xf32>
    %44 = vector.multi_reduction <maximumf>, %43, %cst_14 [2] : vector<2x8x8xf32> to vector<2x8xf32>
    %45 = vector.shape_cast %44 : vector<2x8xf32> to vector<2x8x1xf32>
    %46 = vector.broadcast %45 : vector<2x8x1xf32> to vector<2x8x8xf32>
    %47 = arith.subf %43, %46 : vector<2x8x8xf32>
    %48 = math.exp %47 : vector<2x8x8xf32>
    %cst_15 = arith.constant dense<0.000000e+00> : vector<2x8xf32>
    %49 = vector.multi_reduction <add>, %48, %cst_15 [2] : vector<2x8x8xf32> to vector<2x8xf32>
    %50 = vector.shape_cast %49 : vector<2x8xf32> to vector<2x8x1xf32>
    %51 = tpu.reciprocal %50 {approx = true} : vector<2x8x1xf32> -> vector<2x8x1xf32>
    %52 = vector.broadcast %51 : vector<2x8x1xf32> to vector<2x8x8xf32>
    %53 = arith.mulf %48, %52 : vector<2x8x8xf32>
    %54 = arith.truncf %53 : vector<2x8x8xf32> to vector<2x8x8xbf16>
    %55 = arith.truncf %40 : vector<2x8x16xf32> to vector<2x8x16xbf16>
    %cst_16 = arith.constant dense<0.000000e+00> : vector<2x8x16xf32>
    %56 = tpu.matmul %54, %55, %cst_16 {dimension_numbers = #tpu.dot_dimension_numbers<[2], [1], [1], [2], [0, 0, 0, 1, 1, 2], [0], [0]>} : vector<2x8x8xbf16>, vector<2x8x16xbf16>, vector<2x8x16xf32> -> vector<2x8x16xf32>
    %57 = vector.shape_cast %56 : vector<2x8x16xf32> to vector<16x16xf32>
    %58 = vector.extract_strided_slice %8 {offsets = [16, 0], sizes = [16, 32], strides = [1, 1]} : vector<32x32xbf16> to vector<16x32xbf16>
    %59 = arith.truncf %57 : vector<16x16xf32> to vector<16x16xbf16>
    %cst_17 = arith.constant dense<0.000000e+00> : vector<16x32xf32>
    %60 = tpu.matmul %59, %58, %cst_17 {dimension_numbers = #tpu.dot_dimension_numbers<[1], [0], [0], [1], [0, 0, 1, 1], [], []>} : vector<16x16xbf16>, vector<16x32xbf16>, vector<16x32xf32> -> vector<16x32xf32>
    %61 = arith.addf %34, %60 : vector<16x32xf32>
    %c0_18 = arith.constant 0 : index
    %c0_19 = arith.constant 0 : index
    %c0_20 = arith.constant 0 : index
    %62 = vector.load %arg4[%c0_18, %c0_19, %c0_20] : memref<2x1x32xf32, #tpu.memory_space<vmem>>, vector<1x1x32xf32>
    %63 = vector.shape_cast %62 : vector<1x1x32xf32> to vector<1x32xf32>
    %64 = vector.broadcast %63 : vector<1x32xf32> to vector<16x32xf32>
    %65 = arith.addf %61, %64 : vector<16x32xf32>
    %66 = arith.addf %2, %65 : vector<16x32xf32>
    %c0_21 = arith.constant 0 : index
    %c0_22 = arith.constant 0 : index
    %c0_23 = arith.constant 0 : index
    %67 = vector.load %arg9[%c0_21, %c0_22, %c0_23] : memref<2x1x32xf32, #tpu.memory_space<vmem>>, vector<1x1x32xf32>
    %68 = vector.shape_cast %67 : vector<1x1x32xf32> to vector<1x32xf32>
    %c0_24 = arith.constant 0 : index
    %c0_25 = arith.constant 0 : index
    %c0_26 = arith.constant 0 : index
    %69 = vector.load %arg10[%c0_24, %c0_25, %c0_26] : memref<2x1x32xf32, #tpu.memory_space<vmem>>, vector<1x1x32xf32>
    %70 = vector.shape_cast %69 : vector<1x1x32xf32> to vector<1x32xf32>
    %cst_27 = arith.constant dense<0.000000e+00> : vector<16xf32>
    %71 = vector.multi_reduction <add>, %66, %cst_27 [1] : vector<16x32xf32> to vector<16xf32>
    %72 = vector.shape_cast %71 : vector<16xf32> to vector<16x1xf32>
    %cst_28 = arith.constant 3.200000e+01 : f32
    %73 = vector.broadcast %cst_28 : f32 to vector<16x1xf32>
    %74 = arith.divf %72, %73 : vector<16x1xf32>
    %75 = vector.broadcast %74 : vector<16x1xf32> to vector<16x32xf32>
    %76 = arith.subf %66, %75 : vector<16x32xf32>
    %77 = arith.mulf %76, %76 : vector<16x32xf32>
    %cst_29 = arith.constant dense<0.000000e+00> : vector<16xf32>
    %78 = vector.multi_reduction <add>, %77, %cst_29 [1] : vector<16x32xf32> to vector<16xf32>
    %79 = vector.shape_cast %78 : vector<16xf32> to vector<16x1xf32>
    %cst_30 = arith.constant 3.200000e+01 : f32
    %80 = vector.broadcast %cst_30 : f32 to vector<16x1xf32>
    %81 = arith.divf %79, %80 : vector<16x1xf32>
    %82 = vector.broadcast %74 : vector<16x1xf32> to vector<16x32xf32>
    %83 = arith.subf %66, %82 : vector<16x32xf32>
    %cst_31 = arith.constant 9.99999974E-6 : f32
    %84 = vector.broadcast %cst_31 : f32 to vector<16x1xf32>
    %85 = arith.addf %81, %84 : vector<16x1xf32>
    %86 = math.rsqrt %85 : vector<16x1xf32>
    %87 = vector.broadcast %86 : vector<16x1xf32> to vector<16x32xf32>
    %88 = arith.mulf %83, %87 : vector<16x32xf32>
    %89 = vector.broadcast %68 : vector<1x32xf32> to vector<16x32xf32>
    %90 = arith.mulf %88, %89 : vector<16x32xf32>
    %91 = vector.broadcast %70 : vector<1x32xf32> to vector<16x32xf32>
    %92 = arith.addf %90, %91 : vector<16x32xf32>
    %c0_32 = arith.constant 0 : index
    %c0_33 = arith.constant 0 : index
    %c0_34 = arith.constant 0 : index
    %93 = vector.load %arg5[%c0_32, %c0_33, %c0_34] : memref<2x32x32xbf16, #tpu.memory_space<vmem>>, vector<1x32x32xbf16>
    %94 = vector.shape_cast %93 : vector<1x32x32xbf16> to vector<32x32xbf16>
    %95 = arith.truncf %92 : vector<16x32xf32> to vector<16x32xbf16>
    %cst_35 = arith.constant dense<0.000000e+00> : vector<16x32xf32>
    %96 = tpu.matmul %95, %94, %cst_35 {dimension_numbers = #tpu.dot_dimension_numbers<[1], [0], [0], [1], [0, 0, 1, 1], [], []>} : vector<16x32xbf16>, vector<32x32xbf16>, vector<16x32xf32> -> vector<16x32xf32>
    %c0_36 = arith.constant 0 : index
    %c0_37 = arith.constant 0 : index
    %c0_38 = arith.constant 0 : index
    %97 = vector.load %arg6[%c0_36, %c0_37, %c0_38] : memref<2x1x32xf32, #tpu.memory_space<vmem>>, vector<1x1x32xf32>
    %98 = vector.shape_cast %97 : vector<1x1x32xf32> to vector<1x32xf32>
    %99 = vector.broadcast %98 : vector<1x32xf32> to vector<16x32xf32>
    %100 = arith.addf %96, %99 : vector<16x32xf32>
    %cst_39 = arith.constant 0.000000e+00 : f32
    %101 = vector.broadcast %cst_39 : f32 to vector<16x32xf32>
    %102 = arith.maximumf %100, %101 : vector<16x32xf32>
    %c0_40 = arith.constant 0 : index
    %c0_41 = arith.constant 0 : index
    %c0_42 = arith.constant 0 : index
    %103 = vector.load %arg7[%c0_40, %c0_41, %c0_42] : memref<2x32x32xbf16, #tpu.memory_space<vmem>>, vector<1x32x32xbf16>
    %104 = vector.shape_cast %103 : vector<1x32x32xbf16> to vector<32x32xbf16>
    %105 = arith.truncf %102 : vector<16x32xf32> to vector<16x32xbf16>
    %cst_43 = arith.constant dense<0.000000e+00> : vector<16x32xf32>
    %106 = tpu.matmul %105, %104, %cst_43 {dimension_numbers = #tpu.dot_dimension_numbers<[1], [0], [0], [1], [0, 0, 1, 1], [], []>} : vector<16x32xbf16>, vector<32x32xbf16>, vector<16x32xf32> -> vector<16x32xf32>
    %c0_44 = arith.constant 0 : index
    %c0_45 = arith.constant 0 : index
    %c0_46 = arith.constant 0 : index
    %107 = vector.load %arg8[%c0_44, %c0_45, %c0_46] : memref<2x1x32xf32, #tpu.memory_space<vmem>>, vector<1x1x32xf32>
    %108 = vector.shape_cast %107 : vector<1x1x32xf32> to vector<1x32xf32>
    %109 = vector.broadcast %108 : vector<1x32xf32> to vector<16x32xf32>
    %110 = arith.addf %106, %109 : vector<16x32xf32>
    %111 = arith.addf %92, %110 : vector<16x32xf32>
    %c0_47 = arith.constant 0 : index
    %c0_48 = arith.constant 0 : index
    %c0_49 = arith.constant 0 : index
    %112 = vector.load %arg11[%c0_47, %c0_48, %c0_49] : memref<2x1x32xf32, #tpu.memory_space<vmem>>, vector<1x1x32xf32>
    %113 = vector.shape_cast %112 : vector<1x1x32xf32> to vector<1x32xf32>
    %c0_50 = arith.constant 0 : index
    %c0_51 = arith.constant 0 : index
    %c0_52 = arith.constant 0 : index
    %114 = vector.load %arg12[%c0_50, %c0_51, %c0_52] : memref<2x1x32xf32, #tpu.memory_space<vmem>>, vector<1x1x32xf32>
    %115 = vector.shape_cast %114 : vector<1x1x32xf32> to vector<1x32xf32>
    %cst_53 = arith.constant dense<0.000000e+00> : vector<16xf32>
    %116 = vector.multi_reduction <add>, %111, %cst_53 [1] : vector<16x32xf32> to vector<16xf32>
    %117 = vector.shape_cast %116 : vector<16xf32> to vector<16x1xf32>
    %cst_54 = arith.constant 3.200000e+01 : f32
    %118 = vector.broadcast %cst_54 : f32 to vector<16x1xf32>
    %119 = arith.divf %117, %118 : vector<16x1xf32>
    %120 = vector.broadcast %119 : vector<16x1xf32> to vector<16x32xf32>
    %121 = arith.subf %111, %120 : vector<16x32xf32>
    %122 = arith.mulf %121, %121 : vector<16x32xf32>
    %cst_55 = arith.constant dense<0.000000e+00> : vector<16xf32>
    %123 = vector.multi_reduction <add>, %122, %cst_55 [1] : vector<16x32xf32> to vector<16xf32>
    %124 = vector.shape_cast %123 : vector<16xf32> to vector<16x1xf32>
    %cst_56 = arith.constant 3.200000e+01 : f32
    %125 = vector.broadcast %cst_56 : f32 to vector<16x1xf32>
    %126 = arith.divf %124, %125 : vector<16x1xf32>
    %127 = vector.broadcast %119 : vector<16x1xf32> to vector<16x32xf32>
    %128 = arith.subf %111, %127 : vector<16x32xf32>
    %cst_57 = arith.constant 9.99999974E-6 : f32
    %129 = vector.broadcast %cst_57 : f32 to vector<16x1xf32>
    %130 = arith.addf %126, %129 : vector<16x1xf32>
    %131 = math.rsqrt %130 : vector<16x1xf32>
    %132 = vector.broadcast %131 : vector<16x1xf32> to vector<16x32xf32>
    %133 = arith.mulf %128, %132 : vector<16x32xf32>
    %134 = vector.broadcast %113 : vector<1x32xf32> to vector<16x32xf32>
    %135 = arith.mulf %133, %134 : vector<16x32xf32>
    %136 = vector.broadcast %115 : vector<1x32xf32> to vector<16x32xf32>
    %137 = arith.addf %135, %136 : vector<16x32xf32>
    %c1 = arith.constant 1 : index
    %c0_58 = arith.constant 0 : index
    %c0_59 = arith.constant 0 : index
    %138 = vector.load %arg2[%c1, %c0_58, %c0_59] : memref<2x32x96xbf16, #tpu.memory_space<vmem>>, vector<1x32x96xbf16>
    %139 = vector.shape_cast %138 : vector<1x32x96xbf16> to vector<32x96xbf16>
    %140 = arith.truncf %137 : vector<16x32xf32> to vector<16x32xbf16>
    %cst_60 = arith.constant dense<0.000000e+00> : vector<16x96xf32>
    %141 = tpu.matmul %140, %139, %cst_60 {dimension_numbers = #tpu.dot_dimension_numbers<[1], [0], [0], [1], [0, 0, 1, 1], [], []>} : vector<16x32xbf16>, vector<32x96xbf16>, vector<16x96xf32> -> vector<16x96xf32>
    %c1_61 = arith.constant 1 : index
    %c0_62 = arith.constant 0 : index
    %c0_63 = arith.constant 0 : index
    %142 = vector.load %arg3[%c1_61, %c0_62, %c0_63] : memref<2x32x32xbf16, #tpu.memory_space<vmem>>, vector<1x32x32xbf16>
    %143 = vector.shape_cast %142 : vector<1x32x32xbf16> to vector<32x32xbf16>
    %144 = vector.extract_strided_slice %141 {offsets = [0, 0], sizes = [16, 16], strides = [1, 1]} : vector<16x96xf32> to vector<16x16xf32>
    %145 = vector.shape_cast %144 : vector<16x16xf32> to vector<2x8x16xf32>
    %146 = vector.extract_strided_slice %141 {offsets = [0, 32], sizes = [16, 16], strides = [1, 1]} : vector<16x96xf32> to vector<16x16xf32>
    %147 = vector.shape_cast %146 : vector<16x16xf32> to vector<2x8x16xf32>
    %148 = vector.extract_strided_slice %141 {offsets = [0, 64], sizes = [16, 16], strides = [1, 1]} : vector<16x96xf32> to vector<16x16xf32>
    %149 = vector.shape_cast %148 : vector<16x16xf32> to vector<2x8x16xf32>
    %150 = arith.truncf %145 : vector<2x8x16xf32> to vector<2x8x16xbf16>
    %151 = arith.truncf %147 : vector<2x8x16xf32> to vector<2x8x16xbf16>
    %cst_64 = arith.constant dense<0.000000e+00> : vector<2x8x8xf32>
    %152 = tpu.matmul %150, %151, %cst_64 {dimension_numbers = #tpu.dot_dimension_numbers<[2], [2], [1], [1], [0, 0, 0, 1, 1, 1], [0], [0]>} : vector<2x8x16xbf16>, vector<2x8x16xbf16>, vector<2x8x8xf32> -> vector<2x8x8xf32>
    %cst_65 = arith.constant dense<0xFF800000> : vector<2x8xf32>
    %153 = vector.multi_reduction <maximumf>, %152, %cst_65 [2] : vector<2x8x8xf32> to vector<2x8xf32>
    %154 = vector.shape_cast %153 : vector<2x8xf32> to vector<2x8x1xf32>
    %155 = vector.broadcast %154 : vector<2x8x1xf32> to vector<2x8x8xf32>
    %156 = arith.subf %152, %155 : vector<2x8x8xf32>
    %157 = math.exp %156 : vector<2x8x8xf32>
    %cst_66 = arith.constant dense<0.000000e+00> : vector<2x8xf32>
    %158 = vector.multi_reduction <add>, %157, %cst_66 [2] : vector<2x8x8xf32> to vector<2x8xf32>
    %159 = vector.shape_cast %158 : vector<2x8xf32> to vector<2x8x1xf32>
    %160 = tpu.reciprocal %159 {approx = true} : vector<2x8x1xf32> -> vector<2x8x1xf32>
    %161 = vector.broadcast %160 : vector<2x8x1xf32> to vector<2x8x8xf32>
    %162 = arith.mulf %157, %161 : vector<2x8x8xf32>
    %163 = arith.truncf %162 : vector<2x8x8xf32> to vector<2x8x8xbf16>
    %164 = arith.truncf %149 : vector<2x8x16xf32> to vector<2x8x16xbf16>
    %cst_67 = arith.constant dense<0.000000e+00> : vector<2x8x16xf32>
    %165 = tpu.matmul %163, %164, %cst_67 {dimension_numbers = #tpu.dot_dimension_numbers<[2], [1], [1], [2], [0, 0, 0, 1, 1, 2], [0], [0]>} : vector<2x8x8xbf16>, vector<2x8x16xbf16>, vector<2x8x16xf32> -> vector<2x8x16xf32>
    %166 = vector.shape_cast %165 : vector<2x8x16xf32> to vector<16x16xf32>
    %167 = vector.extract_strided_slice %143 {offsets = [0, 0], sizes = [16, 32], strides = [1, 1]} : vector<32x32xbf16> to vector<16x32xbf16>
    %168 = arith.truncf %166 : vector<16x16xf32> to vector<16x16xbf16>
    %cst_68 = arith.constant dense<0.000000e+00> : vector<16x32xf32>
    %169 = tpu.matmul %168, %167, %cst_68 {dimension_numbers = #tpu.dot_dimension_numbers<[1], [0], [0], [1], [0, 0, 1, 1], [], []>} : vector<16x16xbf16>, vector<16x32xbf16>, vector<16x32xf32> -> vector<16x32xf32>
    %170 = vector.extract_strided_slice %141 {offsets = [0, 16], sizes = [16, 16], strides = [1, 1]} : vector<16x96xf32> to vector<16x16xf32>
    %171 = vector.shape_cast %170 : vector<16x16xf32> to vector<2x8x16xf32>
    %172 = vector.extract_strided_slice %141 {offsets = [0, 48], sizes = [16, 16], strides = [1, 1]} : vector<16x96xf32> to vector<16x16xf32>
    %173 = vector.shape_cast %172 : vector<16x16xf32> to vector<2x8x16xf32>
    %174 = vector.extract_strided_slice %141 {offsets = [0, 80], sizes = [16, 16], strides = [1, 1]} : vector<16x96xf32> to vector<16x16xf32>
    %175 = vector.shape_cast %174 : vector<16x16xf32> to vector<2x8x16xf32>
    %176 = arith.truncf %171 : vector<2x8x16xf32> to vector<2x8x16xbf16>
    %177 = arith.truncf %173 : vector<2x8x16xf32> to vector<2x8x16xbf16>
    %cst_69 = arith.constant dense<0.000000e+00> : vector<2x8x8xf32>
    %178 = tpu.matmul %176, %177, %cst_69 {dimension_numbers = #tpu.dot_dimension_numbers<[2], [2], [1], [1], [0, 0, 0, 1, 1, 1], [0], [0]>} : vector<2x8x16xbf16>, vector<2x8x16xbf16>, vector<2x8x8xf32> -> vector<2x8x8xf32>
    %cst_70 = arith.constant dense<0xFF800000> : vector<2x8xf32>
    %179 = vector.multi_reduction <maximumf>, %178, %cst_70 [2] : vector<2x8x8xf32> to vector<2x8xf32>
    %180 = vector.shape_cast %179 : vector<2x8xf32> to vector<2x8x1xf32>
    %181 = vector.broadcast %180 : vector<2x8x1xf32> to vector<2x8x8xf32>
    %182 = arith.subf %178, %181 : vector<2x8x8xf32>
    %183 = math.exp %182 : vector<2x8x8xf32>
    %cst_71 = arith.constant dense<0.000000e+00> : vector<2x8xf32>
    %184 = vector.multi_reduction <add>, %183, %cst_71 [2] : vector<2x8x8xf32> to vector<2x8xf32>
    %185 = vector.shape_cast %184 : vector<2x8xf32> to vector<2x8x1xf32>
    %186 = tpu.reciprocal %185 {approx = true} : vector<2x8x1xf32> -> vector<2x8x1xf32>
    %187 = vector.broadcast %186 : vector<2x8x1xf32> to vector<2x8x8xf32>
    %188 = arith.mulf %183, %187 : vector<2x8x8xf32>
    %189 = arith.truncf %188 : vector<2x8x8xf32> to vector<2x8x8xbf16>
    %190 = arith.truncf %175 : vector<2x8x16xf32> to vector<2x8x16xbf16>
    %cst_72 = arith.constant dense<0.000000e+00> : vector<2x8x16xf32>
    %191 = tpu.matmul %189, %190, %cst_72 {dimension_numbers = #tpu.dot_dimension_numbers<[2], [1], [1], [2], [0, 0, 0, 1, 1, 2], [0], [0]>} : vector<2x8x8xbf16>, vector<2x8x16xbf16>, vector<2x8x16xf32> -> vector<2x8x16xf32>
    %192 = vector.shape_cast %191 : vector<2x8x16xf32> to vector<16x16xf32>
    %193 = vector.extract_strided_slice %143 {offsets = [16, 0], sizes = [16, 32], strides = [1, 1]} : vector<32x32xbf16> to vector<16x32xbf16>
    %194 = arith.truncf %192 : vector<16x16xf32> to vector<16x16xbf16>
    %cst_73 = arith.constant dense<0.000000e+00> : vector<16x32xf32>
    %195 = tpu.matmul %194, %193, %cst_73 {dimension_numbers = #tpu.dot_dimension_numbers<[1], [0], [0], [1], [0, 0, 1, 1], [], []>} : vector<16x16xbf16>, vector<16x32xbf16>, vector<16x32xf32> -> vector<16x32xf32>
    %196 = arith.addf %169, %195 : vector<16x32xf32>
    %c1_74 = arith.constant 1 : index
    %c0_75 = arith.constant 0 : index
    %c0_76 = arith.constant 0 : index
    %197 = vector.load %arg4[%c1_74, %c0_75, %c0_76] : memref<2x1x32xf32, #tpu.memory_space<vmem>>, vector<1x1x32xf32>
    %198 = vector.shape_cast %197 : vector<1x1x32xf32> to vector<1x32xf32>
    %199 = vector.broadcast %198 : vector<1x32xf32> to vector<16x32xf32>
    %200 = arith.addf %196, %199 : vector<16x32xf32>
    %201 = arith.addf %137, %200 : vector<16x32xf32>
    %c1_77 = arith.constant 1 : index
    %c0_78 = arith.constant 0 : index
    %c0_79 = arith.constant 0 : index
    %202 = vector.load %arg9[%c1_77, %c0_78, %c0_79] : memref<2x1x32xf32, #tpu.memory_space<vmem>>, vector<1x1x32xf32>
    %203 = vector.shape_cast %202 : vector<1x1x32xf32> to vector<1x32xf32>
    %c1_80 = arith.constant 1 : index
    %c0_81 = arith.constant 0 : index
    %c0_82 = arith.constant 0 : index
    %204 = vector.load %arg10[%c1_80, %c0_81, %c0_82] : memref<2x1x32xf32, #tpu.memory_space<vmem>>, vector<1x1x32xf32>
    %205 = vector.shape_cast %204 : vector<1x1x32xf32> to vector<1x32xf32>
    %cst_83 = arith.constant dense<0.000000e+00> : vector<16xf32>
    %206 = vector.multi_reduction <add>, %201, %cst_83 [1] : vector<16x32xf32> to vector<16xf32>
    %207 = vector.shape_cast %206 : vector<16xf32> to vector<16x1xf32>
    %cst_84 = arith.constant 3.200000e+01 : f32
    %208 = vector.broadcast %cst_84 : f32 to vector<16x1xf32>
    %209 = arith.divf %207, %208 : vector<16x1xf32>
    %210 = vector.broadcast %209 : vector<16x1xf32> to vector<16x32xf32>
    %211 = arith.subf %201, %210 : vector<16x32xf32>
    %212 = arith.mulf %211, %211 : vector<16x32xf32>
    %cst_85 = arith.constant dense<0.000000e+00> : vector<16xf32>
    %213 = vector.multi_reduction <add>, %212, %cst_85 [1] : vector<16x32xf32> to vector<16xf32>
    %214 = vector.shape_cast %213 : vector<16xf32> to vector<16x1xf32>
    %cst_86 = arith.constant 3.200000e+01 : f32
    %215 = vector.broadcast %cst_86 : f32 to vector<16x1xf32>
    %216 = arith.divf %214, %215 : vector<16x1xf32>
    %217 = vector.broadcast %209 : vector<16x1xf32> to vector<16x32xf32>
    %218 = arith.subf %201, %217 : vector<16x32xf32>
    %cst_87 = arith.constant 9.99999974E-6 : f32
    %219 = vector.broadcast %cst_87 : f32 to vector<16x1xf32>
    %220 = arith.addf %216, %219 : vector<16x1xf32>
    %221 = math.rsqrt %220 : vector<16x1xf32>
    %222 = vector.broadcast %221 : vector<16x1xf32> to vector<16x32xf32>
    %223 = arith.mulf %218, %222 : vector<16x32xf32>
    %224 = vector.broadcast %203 : vector<1x32xf32> to vector<16x32xf32>
    %225 = arith.mulf %223, %224 : vector<16x32xf32>
    %226 = vector.broadcast %205 : vector<1x32xf32> to vector<16x32xf32>
    %227 = arith.addf %225, %226 : vector<16x32xf32>
    %c1_88 = arith.constant 1 : index
    %c0_89 = arith.constant 0 : index
    %c0_90 = arith.constant 0 : index
    %228 = vector.load %arg5[%c1_88, %c0_89, %c0_90] : memref<2x32x32xbf16, #tpu.memory_space<vmem>>, vector<1x32x32xbf16>
    %229 = vector.shape_cast %228 : vector<1x32x32xbf16> to vector<32x32xbf16>
    %230 = arith.truncf %227 : vector<16x32xf32> to vector<16x32xbf16>
    %cst_91 = arith.constant dense<0.000000e+00> : vector<16x32xf32>
    %231 = tpu.matmul %230, %229, %cst_91 {dimension_numbers = #tpu.dot_dimension_numbers<[1], [0], [0], [1], [0, 0, 1, 1], [], []>} : vector<16x32xbf16>, vector<32x32xbf16>, vector<16x32xf32> -> vector<16x32xf32>
    %c1_92 = arith.constant 1 : index
    %c0_93 = arith.constant 0 : index
    %c0_94 = arith.constant 0 : index
    %232 = vector.load %arg6[%c1_92, %c0_93, %c0_94] : memref<2x1x32xf32, #tpu.memory_space<vmem>>, vector<1x1x32xf32>
    %233 = vector.shape_cast %232 : vector<1x1x32xf32> to vector<1x32xf32>
    %234 = vector.broadcast %233 : vector<1x32xf32> to vector<16x32xf32>
    %235 = arith.addf %231, %234 : vector<16x32xf32>
    %cst_95 = arith.constant 0.000000e+00 : f32
    %236 = vector.broadcast %cst_95 : f32 to vector<16x32xf32>
    %237 = arith.maximumf %235, %236 : vector<16x32xf32>
    %c1_96 = arith.constant 1 : index
    %c0_97 = arith.constant 0 : index
    %c0_98 = arith.constant 0 : index
    %238 = vector.load %arg7[%c1_96, %c0_97, %c0_98] : memref<2x32x32xbf16, #tpu.memory_space<vmem>>, vector<1x32x32xbf16>
    %239 = vector.shape_cast %238 : vector<1x32x32xbf16> to vector<32x32xbf16>
    %240 = arith.truncf %237 : vector<16x32xf32> to vector<16x32xbf16>
    %cst_99 = arith.constant dense<0.000000e+00> : vector<16x32xf32>
    %241 = tpu.matmul %240, %239, %cst_99 {dimension_numbers = #tpu.dot_dimension_numbers<[1], [0], [0], [1], [0, 0, 1, 1], [], []>} : vector<16x32xbf16>, vector<32x32xbf16>, vector<16x32xf32> -> vector<16x32xf32>
    %c1_100 = arith.constant 1 : index
    %c0_101 = arith.constant 0 : index
    %c0_102 = arith.constant 0 : index
    %242 = vector.load %arg8[%c1_100, %c0_101, %c0_102] : memref<2x1x32xf32, #tpu.memory_space<vmem>>, vector<1x1x32xf32>
    %243 = vector.shape_cast %242 : vector<1x1x32xf32> to vector<1x32xf32>
    %244 = vector.broadcast %243 : vector<1x32xf32> to vector<16x32xf32>
    %245 = arith.addf %241, %244 : vector<16x32xf32>
    %246 = arith.addf %227, %245 : vector<16x32xf32>
    %c1_103 = arith.constant 1 : index
    %c0_104 = arith.constant 0 : index
    %c0_105 = arith.constant 0 : index
    %247 = vector.load %arg11[%c1_103, %c0_104, %c0_105] : memref<2x1x32xf32, #tpu.memory_space<vmem>>, vector<1x1x32xf32>
    %248 = vector.shape_cast %247 : vector<1x1x32xf32> to vector<1x32xf32>
    %c1_106 = arith.constant 1 : index
    %c0_107 = arith.constant 0 : index
    %c0_108 = arith.constant 0 : index
    %249 = vector.load %arg12[%c1_106, %c0_107, %c0_108] : memref<2x1x32xf32, #tpu.memory_space<vmem>>, vector<1x1x32xf32>
    %250 = vector.shape_cast %249 : vector<1x1x32xf32> to vector<1x32xf32>
    %cst_109 = arith.constant dense<0.000000e+00> : vector<16xf32>
    %251 = vector.multi_reduction <add>, %246, %cst_109 [1] : vector<16x32xf32> to vector<16xf32>
    %252 = vector.shape_cast %251 : vector<16xf32> to vector<16x1xf32>
    %cst_110 = arith.constant 3.200000e+01 : f32
    %253 = vector.broadcast %cst_110 : f32 to vector<16x1xf32>
    %254 = arith.divf %252, %253 : vector<16x1xf32>
    %255 = vector.broadcast %254 : vector<16x1xf32> to vector<16x32xf32>
    %256 = arith.subf %246, %255 : vector<16x32xf32>
    %257 = arith.mulf %256, %256 : vector<16x32xf32>
    %cst_111 = arith.constant dense<0.000000e+00> : vector<16xf32>
    %258 = vector.multi_reduction <add>, %257, %cst_111 [1] : vector<16x32xf32> to vector<16xf32>
    %259 = vector.shape_cast %258 : vector<16xf32> to vector<16x1xf32>
    %cst_112 = arith.constant 3.200000e+01 : f32
    %260 = vector.broadcast %cst_112 : f32 to vector<16x1xf32>
    %261 = arith.divf %259, %260 : vector<16x1xf32>
    %262 = vector.broadcast %254 : vector<16x1xf32> to vector<16x32xf32>
    %263 = arith.subf %246, %262 : vector<16x32xf32>
    %cst_113 = arith.constant 9.99999974E-6 : f32
    %264 = vector.broadcast %cst_113 : f32 to vector<16x1xf32>
    %265 = arith.addf %261, %264 : vector<16x1xf32>
    %266 = math.rsqrt %265 : vector<16x1xf32>
    %267 = vector.broadcast %266 : vector<16x1xf32> to vector<16x32xf32>
    %268 = arith.mulf %263, %267 : vector<16x32xf32>
    %269 = vector.broadcast %248 : vector<1x32xf32> to vector<16x32xf32>
    %270 = arith.mulf %268, %269 : vector<16x32xf32>
    %271 = vector.broadcast %250 : vector<1x32xf32> to vector<16x32xf32>
    %272 = arith.addf %270, %271 : vector<16x32xf32>
    %273 = vector.shape_cast %272 : vector<16x32xf32> to vector<2x8x32xf32>
    %274 = arith.truncf %273 : vector<2x8x32xf32> to vector<2x8x32xbf16>
    %c0_114 = arith.constant 0 : index
    %c0_115 = arith.constant 0 : index
    %c0_116 = arith.constant 0 : index
    %275 = vector.load %arg13[%c0_114, %c0_115, %c0_116] : memref<2x8x32xbf16, #tpu.memory_space<vmem>>, vector<2x8x32xbf16>
    tpu.vector_store %arg13[%c0_114, %c0_115, %c0_116], %274 {strides = array<i32>} : memref<2x8x32xbf16, #tpu.memory_space<vmem>>, vector<2x8x32xbf16>,
    return
  }
  func.func @transform_0(%arg0: i32) -> (i32, i32, i32) {
    %c0_i32 = arith.constant 0 : i32
    %c0_i32_0 = arith.constant 0 : i32
    %c0_i32_1 = arith.constant 0 : i32
    return %arg0, %c0_i32, %c0_i32_0 : i32, i32, i32
  }
  func.func @transform_1(%arg0: i32) -> (i32, i32, i32) {
    %c0_i32 = arith.constant 0 : i32
    %c0_i32_0 = arith.constant 0 : i32
    %c0_i32_1 = arith.constant 0 : i32
    %c0_i32_2 = arith.constant 0 : i32
    return %c0_i32, %c0_i32_0, %c0_i32_1 : i32, i32, i32
  }
  func.func @transform_2(%arg0: i32) -> (i32, i32, i32) {
    %c0_i32 = arith.constant 0 : i32
    %c0_i32_0 = arith.constant 0 : i32
    %c0_i32_1 = arith.constant 0 : i32
    %c0_i32_2 = arith.constant 0 : i32
    return %c0_i32, %c0_i32_0, %c0_i32_1 : i32, i32, i32
  }
  func.func @transform_3(%arg0: i32) -> (i32, i32, i32) {
    %c0_i32 = arith.constant 0 : i32
    %c0_i32_0 = arith.constant 0 : i32
    %c0_i32_1 = arith.constant 0 : i32
    %c0_i32_2 = arith.constant 0 : i32
    return %c0_i32, %c0_i32_0, %c0_i32_1 : i32, i32, i32
  }
  func.func @transform_4(%arg0: i32) -> (i32, i32, i32) {
    %c0_i32 = arith.constant 0 : i32
    %c0_i32_0 = arith.constant 0 : i32
    %c0_i32_1 = arith.constant 0 : i32
    %c0_i32_2 = arith.constant 0 : i32
    return %c0_i32, %c0_i32_0, %c0_i32_1 : i32, i32, i32
  }
  func.func @transform_5(%arg0: i32) -> (i32, i32, i32) {
    %c0_i32 = arith.constant 0 : i32
    %c0_i32_0 = arith.constant 0 : i32
    %c0_i32_1 = arith.constant 0 : i32
    %c0_i32_2 = arith.constant 0 : i32
    return %c0_i32, %c0_i32_0, %c0_i32_1 : i32, i32, i32
  }
  func.func @transform_6(%arg0: i32) -> (i32, i32, i32) {
    %c0_i32 = arith.constant 0 : i32
    %c0_i32_0 = arith.constant 0 : i32
    %c0_i32_1 = arith.constant 0 : i32
    %c0_i32_2 = arith.constant 0 : i32
    return %c0_i32, %c0_i32_0, %c0_i32_1 : i32, i32, i32
  }
  func.func @transform_7(%arg0: i32) -> (i32, i32, i32) {
    %c0_i32 = arith.constant 0 : i32
    %c0_i32_0 = arith.constant 0 : i32
    %c0_i32_1 = arith.constant 0 : i32
    %c0_i32_2 = arith.constant 0 : i32
    return %c0_i32, %c0_i32_0, %c0_i32_1 : i32, i32, i32
  }
  func.func @transform_8(%arg0: i32) -> (i32, i32, i32) {
    %c0_i32 = arith.constant 0 : i32
    %c0_i32_0 = arith.constant 0 : i32
    %c0_i32_1 = arith.constant 0 : i32
    %c0_i32_2 = arith.constant 0 : i32
    return %c0_i32, %c0_i32_0, %c0_i32_1 : i32, i32, i32
  }
  func.func @transform_9(%arg0: i32) -> (i32, i32, i32) {
    %c0_i32 = arith.constant 0 : i32
    %c0_i32_0 = arith.constant 0 : i32
    %c0_i32_1 = arith.constant 0 : i32
    %c0_i32_2 = arith.constant 0 : i32
    return %c0_i32, %c0_i32_0, %c0_i32_1 : i32, i32, i32
  }
  func.func @transform_10(%arg0: i32) -> (i32, i32, i32) {
    %c0_i32 = arith.constant 0 : i32
    %c0_i32_0 = arith.constant 0 : i32
    %c0_i32_1 = arith.constant 0 : i32
    %c0_i32_2 = arith.constant 0 : i32
    return %c0_i32, %c0_i32_0, %c0_i32_1 : i32, i32, i32
  }
  func.func @transform_11(%arg0: i32) -> (i32, i32, i32) {
    %c0_i32 = arith.constant 0 : i32
    %c0_i32_0 = arith.constant 0 : i32
    %c0_i32_1 = arith.constant 0 : i32
    %c0_i32_2 = arith.constant 0 : i32
    return %c0_i32, %c0_i32_0, %c0_i32_1 : i32, i32, i32
  }
  func.func @transform_12(%arg0: i32) -> (i32, i32, i32) {
    %c0_i32 = arith.constant 0 : i32
    %c0_i32_0 = arith.constant 0 : i32
    %c0_i32_1 = arith.constant 0 : i32
    return %arg0, %c0_i32, %c0_i32_0 : i32, i32, i32
  }
}

module attributes {stable_mosaic.version = 11 : i64} {
  func.func @loss_kernel(%arg0: i32, %arg1: memref<2x2x8x32xf32, #tpu.memory_space<vmem>>, %arg2: memref<2x8x32xbf16, #tpu.memory_space<vmem>>, %arg3: memref<2x2x8x5xf32, #tpu.memory_space<vmem>>, %arg4: memref<2x8x5xbf16, #tpu.memory_space<vmem>>, %arg5: memref<2x2x8xf32, #tpu.memory_space<vmem>>, %arg6: memref<2x8xf32, #tpu.memory_space<vmem>>, %arg7: memref<1x1x1xf32, #tpu.memory_space<vmem>>, %arg8: memref<1x1x1xf32, #tpu.memory_space<vmem>>) attributes {dimension_semantics = [#tpu.dimension_semantics<parallel>], iteration_bounds = array<i64: 1>, scalar_prefetch = 0 : i64, scratch_operands = 0 : i64, tpu.core_type = #tpu.core_type<tc>, window_params = [{transform_indices = @transform_0, window_bounds = array<i64: 2, 2, 8, 32>}, {transform_indices = @transform_1, window_bounds = array<i64: 2, 8, 32>}, {transform_indices = @transform_2, window_bounds = array<i64: 2, 2, 8, 5>}, {transform_indices = @transform_3, window_bounds = array<i64: 2, 8, 5>}, {transform_indices = @transform_4, window_bounds = array<i64: 2, 2, 8>}, {transform_indices = @transform_5, window_bounds = array<i64: 2, 8>}, {transform_indices = @transform_6, window_bounds = array<i64: 1, 1, 1>}, {transform_indices = @transform_7, window_bounds = array<i64: 1, 1, 1>}]} {
    %c0 = arith.constant 0 : index
    %c0_0 = arith.constant 0 : index
    %c0_1 = arith.constant 0 : index
    %c0_2 = arith.constant 0 : index
    %0 = vector.load %arg1[%c0, %c0_0, %c0_1, %c0_2] : memref<2x2x8x32xf32, #tpu.memory_space<vmem>>, vector<2x2x8x32xf32>
    %c0_3 = arith.constant 0 : index
    %c0_4 = arith.constant 0 : index
    %c0_5 = arith.constant 0 : index
    %1 = vector.load %arg2[%c0_3, %c0_4, %c0_5] : memref<2x8x32xbf16, #tpu.memory_space<vmem>>, vector<2x8x32xbf16>
    %2 = arith.extf %1 : vector<2x8x32xbf16> to vector<2x8x32xf32>
    %c0_6 = arith.constant 0 : index
    %c0_7 = arith.constant 0 : index
    %c0_8 = arith.constant 0 : index
    %c0_9 = arith.constant 0 : index
    %3 = vector.load %arg3[%c0_6, %c0_7, %c0_8, %c0_9] : memref<2x2x8x5xf32, #tpu.memory_space<vmem>>, vector<2x2x8x5xf32>
    %c0_10 = arith.constant 0 : index
    %c0_11 = arith.constant 0 : index
    %c0_12 = arith.constant 0 : index
    %4 = vector.load %arg4[%c0_10, %c0_11, %c0_12] : memref<2x8x5xbf16, #tpu.memory_space<vmem>>, vector<2x8x5xbf16>
    %5 = arith.extf %4 : vector<2x8x5xbf16> to vector<2x8x5xf32>
    %c0_13 = arith.constant 0 : index
    %c0_14 = arith.constant 0 : index
    %c0_15 = arith.constant 0 : index
    %6 = vector.load %arg5[%c0_13, %c0_14, %c0_15] : memref<2x2x8xf32, #tpu.memory_space<vmem>>, vector<2x2x8xf32>
    %c0_16 = arith.constant 0 : index
    %c0_17 = arith.constant 0 : index
    %7 = vector.load %arg6[%c0_16, %c0_17] : memref<2x8xf32, #tpu.memory_space<vmem>>, vector<2x8xf32>
    %8 = vector.shape_cast %2 : vector<2x8x32xf32> to vector<1x2x8x32xf32>
    %9 = vector.broadcast %8 : vector<1x2x8x32xf32> to vector<2x2x8x32xf32>
    %10 = arith.mulf %0, %9 : vector<2x2x8x32xf32>
    %cst = arith.constant dense<0.000000e+00> : vector<2x2x8xf32>
    %11 = vector.multi_reduction <add>, %10, %cst [3] : vector<2x2x8x32xf32> to vector<2x2x8xf32>
    %cst_18 = arith.constant 5.000000e-01 : f32
    %12 = vector.broadcast %cst_18 : f32 to vector<2x2x8xf32>
    %13 = arith.mulf %12, %11 : vector<2x2x8xf32>
    %14 = arith.addf %6, %13 : vector<2x2x8xf32>
    %15 = vector.shape_cast %5 : vector<2x8x5xf32> to vector<1x2x8x5xf32>
    %16 = vector.broadcast %15 : vector<1x2x8x5xf32> to vector<2x2x8x5xf32>
    %17 = arith.mulf %3, %16 : vector<2x2x8x5xf32>
    %cst_19 = arith.constant dense<0.000000e+00> : vector<2x2x8xf32>
    %18 = vector.multi_reduction <add>, %17, %cst_19 [3] : vector<2x2x8x5xf32> to vector<2x2x8xf32>
    %cst_20 = arith.constant 5.000000e-01 : f32
    %19 = vector.broadcast %cst_20 : f32 to vector<2x2x8xf32>
    %20 = arith.mulf %19, %18 : vector<2x2x8xf32>
    %21 = arith.addf %14, %20 : vector<2x2x8xf32>
    %22 = tpu.iota {dimensions = array<i32: 0>} : vector<2x2x8xi32>
    %c0_i32 = arith.constant 0 : i32
    %23 = vector.broadcast %c0_i32 : i32 to vector<2x2x8xi32>
    %24 = arith.cmpi eq, %22, %23 : vector<2x2x8xi32>
    %cst_21 = arith.constant 1.000000e+00 : f32
    %cst_22 = arith.constant -1.000000e+00 : f32
    %25 = vector.broadcast %cst_21 : f32 to vector<2x2x8xf32>
    %26 = vector.broadcast %cst_22 : f32 to vector<2x2x8xf32>
    %27 = arith.select %24, %25, %26 : vector<2x2x8xi1>, vector<2x2x8xf32>
    %cst_23 = arith.constant 0.000000e+00 : f32
    %28 = vector.broadcast %cst_23 : f32 to vector<2x2x8xf32>
    %29 = arith.subf %28, %27 : vector<2x2x8xf32>
    %30 = arith.mulf %29, %21 : vector<2x2x8xf32>
    %31 = math.exp %30 : vector<2x2x8xf32>
    %cst_24 = arith.constant 1.000000e+00 : f32
    %32 = vector.broadcast %cst_24 : f32 to vector<2x2x8xf32>
    %33 = arith.addf %32, %31 : vector<2x2x8xf32>
    %cst_25 = arith.constant 1.000000e+00 : f32
    %34 = vector.broadcast %cst_25 : f32 to vector<2x2x8xf32>
    %35 = arith.divf %34, %33 : vector<2x2x8xf32>
    %cst_26 = arith.constant 1.000000e-24 : f32
    %36 = vector.broadcast %cst_26 : f32 to vector<2x2x8xf32>
    %37 = arith.addf %35, %36 : vector<2x2x8xf32>
    %38 = math.log %37 : vector<2x2x8xf32>
    %cst_27 = arith.constant 0.000000e+00 : f32
    %39 = vector.broadcast %cst_27 : f32 to vector<2x2x8xf32>
    %40 = arith.subf %39, %38 : vector<2x2x8xf32>
    %41 = vector.shape_cast %7 : vector<2x8xf32> to vector<1x2x8xf32>
    %42 = vector.broadcast %41 : vector<1x2x8xf32> to vector<2x2x8xf32>
    %43 = arith.mulf %40, %42 : vector<2x2x8xf32>
    %44 = vector.shape_cast %43 : vector<2x2x8xf32> to vector<1x2x2x8xf32>
    %cst_28 = arith.constant dense<0.000000e+00> : vector<1xf32>
    %45 = vector.multi_reduction <add>, %44, %cst_28 [1, 2, 3] : vector<1x2x2x8xf32> to vector<1xf32>
    %46 = vector.shape_cast %45 : vector<1xf32> to vector<1x1x1x1xf32>
    %47 = vector.extract %46[0, 0, 0, 0] : f32 from vector<1x1x1x1xf32>
    %48 = vector.broadcast %47 : f32 to vector<1x1x1xf32>
    %c0_29 = arith.constant 0 : index
    %c0_30 = arith.constant 0 : index
    %c0_31 = arith.constant 0 : index
    %49 = vector.load %arg7[%c0_29, %c0_30, %c0_31] : memref<1x1x1xf32, #tpu.memory_space<vmem>>, vector<1x1x1xf32>
    tpu.vector_store %arg7[%c0_29, %c0_30, %c0_31], %48 {strides = array<i32>} : memref<1x1x1xf32, #tpu.memory_space<vmem>>, vector<1x1x1xf32>,
    %50 = vector.shape_cast %7 : vector<2x8xf32> to vector<1x2x8xf32>
    %cst_32 = arith.constant dense<0.000000e+00> : vector<1xf32>
    %51 = vector.multi_reduction <add>, %50, %cst_32 [1, 2] : vector<1x2x8xf32> to vector<1xf32>
    %52 = vector.shape_cast %51 : vector<1xf32> to vector<1x1x1xf32>
    %53 = vector.extract %52[0, 0, 0] : f32 from vector<1x1x1xf32>
    %54 = vector.broadcast %53 : f32 to vector<1x1x1xf32>
    %c0_33 = arith.constant 0 : index
    %c0_34 = arith.constant 0 : index
    %c0_35 = arith.constant 0 : index
    %55 = vector.load %arg8[%c0_33, %c0_34, %c0_35] : memref<1x1x1xf32, #tpu.memory_space<vmem>>, vector<1x1x1xf32>
    tpu.vector_store %arg8[%c0_33, %c0_34, %c0_35], %54 {strides = array<i32>} : memref<1x1x1xf32, #tpu.memory_space<vmem>>, vector<1x1x1xf32>,
    return
  }
  func.func @transform_0(%arg0: i32) -> (i32, i32, i32, i32) {
    %c0_i32 = arith.constant 0 : i32
    %c0_i32_0 = arith.constant 0 : i32
    %c0_i32_1 = arith.constant 0 : i32
    %c0_i32_2 = arith.constant 0 : i32
    return %c0_i32, %arg0, %c0_i32_0, %c0_i32_1 : i32, i32, i32, i32
  }
  func.func @transform_1(%arg0: i32) -> (i32, i32, i32) {
    %c0_i32 = arith.constant 0 : i32
    %c0_i32_0 = arith.constant 0 : i32
    %c0_i32_1 = arith.constant 0 : i32
    return %arg0, %c0_i32, %c0_i32_0 : i32, i32, i32
  }
  func.func @transform_2(%arg0: i32) -> (i32, i32, i32, i32) {
    %c0_i32 = arith.constant 0 : i32
    %c0_i32_0 = arith.constant 0 : i32
    %c0_i32_1 = arith.constant 0 : i32
    %c0_i32_2 = arith.constant 0 : i32
    return %c0_i32, %arg0, %c0_i32_0, %c0_i32_1 : i32, i32, i32, i32
  }
  func.func @transform_3(%arg0: i32) -> (i32, i32, i32) {
    %c0_i32 = arith.constant 0 : i32
    %c0_i32_0 = arith.constant 0 : i32
    %c0_i32_1 = arith.constant 0 : i32
    return %arg0, %c0_i32, %c0_i32_0 : i32, i32, i32
  }
  func.func @transform_4(%arg0: i32) -> (i32, i32, i32) {
    %c0_i32 = arith.constant 0 : i32
    %c0_i32_0 = arith.constant 0 : i32
    %c0_i32_1 = arith.constant 0 : i32
    return %c0_i32, %arg0, %c0_i32_0 : i32, i32, i32
  }
  func.func @transform_5(%arg0: i32) -> (i32, i32) {
    %c0_i32 = arith.constant 0 : i32
    %c0_i32_0 = arith.constant 0 : i32
    return %arg0, %c0_i32 : i32, i32
  }
  func.func @transform_6(%arg0: i32) -> (i32, i32, i32) {
    %c0_i32 = arith.constant 0 : i32
    %c0_i32_0 = arith.constant 0 : i32
    %c0_i32_1 = arith.constant 0 : i32
    return %arg0, %c0_i32, %c0_i32_0 : i32, i32, i32
  }
  func.func @transform_7(%arg0: i32) -> (i32, i32, i32) {
    %c0_i32 = arith.constant 0 : i32
    %c0_i32_0 = arith.constant 0 : i32
    %c0_i32_1 = arith.constant 0 : i32
    return %arg0, %c0_i32, %c0_i32_0 : i32, i32, i32
  }
}

</mosaic_0001>

<bundles_post_ra>
// kernel: tctrec_forward.8
= control target key start
LH: loop header
LB: loop body
LE: loop exit
PB: predicated region body
PF: predicated region fallthrough
CT: control target
= control target key end

     0   :  { %8 = vsyncpa [#allocation3], 0  ;;  %s465_s0 = inlined_call_operand.hbm [shape: bf16[2,8,32], index: 0, kind: input, shape index: {}]   ;;  %s466_s1 = inlined_call_operand.hbm [shape: f32[32,8], index: 1, kind: input, shape index: {}]   ;;  %s467_s2 = inlined_call_operand.hbm [shape: f32[1,8], index: 2, kind: input, shape index: {}]   ;;  %s468_s3 = inlined_call_operand.hbm [shape: bf16[2,8,5], index: 3, kind: output, shape index: {}]  }
   0x1   :  { %9 = vsyncpa [#allocation6], 0 }
   0x2   :  { %10 = vsyncpa [#allocation4], 0  ;;  %s381_s12 = smov [#allocation5]   ;;  %s287_s16 = scalar_lea.hbm %s466_s1, 512 }
   0x3   :  { %s28_s13 = sshll.u32 %s381_s12, 4  ;;  %p288_p0 = scmp.ne.s32.totalorder %s466_s1, %s287_s16  ;;  %s29_s13 = int_to_ptr.vmem [resolvable:$true] %s28_s13 }
   0x4   :  { %p291_p1 = scmp.lt.u32.totalorder %s287_s16, %s466_s1 }
   0x6   :  { %p293_p2 = pnand %p291_p1, %p288_p0 }
   0x8   :  { %296 = shalt.err (!%p293_p2)
}
   0x9   :  { %s297_s21 = scalar_lea.vmem %s29_s13, 512  ;;  %p302_p4 = scmp.lt.s32.totalorder %s29_s13, %s29_s13 }
   0xa   :  { %p298_p3 = scmp.ne.s32.totalorder %s29_s13, %s297_s21  ;;  %p303_p5 = scmp.lt.s32.totalorder %s297_s21, %s297_s21 }
   0xc   :  { %p304_p6 = por %p303_p5, %p302_p4 }
   0xe   :  { %p305_p7 = pnand %p304_p6, %p298_p3 }
  0x10   :  { %308 = shalt.err (!%p305_p7)
}
  0x11   :  { %s382_s22 = smov 128   ;;  %s383_s23 = smov 8  }
  0x12   :  { %34 = dma.hbm_to_vmem [thread:$0]  %s466_s1, 512, %s29_s13, [#allocation6], %s382_s22, %s382_s22, %s383_s23  }
  0x13   :  { %s384_s26 = smov [#allocation2]   ;;  %s309_s30 = scalar_lea.hbm %s465_s0, 128 }
  0x14   :  { %s16_s27 = sshll.u32 %s384_s26, 4  ;;  %p310_p8 = scmp.ne.s32.totalorder %s465_s0, %s309_s30  ;;  %s17_s27 = int_to_ptr.vmem [resolvable:$true] %s16_s27 }
  0x15   :  { %p313_p9 = scmp.lt.u32.totalorder %s309_s30, %s465_s0 }
  0x17   :  { %p315_p10 = pnand %p313_p9, %p310_p8 }
  0x19   :  { %318 = shalt.err (!%p315_p10)
}
  0x1a   :  { %s319_s8 = scalar_lea.vmem %s17_s27, 128  ;;  %p324_p12 = scmp.lt.s32.totalorder %s17_s27, %s17_s27 }
  0x1b   :  { %p320_p11 = scmp.ne.s32.totalorder %s17_s27, %s319_s8  ;;  %p325_p13 = scmp.lt.s32.totalorder %s319_s8, %s319_s8 }
  0x1d   :  { %p326_p0 = por %p325_p13, %p324_p12 }
  0x1f   :  { %p327_p1 = pnand %p326_p0, %p320_p11 }
  0x21   :  { %330 = shalt.err (!%p327_p1)
}
  0x22   :  { %s385_s1 = smov 64   ;;  %s386_s9 = smov 4  }
  0x23   :  { %22 = dma.hbm_to_vmem [thread:$0]  %s465_s0, 128, %s17_s27, [#allocation3], %s385_s1, %s385_s1, %s386_s9  }
  0x24   :  { %s387_s12 = smov [#allocation7]   ;;  %s331_s16 = scalar_lea.hbm %s467_s2, 16 }
  0x25   :  { %s41_s13 = sshll.u32 %s387_s12, 4  ;;  %p332_p2 = scmp.ne.s32.totalorder %s467_s2, %s331_s16  ;;  %s42_s13 = int_to_ptr.vmem [resolvable:$true] %s41_s13 }
  0x26   :  { %p335_p3 = scmp.lt.u32.totalorder %s331_s16, %s467_s2 }
  0x28   :  { %p337_p4 = pnand %p335_p3, %p332_p2 }
  0x2a   :  { %340 = shalt.err (!%p337_p4)
}
  0x2b   :  { %s341_s21 = scalar_lea.vmem %s42_s13, 16  ;;  %s345_s0 = scalar_lea.vmem %s42_s13, 32 }
  0x2c   :  { %p342_p5 = scmp.ne.s32.totalorder %s42_s13, %s341_s21  ;;  %p346_p6 = scmp.lt.s32.totalorder %s42_s13, %s42_s13 }
  0x2d   :  { %p347_p7 = scmp.lt.s32.totalorder %s345_s0, %s341_s21 }
  0x2f   :  { %p348_p8 = por %p347_p7, %p346_p6 }
  0x31   :  { %p349_p9 = pnand %p348_p8, %p342_p5 }
  0x33   :  { %352 = shalt.err (!%p349_p9)
}
  0x34   :  { %44 = dma.hbm_to_vmem [thread:$0]  %s467_s2, 16, %s42_s13, [#allocation6]  }
  0x35   :  { %375 = dma.done.wait [#allocation3], 128  }
  0x36   :  { %376 = vsyncadd [#allocation3], 4294967168 }
  0x37   :  { %377 = dma.done.wait [#allocation6], 528  }
  0x38   :  { %378 = vsyncadd [#allocation6], 4294966768  ;;  %v388_v0 = vmov 0.0   ;;  %vm389_vm0 = vmmov 0   ;;  %v55_v1 = vld [vmem:[#allocation5] sm:$0xff]  ;;  %v56_v2 = vld [vmem:[#allocation5 + $0x8] sm:$0xff] }
  0x39   :  { %254 = vmatprep.subr.bf16.mxu0 %v388_v0  ;;  %262 = vmatprep.subr.bf16.mxu1 %v388_v0  ;;  %v57_v3 = vld [vmem:[#allocation5 + $0x10] sm:$0xff]  ;;  %v59_v4 = vpack.c.bf16 %v56_v2, %v55_v1  ;;  %v58_v5 = vld [vmem:[#allocation5 + $0x18] sm:$0xff]  ;;  %vm69_vm1 = vcmask 261120   ;;  %v245_v9 = vld [vmem:[#allocation7] ss:$0 sm:$0xff]  ;;  %s390_s2 = smov [#allocation8]  }
  0x3a   :  { %258 = vmatprep.mubr.msk.bf16.mxu0 %vm389_vm0, %v388_v0  ;;  %266 = vmatprep.mubr.msk.bf16.mxu1 %vm389_vm0, %v388_v0  ;;  %v60_v6 = vpack.c.bf16 %v58_v5, %v57_v3  ;;  %v62_v7 = vld [vmem:[#allocation2] sm:$0xf]  ;;  %v146_v8 = vld [vmem:[#allocation2 + $0x4] sm:$0xf]  ;;  %s232_s24 = sshll.u32 %s390_s2, 4  ;;  %vm224_vm2 = vcmask 35840   ;;  %s233_s24 = int_to_ptr.vmem [resolvable:$true] %s232_s24 }
  0x3b   :  { %255 = vmatpush3.bf16.msra.mxu0 %v59_v4  ;;  %263 = vmatpush3.bf16.msra.mxu1 %v59_v4  ;;  %s353_s25 = scalar_lea.vmem %s233_s24, 128  ;;  %p358_p11 = scmp.lt.s32.totalorder %s233_s24, %s233_s24 }
  0x3c   :  { %256 = vmatprep.subr.bf16.mxu0 %v388_v0  ;;  %264 = vmatprep.subr.bf16.mxu1 %v388_v0  ;;  %p354_p10 = scmp.ne.s32.totalorder %s233_s24, %s353_s25  ;;  %p359_p12 = scmp.lt.s32.totalorder %s353_s25, %s353_s25 }
  0x3e   :  { %p360_p13 = por %p359_p12, %p358_p11 }
  0x3f   :  { %257 = vmatpush3.bf16.msra.mxu0 %v60_v6  ;;  %265 = vmatpush3.bf16.msra.mxu1 %v60_v6 }
  0x40   :  { %p361_p0 = pnand %p360_p13, %p354_p10 }
  0x42   :  { %259 = vmatmul.mubr.msk.bf16.vlgmr.msra.gmra.mrb[0].mxu0 %vm69_vm1, %v62_v7  ;;  %267 = vmatmul.mubr.msk.bf16.vlgmr.msra.gmra.mrb[0].mxu1 %vm69_vm1, %v146_v8 }
 0x115   :  { %v107_v10 = vpop.f32.mrb[0].mxu0  ;;  %v184_v11 = vpop.f32.mrb[0].mxu1 }
 0x116   :  { %v108_v12 = vadd.f32 %v245_v9, %v107_v10  ;;  %v185_v13 = vadd.f32 %v245_v9, %v184_v11  ;;  %v260_v14 = vpop.f32.mrb[1].mxu0  ;;  %v268_v15 = vpop.f32.mrb[1].mxu1 }
 0x117   :  { %v110_v16 = vpop.f32.mrb[2].mxu0  ;;  %v187_v17 = vpop.f32.mrb[2].mxu1 }
 0x118   :  { %v261_v18 = vpop.f32.mrb[3].mxu0  ;;  %v269_v19 = vpop.f32.mrb[3].mxu1  ;;  %v280_v20 = vpack.i.bf16 %v185_v13, %v108_v12 }
 0x11a   :  { %281 = vxpose.xlu0.b32.start.end [1/1] (short) (narrow) %v280_v20, 8 }
 0x19a   :  { %v282_v21 = vpop.trf.xlu0 }
 0x19b   :  { %v286_v22 = vunpack.i.h.bf16 %v282_v21  ;;  %v283_v23 = vunpack.i.l.bf16 %v282_v21 }
 0x19d   :  { %v223_v24 = vpack.c.bf16 %v286_v22, %v286_v22  ;;  %v222_v25 = vpack.c.bf16 %v283_v23, %v283_v23 }
 0x19f   :  { %225 = vst.msk [vmem:[#allocation8] sm:$0xf] %vm224_vm2, %v222_v25  ;;  %226 = vst.msk [vmem:[#allocation8 + $0x4] sm:$0xf] %vm224_vm2, %v223_v24 }
 0x1a0   :  { %364 = shalt.err (!%p361_p0)
}
 0x1a1   :  { %s365_s28 = scalar_lea.hbm %s468_s3, 128 }
 0x1a2   :  { %p366_p1 = scmp.ne.s32.totalorder %s468_s3, %s365_s28  ;;  %p369_p2 = scmp.lt.u32.totalorder %s365_s28, %s468_s3 }
 0x1a4   :  { %p371_p3 = pnand %p369_p2, %p366_p1 }
 0x1a6   :  { %374 = shalt.err (!%p371_p3)
}
 0x1a7   :  { %238 = dma.vmem_to_hbm [thread:$0]  %s233_s24, 128, %s468_s3, [#allocation4], %s385_s1, %s385_s1, %s386_s9  }
 0x1a8   :  { %379 = dma.done.wait [#allocation4], 128  }
 0x1a9   :  { %380 = vsyncadd [#allocation4], 4294967168 }
 0x1aa   :  { %242 = vsyncpa [#allocation3], 1 }
 0x1ab   :  { %243 = vsyncpa [#allocation6], 1 }
 0x1ac   :  { %244 = vsyncpa [#allocation4], 1 }

// kernel: tctrec_forward.6
= control target key start
LH: loop header
LB: loop body
LE: loop exit
PB: predicated region body
PF: predicated region fallthrough
CT: control target
= control target key end

     0   :  { %11 = vsyncpa [#allocation3], 0  ;;  %s620_s0 = inlined_call_operand.hbm [shape: f32[2,8,5], index: 0, kind: input, shape index: {}]   ;;  %s621_s1 = inlined_call_operand.hbm [shape: f32[2,3], index: 1, kind: input, shape index: {}]   ;;  %s622_s2 = inlined_call_operand.hbm [shape: f32[8,32], index: 2, kind: input, shape index: {}]   ;;  %s623_s3 = inlined_call_operand.hbm [shape: f32[1,32], index: 3, kind: input, shape index: {}]   ;;  %s624_s4 = inlined_call_operand.hbm [shape: f32[3,32], index: 4, kind: input, shape index: {}]   ;;  %s625_s5 = inlined_call_operand.hbm [shape: f32[3,32], index: 5, kind: input, shape index: {}]   ;;  %s626_s6 = inlined_call_operand.hbm [shape: bf16[2,8,32], index: 6, kind: output, shape index: {}]  }
   0x1   :  { %12 = vsyncpa [#allocation6], 0 }
   0x2   :  { %13 = vsyncpa [#allocation9], 0 }
   0x3   :  { %14 = vsyncpa [#allocation12], 0 }
   0x4   :  { %15 = vsyncpa [#allocation4], 0  ;;  %s486_s21 = smov [#allocation5]   ;;  %s487_s23 = smov [#allocation8]  }
   0x5   :  { %s34_s22 = sshll.u32 %s486_s21, 4  ;;  %s54_s24 = sshll.u32 %s487_s23, 4  ;;  %s35_s22 = int_to_ptr.vmem [resolvable:$true] %s34_s22  ;;  %s55_s24 = int_to_ptr.vmem [resolvable:$true] %s54_s24 }
   0x6   :  { %s322_s27 = scalar_lea.hbm %s621_s1, 32 }
   0x7   :  { %p323_p0 = scmp.ne.s32.totalorder %s621_s1, %s322_s27  ;;  %p326_p1 = scmp.lt.u32.totalorder %s322_s27, %s621_s1 }
   0x9   :  { %p328_p2 = pnand %p326_p1, %p323_p0 }
   0xb   :  { %331 = shalt.err (!%p328_p2)
}
   0xc   :  { %s332_s8 = scalar_lea.vmem %s35_s22, 32  ;;  %p337_p4 = scmp.lt.s32.totalorder %s35_s22, %s35_s22 }
   0xd   :  { %p333_p3 = scmp.ne.s32.totalorder %s35_s22, %s332_s8  ;;  %p338_p5 = scmp.lt.s32.totalorder %s332_s8, %s332_s8 }
   0xf   :  { %p339_p6 = por %p338_p5, %p337_p4 }
  0x11   :  { %p340_p7 = pnand %p339_p6, %p333_p3 }
  0x13   :  { %343 = shalt.err (!%p340_p7)
}
  0x14   :  { %37 = dma.hbm_to_vmem [thread:$0]  %s621_s1, 32, %s35_s22, [#allocation6]  }
  0x15   :  { %s344_s13 = scalar_lea.hbm %s623_s3, 16 }
  0x16   :  { %p345_p8 = scmp.ne.s32.totalorder %s623_s3, %s344_s13  ;;  %p348_p9 = scmp.lt.u32.totalorder %s344_s13, %s623_s3 }
  0x18   :  { %p350_p10 = pnand %p348_p9, %p345_p8 }
  0x1a   :  { %353 = shalt.err (!%p350_p10)
}
  0x1b   :  { %s354_s18 = scalar_lea.vmem %s55_s24, 16  ;;  %s358_s19 = scalar_lea.vmem %s55_s24, 32 }
  0x1c   :  { %p355_p11 = scmp.ne.s32.totalorder %s55_s24, %s354_s18  ;;  %p359_p12 = scmp.lt.s32.totalorder %s55_s24, %s55_s24 }
  0x1d   :  { %p360_p13 = scmp.lt.s32.totalorder %s358_s19, %s354_s18 }
  0x1f   :  { %p361_p0 = por %p360_p13, %p359_p12 }
  0x21   :  { %p362_p1 = pnand %p361_p0, %p355_p11 }
  0x23   :  { %365 = shalt.err (!%p362_p1)
}
  0x24   :  { %57 = dma.hbm_to_vmem [thread:$0]  %s623_s3, 16, %s55_s24, [#allocation9]  }
  0x25   :  { %s488_s21 = smov [#allocation2]   ;;  %s366_s26 = scalar_lea.hbm %s620_s0, 256 }
  0x26   :  { %s21_s22 = sshll.u32 %s488_s21, 4  ;;  %p367_p2 = scmp.ne.s32.totalorder %s620_s0, %s366_s26  ;;  %s22_s22 = int_to_ptr.vmem [resolvable:$true] %s21_s22 }
  0x27   :  { %p370_p3 = scmp.lt.u32.totalorder %s366_s26, %s620_s0 }
  0x29   :  { %p372_p4 = pnand %p370_p3, %p367_p2 }
  0x2b   :  { %375 = shalt.err (!%p372_p4)
}
  0x2c   :  { %s376_s7 = scalar_lea.vmem %s22_s22, 256  ;;  %p381_p6 = scmp.lt.s32.totalorder %s22_s22, %s22_s22 }
  0x2d   :  { %p377_p5 = scmp.ne.s32.totalorder %s22_s22, %s376_s7  ;;  %p382_p7 = scmp.lt.s32.totalorder %s376_s7, %s376_s7 }
  0x2f   :  { %p383_p8 = por %p382_p7, %p381_p6 }
  0x31   :  { %p384_p9 = pnand %p383_p8, %p377_p5 }
  0x33   :  { %387 = shalt.err (!%p384_p9)
}
  0x34   :  { %s489_s3 = smov 128   ;;  %s490_s24 = smov 8  }
  0x35   :  { %27 = dma.hbm_to_vmem [thread:$0]  %s620_s0, 256, %s22_s22, [#allocation3], %s489_s3, %s489_s3, %s490_s24  }
  0x36   :  { %s491_s10 = smov [#allocation7]   ;;  %s492_s12 = smov [#allocation10]  }
  0x37   :  { %s44_s11 = sshll.u32 %s491_s10, 4  ;;  %s64_s13 = sshll.u32 %s492_s12, 4  ;;  %s45_s11 = int_to_ptr.vmem [resolvable:$true] %s44_s11  ;;  %s65_s13 = int_to_ptr.vmem [resolvable:$true] %s64_s13 }
  0x38   :  { %s388_s16 = scalar_lea.hbm %s622_s2, 128 }
  0x39   :  { %p389_p10 = scmp.ne.s32.totalorder %s622_s2, %s388_s16  ;;  %p392_p11 = scmp.lt.u32.totalorder %s388_s16, %s622_s2 }
  0x3b   :  { %p394_p12 = pnand %p392_p11, %p389_p10 }
  0x3d   :  { %397 = shalt.err (!%p394_p12)
}
  0x3e   :  { %s398_s0 = scalar_lea.vmem %s45_s11, 128  ;;  %p403_p0 = scmp.lt.s32.totalorder %s45_s11, %s45_s11 }
  0x3f   :  { %p399_p13 = scmp.ne.s32.totalorder %s45_s11, %s398_s0  ;;  %p404_p1 = scmp.lt.s32.totalorder %s398_s0, %s398_s0 }
  0x41   :  { %p405_p2 = por %p404_p1, %p403_p0 }
  0x43   :  { %p406_p3 = pnand %p405_p2, %p399_p13 }
  0x45   :  { %409 = shalt.err (!%p406_p3)
}
  0x46   :  { %47 = dma.hbm_to_vmem [thread:$0]  %s622_s2, 128, %s45_s11, [#allocation6]  }
  0x47   :  { %s410_s25 = scalar_lea.hbm %s624_s4, 64 }
  0x48   :  { %p411_p4 = scmp.ne.s32.totalorder %s624_s4, %s410_s25  ;;  %p414_p5 = scmp.lt.u32.totalorder %s410_s25, %s624_s4 }
  0x4a   :  { %p416_p6 = pnand %p414_p5, %p411_p4 }
  0x4c   :  { %419 = shalt.err (!%p416_p6)
}
  0x4d   :  { %s420_s30 = scalar_lea.vmem %s65_s13, 64  ;;  %p425_p8 = scmp.lt.s32.totalorder %s65_s13, %s65_s13 }
  0x4e   :  { %p421_p7 = scmp.ne.s32.totalorder %s65_s13, %s420_s30  ;;  %p426_p9 = scmp.lt.s32.totalorder %s420_s30, %s420_s30 }
  0x50   :  { %p427_p10 = por %p426_p9, %p425_p8 }
  0x52   :  { %p428_p11 = pnand %p427_p10, %p421_p7 }
  0x54   :  { %431 = shalt.err (!%p428_p11)
}
  0x55   :  { %67 = dma.hbm_to_vmem [thread:$0]  %s624_s4, 64, %s65_s13, [#allocation9]  }
  0x56   :  { %s493_s3 = smov [#allocation11]   ;;  %s432_s10 = scalar_lea.hbm %s625_s5, 64 }
  0x57   :  { %s74_s24 = sshll.u32 %s493_s3, 4  ;;  %p433_p12 = scmp.ne.s32.totalorder %s625_s5, %s432_s10  ;;  %s75_s24 = int_to_ptr.vmem [resolvable:$true] %s74_s24 }
  0x58   :  { %p436_p13 = scmp.lt.u32.totalorder %s432_s10, %s625_s5 }
  0x5a   :  { %p438_p0 = pnand %p436_p13, %p433_p12 }
  0x5c   :  { %441 = shalt.err (!%p438_p0)
}
  0x5d   :  { %s442_s16 = scalar_lea.vmem %s75_s24, 64  ;;  %p447_p2 = scmp.lt.s32.totalorder %s75_s24, %s75_s24 }
  0x5e   :  { %p443_p1 = scmp.ne.s32.totalorder %s75_s24, %s442_s16  ;;  %p448_p3 = scmp.lt.s32.totalorder %s442_s16, %s442_s16 }
  0x60   :  { %p449_p4 = por %p448_p3, %p447_p2 }
  0x62   :  { %p450_p5 = pnand %p449_p4, %p443_p1 }
  0x64   :  { %453 = shalt.err (!%p450_p5)
}
  0x65   :  { %77 = dma.hbm_to_vmem [thread:$0]  %s625_s5, 64, %s75_s24, [#allocation12]  }
  0x66   :  { %476 = dma.done.wait [#allocation3], 256  }
  0x67   :  { %477 = vsyncadd [#allocation3], 4294967040 }
  0x68   :  { %478 = dma.done.wait [#allocation6], 160  }
  0x69   :  { %479 = vsyncadd [#allocation6], 4294967136 }
  0x6a   :  { %480 = dma.done.wait [#allocation9], 80  }
  0x6b   :  { %481 = vsyncadd [#allocation9], 4294967216 }
  0x6c   :  { %482 = dma.done.wait [#allocation12], 64  }
  0x6d   :  { %483 = vsyncadd [#allocation12], 4294967232  ;;  %v494_v0 = vmov 0.0   ;;  %vm495_vm0 = vmmov 0   ;;  %v235_v1 = vlaneseq  ;;  %v100_v4 = vld [vmem:[#allocation2] sm:$0xff]  ;;  %v173_v5 = vld [vmem:[#allocation2 + $0x8] sm:$0xff] }
  0x6e   :  { %296 = vmatprep.subr.bf16.mxu0 %v494_v0  ;;  %298 = vmatprep.mubr.msk.bf16.mxu0 %vm495_vm0, %v494_v0  ;;  %v97_v6 = vld [vmem:[#allocation7] sm:$0xff]  ;;  %vm128_vm1 = vcmask 1043456   ;;  %v101_v7 = vpack.c.bf16 %v100_v4, %v100_v4  ;;  %v234_v9 = vld [vmem:[#allocation5] sm:$0x3]  ;;  %v174_v12 = vpack.c.bf16 %v173_v5, %v173_v5  ;;  %vm124_vm2 = vcmask 64512   ;;  %s496_s5 = smov [#allocation13]  }
  0x6f   :  { %302 = vmatprep.subr.bf16.mxu1 %v494_v0  ;;  %304 = vmatprep.mubr.msk.bf16.mxu1 %vm495_vm0, %v494_v0  ;;  %v236_v2 = vshrl.u32 %v235_v1, 7  ;;  %v98_v8 = vpack.c.bf16 %v97_v6, %v97_v6  ;;  %v249_v18 = vld [vmem:[#allocation10] sm:$0x7]  ;;  %v252_v20 = vld [vmem:[#allocation11] sm:$0x7]  ;;  %vm261_vm3 = vcmask 1044480  }
  0x70   :  { %108 = vxpose.xlu0.c.b16.start.end [1/1] (short) (narrow) %v101_v7, 16  ;;  %v289_v24 = vld [vmem:[#allocation8] ss:$0 sm:$0xff]  ;;  %vm266_vm4 = vcmask 257024   ;;  %s274_s17 = sshll.u32 %s496_s5, 4  ;;  %s275_s17 = int_to_ptr.vmem [resolvable:$true] %s274_s17 }
  0x71   :  { %v237_v3 = vsub.s32 0, %v236_v2  ;;  %v244_v10 = vsub.s32 1, %v236_v2  ;;  %v130_v13 = vsel %vm128_vm1, %v98_v8, 0  ;;  %s454_s18 = scalar_lea.vmem %s275_s17, 128  ;;  %p459_p7 = scmp.lt.s32.totalorder %s275_s17, %s275_s17 }
  0x72   :  { %297 = vmatpush3.bf16.msra.mxu0 %v130_v13  ;;  %303 = vmatpush3.bf16.msra.mxu1 %v130_v13  ;;  %p455_p6 = scmp.ne.s32.totalorder %s275_s17, %s454_s18  ;;  %p460_p8 = scmp.lt.s32.totalorder %s454_s18, %s454_s18 }
  0x73   :  { %v238_v11 = vrot.slane %v234_v9, %v237_v3  ;;  %v245_v14 = vrot.slane %v234_v9, %v244_v10 }
  0x74   :  { %175 = vxpose.xlu0.c.b16.start.end [1/1] (short) (narrow) %v174_v12, 16  ;;  %p461_p9 = por %p460_p8, %p459_p7 }
  0x75   :  { %240 = vbcast.lane.b32.xlu1 %v238_v11, 256 }
  0x76   :  { %p462_p10 = pnand %p461_p9, %p455_p6 }
  0x79   :  { %247 = vbcast.lane.b32.xlu1 %v245_v14, 256 }
  0xd6   :  { %v116_v15 = vpop.trf.xlu0 }
  0xd7   :  { %299 = vmatmul.mubr.msk.bf16.vlgmr.msra.gmra.mrb[0].mxu0 %vm124_vm2, %v116_v15 }
  0xda   :  { %v183_v16 = vpop.trf.xlu0 }
  0xdb   :  { %305 = vmatmul.mubr.msk.bf16.vlgmr.msra.gmra.mrb[0].mxu1 %vm124_vm2, %v183_v16 }
  0xe7   :  { %v241_v17 = vpop.permute.xlu1 %240 }
  0xe8   :  { %v250_v19 = vmul.f32 %v249_v18, %v241_v17 }
  0xea   :  { %v253_v22 = vadd.f32 %v252_v20, %v250_v19 }
  0xeb   :  { %v248_v21 = vpop.permute.xlu1 %247 }
  0xec   :  { %v251_v23 = vmul.f32 %v249_v18, %v248_v21  ;;  %v257_v25 = vrot.slane %v253_v22, 3 }
  0xee   :  { %v254_v26 = vadd.f32 %v252_v20, %v251_v23 }
  0xf0   :  { %v258_v31 = vrot.slane %v254_v26, 3 }
 0x1aa   :  { %v166_v27 = vpop.f32.mrb[0].mxu0 }
 0x1ab   :  { %v167_v28 = vadd.f32 %v289_v24, %v166_v27  ;;  %v300_v29 = vpop.f32.mrb[1].mxu0 }
 0x1ac   :  { %v169_v30 = vpop.f32.mrb[2].mxu0 }
 0x1ad   :  { %v262_v32 = vsel %vm261_vm3, %v167_v28, %v257_v25  ;;  %v301_v33 = vpop.f32.mrb[3].mxu0 }
 0x1ae   :  { %v264_v34 = vpack.c.bf16 %v262_v32, %v262_v32  ;;  %v228_v35 = vpop.f32.mrb[0].mxu1 }
 0x1af   :  { %v229_v36 = vadd.f32 %v289_v24, %v228_v35  ;;  %v306_v37 = vpop.f32.mrb[1].mxu1 }
 0x1b0   :  { %v231_v38 = vpop.f32.mrb[2].mxu1  ;;  %267 = vst.msk [vmem:[#allocation13] sm:$0xf] %vm266_vm4, %v264_v34 }
 0x1b1   :  { %v263_v39 = vsel %vm261_vm3, %v229_v36, %v258_v31  ;;  %v307_v40 = vpop.f32.mrb[3].mxu1 }
 0x1b2   :  { %v265_v41 = vpack.c.bf16 %v263_v39, %v263_v39 }
 0x1b4   :  { %268 = vst.msk [vmem:[#allocation13 + $0x4] sm:$0xf] %vm266_vm4, %v265_v41 }
 0x1b5   :  { %465 = shalt.err (!%p462_p10)
}
 0x1b6   :  { %s466_s0 = scalar_lea.hbm %s626_s6, 128 }
 0x1b7   :  { %p467_p11 = scmp.ne.s32.totalorder %s626_s6, %s466_s0  ;;  %p470_p12 = scmp.lt.u32.totalorder %s466_s0, %s626_s6 }
 0x1b9   :  { %p472_p13 = pnand %p470_p12, %p467_p11 }
 0x1bb   :  { %475 = shalt.err (!%p472_p13)
}
 0x1bc   :  { %s497_s25 = smov 64   ;;  %s498_s26 = smov 4  }
 0x1bd   :  { %280 = dma.vmem_to_hbm [thread:$0]  %s275_s17, 128, %s626_s6, [#allocation4], %s497_s25, %s497_s25, %s498_s26  }
 0x1be   :  { %484 = dma.done.wait [#allocation4], 128  }
 0x1bf   :  { %485 = vsyncadd [#allocation4], 4294967168 }
 0x1c0   :  { %284 = vsyncpa [#allocation3], 1 }
 0x1c1   :  { %285 = vsyncpa [#allocation6], 1 }
 0x1c2   :  { %286 = vsyncpa [#allocation9], 1 }
 0x1c3   :  { %287 = vsyncpa [#allocation12], 1 }
 0x1c4   :  { %288 = vsyncpa [#allocation4], 1 }

// kernel: tctrec_forward.5
= control target key start
LH: loop header
LB: loop body
LE: loop exit
PB: predicated region body
PF: predicated region fallthrough
CT: control target
= control target key end

     0   :  { %18 = vsyncpa [#allocation3], 0  ;;  %s3288_s0 = inlined_call_operand.hbm [shape: f32[2,8,32], index: 0, kind: input, shape index: {}]   ;;  %s3289_s1 = inlined_call_operand.hbm [shape: f32[2,8,1], index: 1, kind: input, shape index: {}]   ;;  %s3290_s2 = inlined_call_operand.hbm [shape: bf16[2,32,96], index: 2, kind: input, shape index: {}]   ;;  %s3291_s3 = inlined_call_operand.hbm [shape: bf16[2,32,32], index: 3, kind: input, shape index: {}]   ;;  %s3292_s4 = inlined_call_operand.hbm [shape: f32[2,1,32], index: 4, kind: input, shape index: {}]   ;;  %s3293_s5 = inlined_call_operand.hbm [shape: bf16[2,32,32], index: 5, kind: input, shape index: {}]   ;;  %s3294_s6 = inlined_call_operand.hbm [shape: f32[2,1,32], index: 6, kind: input, shape index: {}]   ;;  %s3295_s7 = inlined_call_operand.hbm [shape: bf16[2,32,32], index: 7, kind: input, shape index: {}]   ;;  %s3296_s8 = inlined_call_operand.hbm [shape: f32[2,1,32], index: 8, kind: input, shape index: {}]   ;;  %s3297_s9 = inlined_call_operand.hbm [shape: f32[2,1,32], index: 9, kind: input, shape index: {}]   ;;  %s3298_s10 = inlined_call_operand.hbm [shape: f32[2,1,32], index: 10, kind: input, shape index: {}]   ;;  %s3299_s11 = inlined_call_operand.hbm [shape: f32[2,1,32], index: 11, kind: input, shape index: {}]   ;;  %s3300_s12 = inlined_call_operand.hbm [shape: f32[2,1,32], index: 12, kind: input, shape index: {}]   ;;  %s3301_s13 = inlined_call_operand.hbm [shape: bf16[2,8,32], index: 13, kind: output, shape index: {}]  }
   0x1   :  { %19 = vsyncpa [#allocation6], 0 }
   0x2   :  { %20 = vsyncpa [#allocation9], 0 }
   0x3   :  { %21 = vsyncpa [#allocation12], 0 }
   0x4   :  { %22 = vsyncpa [#allocation15], 0 }
   0x5   :  { %23 = vsyncpa [#allocation18], 0 }
   0x6   :  { %24 = vsyncpa [#allocation21], 0 }
   0x7   :  { %25 = vsyncpa [#allocation4], 0  ;;  %s2691_s25 = smov [#allocation5]   ;;  %s2367_s29 = scalar_lea.hbm %s3289_s1, 256 }
   0x8   :  { %s43_s26 = sshll.u32 %s2691_s25, 4  ;;  %p2368_p0 = scmp.ne.s32.totalorder %s3289_s1, %s2367_s29  ;;  %s44_s26 = int_to_ptr.vmem [resolvable:$true] %s43_s26 }
   0x9   :  { %p2371_p1 = scmp.lt.u32.totalorder %s2367_s29, %s3289_s1 }
   0xb   :  { %p2373_p2 = pnand %p2371_p1, %p2368_p0 }
   0xd   :  { %2376 = shalt.err (!%p2373_p2)
}
   0xe   :  { %s2377_s17 = scalar_lea.vmem %s44_s26, 256  ;;  %p2382_p4 = scmp.lt.s32.totalorder %s44_s26, %s44_s26 }
   0xf   :  { %p2378_p3 = scmp.ne.s32.totalorder %s44_s26, %s2377_s17  ;;  %p2383_p5 = scmp.lt.s32.totalorder %s2377_s17, %s2377_s17 }
  0x11   :  { %p2384_p6 = por %p2383_p5, %p2382_p4 }
  0x13   :  { %p2385_p7 = pnand %p2384_p6, %p2378_p3 }
  0x15   :  { %2388 = shalt.err (!%p2385_p7)
}
  0x16   :  { %s2692_s18 = smov 128   ;;  %s2693_s19 = smov 8  }
  0x17   :  { %49 = dma.hbm_to_vmem [thread:$0]  %s3289_s1, 256, %s44_s26, [#allocation6], %s2692_s18, %s2692_s18, %s2693_s19  }
  0x18   :  { %s2694_s22 = smov [#allocation8]   ;;  %s2695_s24 = smov [#allocation11]  }
  0x19   :  { %s67_s23 = sshll.u32 %s2694_s22, 4  ;;  %s91_s25 = sshll.u32 %s2695_s24, 4  ;;  %s68_s23 = int_to_ptr.vmem [resolvable:$true] %s67_s23  ;;  %s92_s25 = int_to_ptr.vmem [resolvable:$true] %s91_s25 }
  0x1a   :  { %s2389_s29 = scalar_lea.hbm %s3291_s3, 512 }
  0x1b   :  { %p2390_p8 = scmp.ne.s32.totalorder %s3291_s3, %s2389_s29  ;;  %p2393_p9 = scmp.lt.u32.totalorder %s2389_s29, %s3291_s3 }
  0x1d   :  { %p2395_p10 = pnand %p2393_p9, %p2390_p8 }
  0x1f   :  { %2398 = shalt.err (!%p2395_p10)
}
  0x20   :  { %s2399_s1 = scalar_lea.vmem %s68_s23, 512  ;;  %p2404_p12 = scmp.lt.s32.totalorder %s68_s23, %s68_s23 }
  0x21   :  { %p2400_p11 = scmp.ne.s32.totalorder %s68_s23, %s2399_s1  ;;  %p2405_p13 = scmp.lt.s32.totalorder %s2399_s1, %s2399_s1 }
  0x23   :  { %p2406_p0 = por %p2405_p13, %p2404_p12 }
  0x25   :  { %p2407_p1 = pnand %p2406_p0, %p2400_p11 }
  0x27   :  { %2410 = shalt.err (!%p2407_p1)
}
  0x28   :  { %s2696_s26 = smov 64   ;;  %s2697_s17 = smov 4  }
  0x29   :  { %73 = dma.hbm_to_vmem [thread:$0]  %s3291_s3, 512, %s68_s23, [#allocation9], %s2696_s26, %s2696_s26, %s2697_s17  }
  0x2a   :  { %s2411_s27 = scalar_lea.hbm %s3293_s5, 512 }
  0x2b   :  { %p2412_p2 = scmp.ne.s32.totalorder %s3293_s5, %s2411_s27  ;;  %p2415_p3 = scmp.lt.u32.totalorder %s2411_s27, %s3293_s5 }
  0x2d   :  { %p2417_p4 = pnand %p2415_p3, %p2412_p2 }
  0x2f   :  { %2420 = shalt.err (!%p2417_p4)
}
  0x30   :  { %s2421_s15 = scalar_lea.vmem %s92_s25, 512  ;;  %p2426_p6 = scmp.lt.s32.totalorder %s92_s25, %s92_s25 }
  0x31   :  { %p2422_p5 = scmp.ne.s32.totalorder %s92_s25, %s2421_s15  ;;  %p2427_p7 = scmp.lt.s32.totalorder %s2421_s15, %s2421_s15 }
  0x33   :  { %p2428_p8 = por %p2427_p7, %p2426_p6 }
  0x35   :  { %p2429_p9 = pnand %p2428_p8, %p2422_p5 }
  0x37   :  { %2432 = shalt.err (!%p2429_p9)
}
  0x38   :  { %97 = dma.hbm_to_vmem [thread:$0]  %s3293_s5, 512, %s92_s25, [#allocation12], %s2696_s26, %s2696_s26, %s2697_s17  }
  0x39   :  { %s2698_s16 = smov [#allocation14]   ;;  %s2433_s22 = scalar_lea.hbm %s3295_s7, 512 }
  0x3a   :  { %s115_s1 = sshll.u32 %s2698_s16, 4  ;;  %p2434_p10 = scmp.ne.s32.totalorder %s3295_s7, %s2433_s22  ;;  %s116_s1 = int_to_ptr.vmem [resolvable:$true] %s115_s1 }
  0x3b   :  { %p2437_p11 = scmp.lt.u32.totalorder %s2433_s22, %s3295_s7 }
  0x3d   :  { %p2439_p12 = pnand %p2437_p11, %p2434_p10 }
  0x3f   :  { %2442 = shalt.err (!%p2439_p12)
}
  0x40   :  { %s2443_s30 = scalar_lea.vmem %s116_s1, 512  ;;  %p2448_p0 = scmp.lt.s32.totalorder %s116_s1, %s116_s1 }
  0x41   :  { %p2444_p13 = scmp.ne.s32.totalorder %s116_s1, %s2443_s30  ;;  %p2449_p1 = scmp.lt.s32.totalorder %s2443_s30, %s2443_s30 }
  0x43   :  { %p2450_p2 = por %p2449_p1, %p2448_p0 }
  0x45   :  { %p2451_p3 = pnand %p2450_p2, %p2444_p13 }
  0x47   :  { %2454 = shalt.err (!%p2451_p3)
}
  0x48   :  { %121 = dma.hbm_to_vmem [thread:$0]  %s3295_s7, 512, %s116_s1, [#allocation15], %s2696_s26, %s2696_s26, %s2697_s17  }
  0x49   :  { %s2699_s14 = smov [#allocation17]   ;;  %s2700_s3 = smov [#allocation20]  }
  0x4a   :  { %s139_s15 = sshll.u32 %s2699_s14, 4  ;;  %s163_s23 = sshll.u32 %s2700_s3, 4  ;;  %s140_s15 = int_to_ptr.vmem [resolvable:$true] %s139_s15  ;;  %s2848_s23 = int_to_ptr.vmem [resolvable:$true] %s163_s23 }
  0x4b   :  { %s2455_s21 = scalar_lea.hbm %s3297_s9, 32 }
  0x4c   :  { %p2456_p4 = scmp.ne.s32.totalorder %s3297_s9, %s2455_s21  ;;  %p2459_p5 = scmp.lt.u32.totalorder %s2455_s21, %s3297_s9 }
  0x4e   :  { %p2461_p6 = pnand %p2459_p5, %p2456_p4 }
  0x50   :  { %2464 = shalt.err (!%p2461_p6)
}
  0x51   :  { %s2465_s7 = scalar_lea.vmem %s140_s15, 32  ;;  %p2470_p8 = scmp.lt.s32.totalorder %s140_s15, %s140_s15 }
  0x52   :  { %p2466_p7 = scmp.ne.s32.totalorder %s140_s15, %s2465_s7  ;;  %p2471_p9 = scmp.lt.s32.totalorder %s2465_s7, %s2465_s7 }
  0x54   :  { %p2472_p10 = por %p2471_p9, %p2470_p8 }
  0x56   :  { %p2473_p11 = pnand %p2472_p10, %p2466_p7 }
  0x58   :  { %2476 = shalt.err (!%p2473_p11)
}
  0x59   :  { %s2701_s1 = smov 16   ;;  %s2702_s29 = smov 1  }
  0x5a   :  { %145 = dma.hbm_to_vmem [thread:$0]  %s3297_s9, 32, %s140_s15, [#allocation18], %s2701_s1, %s2701_s1, %s2702_s29  }
  0x5b   :  { %s2477_s3 = scalar_lea.hbm %s3299_s11, 32 }
  0x5c   :  { %p2478_p12 = scmp.ne.s32.totalorder %s3299_s11, %s2477_s3  ;;  %p2481_p13 = scmp.lt.u32.totalorder %s2477_s3, %s3299_s11 }
  0x5e   :  { %p2483_p0 = pnand %p2481_p13, %p2478_p12 }
  0x60   :  { %2486 = shalt.err (!%p2483_p0)
}
  0x61   :  { %s2487_s24 = scalar_lea.vmem %s2848_s23, 32  ;;  %p2492_p2 = scmp.lt.s32.totalorder %s2848_s23, %s2848_s23 }
  0x62   :  { %p2488_p1 = scmp.ne.s32.totalorder %s2848_s23, %s2487_s24  ;;  %p2493_p3 = scmp.lt.s32.totalorder %s2487_s24, %s2487_s24 }
  0x64   :  { %p2494_p4 = por %p2493_p3, %p2492_p2 }
  0x66   :  { %p2495_p5 = pnand %p2494_p4, %p2488_p1 }
  0x68   :  { %2498 = shalt.err (!%p2495_p5)
}
  0x69   :  { %169 = dma.hbm_to_vmem [thread:$0]  %s3299_s11, 32, %s2848_s23, [#allocation21], %s2701_s1, %s2701_s1, %s2702_s29  }
  0x6a   :  { %s2703_s27 = smov [#allocation2]   ;;  %s2704_s7 = smov [#allocation7]  }
  0x6b   :  { %s31_s28 = sshll.u32 %s2703_s27, 4  ;;  %s55_s30 = sshll.u32 %s2704_s7, 4  ;;  %s32_s28 = int_to_ptr.vmem [resolvable:$true] %s31_s28  ;;  %s2885_s30 = int_to_ptr.vmem [resolvable:$true] %s55_s30 }
  0x6c   :  { %s2499_s14 = scalar_lea.hbm %s3288_s0, 256 }
  0x6d   :  { %p2500_p6 = scmp.ne.s32.totalorder %s3288_s0, %s2499_s14  ;;  %p2503_p7 = scmp.lt.u32.totalorder %s2499_s14, %s3288_s0 }
  0x6f   :  { %p2505_p8 = pnand %p2503_p7, %p2500_p6 }
  0x71   :  { %2508 = shalt.err (!%p2505_p8)
}
  0x72   :  { %s2509_s11 = scalar_lea.vmem %s32_s28, 256  ;;  %p2514_p10 = scmp.lt.s32.totalorder %s32_s28, %s32_s28 }
  0x73   :  { %p2510_p9 = scmp.ne.s32.totalorder %s32_s28, %s2509_s11  ;;  %p2515_p11 = scmp.lt.s32.totalorder %s2509_s11, %s2509_s11 }
  0x75   :  { %p2516_p12 = por %p2515_p11, %p2514_p10 }
  0x77   :  { %p2517_p13 = pnand %p2516_p12, %p2510_p9 }
  0x79   :  { %2520 = shalt.err (!%p2517_p13)
}
  0x7a   :  { %37 = dma.hbm_to_vmem [thread:$0]  %s3288_s0, 256, %s32_s28, [#allocation3], %s2692_s18, %s2692_s18, %s2693_s19  }
  0x7b   :  { %s2521_s15 = scalar_lea.hbm %s3290_s2, 512 }
  0x7c   :  { %p2522_p0 = scmp.ne.s32.totalorder %s3290_s2, %s2521_s15  ;;  %p2525_p1 = scmp.lt.u32.totalorder %s2521_s15, %s3290_s2 }
  0x7e   :  { %p2527_p2 = pnand %p2525_p1, %p2522_p0 }
  0x80   :  { %2530 = shalt.err (!%p2527_p2)
}
  0x81   :  { %s2531_s14 = scalar_lea.vmem %s2885_s30, 512  ;;  %p2536_p4 = scmp.lt.s32.totalorder %s2885_s30, %s2885_s30 }
  0x82   :  { %p2532_p3 = scmp.ne.s32.totalorder %s2885_s30, %s2531_s14  ;;  %p2537_p5 = scmp.lt.s32.totalorder %s2531_s14, %s2531_s14 }
  0x84   :  { %p2538_p6 = por %p2537_p5, %p2536_p4 }
  0x86   :  { %p2539_p7 = pnand %p2538_p6, %p2532_p3 }
  0x88   :  { %2542 = shalt.err (!%p2539_p7)
}
  0x89   :  { %61 = dma.hbm_to_vmem [thread:$0]  %s3290_s2, 512, %s2885_s30, [#allocation6], %s2696_s26, %s2696_s26, %s2697_s17  }
  0x8a   :  { %s2705_s19 = smov [#allocation10]   ;;  %s2706_s3 = smov [#allocation13]  }
  0x8b   :  { %s79_s28 = sshll.u32 %s2705_s19, 4  ;;  %s103_s16 = sshll.u32 %s2706_s3, 4  ;;  %s80_s28 = int_to_ptr.vmem [resolvable:$true] %s79_s28  ;;  %s2922_s16 = int_to_ptr.vmem [resolvable:$true] %s103_s16 }
  0x8c   :  { %s2543_s11 = scalar_lea.hbm %s3292_s4, 32 }
  0x8d   :  { %p2544_p8 = scmp.ne.s32.totalorder %s3292_s4, %s2543_s11  ;;  %p2547_p9 = scmp.lt.u32.totalorder %s2543_s11, %s3292_s4 }
  0x8f   :  { %p2549_p10 = pnand %p2547_p9, %p2544_p8 }
  0x91   :  { %2552 = shalt.err (!%p2549_p10)
}
  0x92   :  { %s2553_s2 = scalar_lea.vmem %s80_s28, 32  ;;  %p2558_p12 = scmp.lt.s32.totalorder %s80_s28, %s80_s28 }
  0x93   :  { %p2554_p11 = scmp.ne.s32.totalorder %s80_s28, %s2553_s2  ;;  %p2559_p13 = scmp.lt.s32.totalorder %s2553_s2, %s2553_s2 }
  0x95   :  { %p2560_p0 = por %p2559_p13, %p2558_p12 }
  0x97   :  { %p2561_p1 = pnand %p2560_p0, %p2554_p11 }
  0x99   :  { %2564 = shalt.err (!%p2561_p1)
}
  0x9a   :  { %85 = dma.hbm_to_vmem [thread:$0]  %s3292_s4, 32, %s80_s28, [#allocation9], %s2701_s1, %s2701_s1, %s2702_s29  }
  0x9b   :  { %s2565_s5 = scalar_lea.hbm %s3294_s6, 32 }
  0x9c   :  { %p2566_p2 = scmp.ne.s32.totalorder %s3294_s6, %s2565_s5  ;;  %p2569_p3 = scmp.lt.u32.totalorder %s2565_s5, %s3294_s6 }
  0x9e   :  { %p2571_p4 = pnand %p2569_p3, %p2566_p2 }
  0xa0   :  { %2574 = shalt.err (!%p2571_p4)
}
  0xa1   :  { %s2575_s19 = scalar_lea.vmem %s2922_s16, 32  ;;  %p2580_p6 = scmp.lt.s32.totalorder %s2922_s16, %s2922_s16 }
  0xa2   :  { %p2576_p5 = scmp.ne.s32.totalorder %s2922_s16, %s2575_s19  ;;  %p2581_p7 = scmp.lt.s32.totalorder %s2575_s19, %s2575_s19 }
  0xa4   :  { %p2582_p8 = por %p2581_p7, %p2580_p6 }
  0xa6   :  { %p2583_p9 = pnand %p2582_p8, %p2576_p5 }
  0xa8   :  { %2586 = shalt.err (!%p2583_p9)
}
  0xa9   :  { %109 = dma.hbm_to_vmem [thread:$0]  %s3294_s6, 32, %s2922_s16, [#allocation12], %s2701_s1, %s2701_s1, %s2702_s29  }
  0xaa   :  { %s2707_s3 = smov [#allocation16]   ;;  %s2708_s21 = smov [#allocation19]  }
  0xab   :  { %s127_s20 = sshll.u32 %s2707_s3, 4  ;;  %s151_s11 = sshll.u32 %s2708_s21, 4  ;;  %s128_s20 = int_to_ptr.vmem [resolvable:$true] %s127_s20  ;;  %s2959_s11 = int_to_ptr.vmem [resolvable:$true] %s151_s11 }
  0xac   :  { %s2587_s24 = scalar_lea.hbm %s3296_s8, 32 }
  0xad   :  { %p2588_p10 = scmp.ne.s32.totalorder %s3296_s8, %s2587_s24  ;;  %p2591_p11 = scmp.lt.u32.totalorder %s2587_s24, %s3296_s8 }
  0xaf   :  { %p2593_p12 = pnand %p2591_p11, %p2588_p10 }
  0xb1   :  { %2596 = shalt.err (!%p2593_p12)
}
  0xb2   :  { %s2597_s6 = scalar_lea.vmem %s128_s20, 32  ;;  %p2602_p0 = scmp.lt.s32.totalorder %s128_s20, %s128_s20 }
  0xb3   :  { %p2598_p13 = scmp.ne.s32.totalorder %s128_s20, %s2597_s6  ;;  %p2603_p1 = scmp.lt.s32.totalorder %s2597_s6, %s2597_s6 }
  0xb5   :  { %p2604_p2 = por %p2603_p1, %p2602_p0 }
  0xb7   :  { %p2605_p3 = pnand %p2604_p2, %p2598_p13 }
  0xb9   :  { %2608 = shalt.err (!%p2605_p3)
}
  0xba   :  { %133 = dma.hbm_to_vmem [thread:$0]  %s3296_s8, 32, %s128_s20, [#allocation15], %s2701_s1, %s2701_s1, %s2702_s29  }
  0xbb   :  { %s2609_s25 = scalar_lea.hbm %s3298_s10, 32 }
  0xbc   :  { %p2610_p4 = scmp.ne.s32.totalorder %s3298_s10, %s2609_s25  ;;  %p2613_p5 = scmp.lt.u32.totalorder %s2609_s25, %s3298_s10 }
  0xbe   :  { %p2615_p6 = pnand %p2613_p5, %p2610_p4 }
  0xc0   :  { %2618 = shalt.err (!%p2615_p6)
}
  0xc1   :  { %s2619_s4 = scalar_lea.vmem %s2959_s11, 32  ;;  %p2624_p8 = scmp.lt.s32.totalorder %s2959_s11, %s2959_s11 }
  0xc2   :  { %p2620_p7 = scmp.ne.s32.totalorder %s2959_s11, %s2619_s4  ;;  %p2625_p9 = scmp.lt.s32.totalorder %s2619_s4, %s2619_s4 }
  0xc4   :  { %p2626_p10 = por %p2625_p9, %p2624_p8 }
  0xc6   :  { %p2627_p11 = pnand %p2626_p10, %p2620_p7 }
  0xc8   :  { %2630 = shalt.err (!%p2627_p11)
}
  0xc9   :  { %157 = dma.hbm_to_vmem [thread:$0]  %s3298_s10, 32, %s2959_s11, [#allocation18], %s2701_s1, %s2701_s1, %s2702_s29  }
  0xca   :  { %s2709_s3 = smov [#allocation22]   ;;  %s2631_s22 = scalar_lea.hbm %s3300_s12, 32 }
  0xcb   :  { %s175_s20 = sshll.u32 %s2709_s3, 4  ;;  %p2632_p12 = scmp.ne.s32.totalorder %s3300_s12, %s2631_s22  ;;  %s176_s20 = int_to_ptr.vmem [resolvable:$true] %s175_s20 }
  0xcc   :  { %p2635_p13 = scmp.lt.u32.totalorder %s2631_s22, %s3300_s12 }
  0xce   :  { %p2637_p0 = pnand %p2635_p13, %p2632_p12 }
  0xd0   :  { %2640 = shalt.err (!%p2637_p0)
}
  0xd1   :  { %s2641_s15 = scalar_lea.vmem %s176_s20, 32  ;;  %p2646_p2 = scmp.lt.s32.totalorder %s176_s20, %s176_s20 }
  0xd2   :  { %p2642_p1 = scmp.ne.s32.totalorder %s176_s20, %s2641_s15  ;;  %p2647_p3 = scmp.lt.s32.totalorder %s2641_s15, %s2641_s15 }
  0xd4   :  { %p2648_p4 = por %p2647_p3, %p2646_p2 }
  0xd6   :  { %p2649_p5 = pnand %p2648_p4, %p2642_p1 }
  0xd8   :  { %2652 = shalt.err (!%p2649_p5)
}
  0xd9   :  { %181 = dma.hbm_to_vmem [thread:$0]  %s3300_s12, 32, %s176_s20, [#allocation21], %s2701_s1, %s2701_s1, %s2702_s29  }
  0xda   :  { %2675 = dma.done.wait [#allocation3], 256  }
  0xdb   :  { %2676 = vsyncadd [#allocation3], 4294967040 }
  0xdc   :  { %2677 = dma.done.wait [#allocation6], 768  }
  0xdd   :  { %2678 = vsyncadd [#allocation6], 4294966528 }
  0xde   :  { %2679 = dma.done.wait [#allocation9], 544  }
  0xdf   :  { %2680 = vsyncadd [#allocation9], 4294966752 }
  0xe0   :  { %2681 = dma.done.wait [#allocation12], 544  }
  0xe1   :  { %2682 = vsyncadd [#allocation12], 4294966752 }
  0xe2   :  { %2683 = dma.done.wait [#allocation15], 544  }
  0xe3   :  { %2684 = vsyncadd [#allocation15], 4294966752 }
  0xe4   :  { %2685 = dma.done.wait [#allocation18], 64  }
  0xe5   :  { %2686 = vsyncadd [#allocation18], 4294967232 }
  0xe6   :  { %2687 = dma.done.wait [#allocation21], 64  }
  0xe7   :  { %2688 = vsyncadd [#allocation21], 4294967232  ;;  %v2710_v0 = vmov 0   ;;  %v224_v1 = vld [vmem:[#allocation5] sm:$0xff]  ;;  %v225_v2 = vld [vmem:[#allocation5 + $0x8] sm:$0xff]  ;;  %v2711_v3 = vmov 0.0   ;;  %v238_v23 = vlaneseq }
  0xe8   :  { %2302 = vset.pattern.permute.xlu0 %v2710_v0  ;;  %2107 = vmatprep.subr.bf16.mxu0 %v2711_v3  ;;  %v2303_v4 = vld [vmem:[#allocation7] sm:$0xff]   ;;  %v2304_v5 = vld [vmem:[#allocation7 + $0x8] sm:$0xff]   ;;  %vm2712_vm0 = vmmov 0   ;;  %vm260_vm1 = vcmask 261120   ;;  %s2713_s12 = smov 96   ;;  %vm314_vm2 = vcmask 130048  }
  0xe9   :  { %228 = vperm.xlu0 %2302, %v224_v1   ;;  %2115 = vmatprep.subr.bf16.mxu1 %v2711_v3  ;;  %v222_v7 = vld [vmem:[#allocation2] sm:$0xff]  ;;  %v223_v8 = vld [vmem:[#allocation2 + $0x8] sm:$0xff]  ;;  %v239_v24 = vshrl.u32 %v238_v23, 7  ;;  %v241_v25 = vand.u32 127, %v238_v23  ;;  %vm414_vm4 = vcmask 64512   ;;  %s2714_s1 = smov 80  }
  0xea   :  { %2108 = vmatpush3.bf16.msra.mxu0 %v2303_v4  ;;  %2111 = vmatprep.mubr.msk.bf16.mxu0 %vm2712_vm0, %v2711_v3  ;;  %s2715_s29 = smov 112   ;;  %vm444_vm5 = vcmask 1043456   ;;  %s2716_s6 = smov 48   ;;  %vm1967_vm6 = vcmask 257024  }
  0xeb   :  { %2109 = vmatprep.subr.bf16.mxu0 %v2711_v3  ;;  %2117 = vmatprep.mubr.msk.bf16.mxu1 %vm2712_vm0, %v2711_v3  ;;  %vm3054_vm3 = vcmp.le.s32.totalorder %v241_v25, %v239_v24  ;;  %s2717_s16 = smov [#allocation23]  }
  0xec   :  { %s1975_s27 = sshll.u32 %s2717_s16, 4  ;;  %s1976_s27 = int_to_ptr.vmem [resolvable:$true] %s1975_s27 }
  0xed   :  { %233 = vperm.xlu0 %2302, %v225_v2   ;;  %s2653_s7 = scalar_lea.vmem %s1976_s27, 128  ;;  %p2658_p7 = scmp.lt.s32.totalorder %s1976_s27, %s1976_s27 }
  0xee   :  { %2110 = vmatpush3.bf16.msra.mxu0 %v2304_v5  ;;  %p2654_p6 = scmp.ne.s32.totalorder %s1976_s27, %s2653_s7  ;;  %p2659_p8 = scmp.lt.s32.totalorder %s2653_s7, %s2653_s7 }
  0xef   :  { %2121 = vmatprep.subr.bf16.mxu0 %v2711_v3 }
  0xf0   :  { %p2660_p9 = por %p2659_p8, %p2658_p7 }
  0xf2   :  { %p2661_p10 = pnand %p2660_p9, %p2654_p6 }
 0x168   :  { %v3019_v6 = vpop.permute.xlu0 %228 }
 0x169   :  { %v3024_v10 = vmul.f32 %v3019_v6, %v222_v7 }
 0x16c   :  { %v3021_v9 = vpop.permute.xlu0 %233 }
 0x16d   :  { %v3027_v11 = vmul.f32 %v3021_v9, %v223_v8 }
 0x16f   :  { %v247_v12 = vpack.c.bf16 %v3027_v11, %v3024_v10 }
 0x171   :  { %2112 = vmatmul.mubr.msk.bf16.vlgmr.msra.gmra.mrb[0].mxu0 %vm260_vm1, %v247_v12 }
 0x172   :  { %2123 = vmatprep.mubr.msk.bf16.mxu0 %vm2712_vm0, %v2711_v3 }
 0x244   :  { %v298_v13 = vpop.f32.mrb[0].mxu0 }
 0x245   :  { %v3034_v14 = vpack.c.bf16 %v298_v13, %v298_v13  ;;  %v2113_v15 = vpop.f32.mrb[1].mxu0 }
 0x246   :  { %v301_v16 = vpop.f32.mrb[2].mxu0 }
 0x247   :  { %312 = vrot.lane.b32.xlu1 %v3034_v14, %s2713_s12  ;;  %v2114_v17 = vpop.f32.mrb[3].mxu0  ;;  %v3038_v18 = vpack.c.bf16 %v301_v16, %v301_v16 }
 0x24b   :  { %362 = vrot.lane.b32.xlu1 %v3038_v18, %s2713_s12 }
 0x2b9   :  { %v313_v19 = vpop.permute.xlu1 %312 }
 0x2ba   :  { %v319_v20 = vsel %vm314_vm2, %v313_v19, 0 }
 0x2bb   :  { %2116 = vmatpush3.bf16.xpose.msra.mxu1 %v319_v20 }
 0x2bc   :  { %2127 = vmatprep.subr.bf16.mxu1 %v2711_v3 }
 0x2bd   :  { %v363_v21 = vpop.permute.xlu1 %362 }
 0x2be   :  { %v368_v22 = vsel %vm314_vm2, %v363_v21, 0 }
 0x2bf   :  { %2122 = vmatpush3.bf16.xpose.msra.mxu0 %v368_v22 }
 0x2c0   :  { %2133 = vmatprep.subr.bf16.mxu0 %v2711_v3 }
 0x2c2   :  { %2118 = vmatmul.mubr.msk.bf16.vlgmr.msra.gmra.mrb[0].mxu1 %vm314_vm2, %v3034_v14 }
 0x2c3   :  { %2129 = vmatprep.mubr.msk.bf16.mxu1 %vm2712_vm0, %v2711_v3 }
 0x2c6   :  { %2124 = vmatmul.mubr.msk.bf16.vlgmr.msra.gmra.mrb[4].mxu0 %vm314_vm2, %v3038_v18 }
 0x2c7   :  { %2135 = vmatprep.mubr.msk.bf16.mxu0 %vm2712_vm0, %v2711_v3 }
 0x395   :  { %v355_v27 = vpop.f32.mrb[0].mxu1 }
 0x396   :  { %v412_v28 = vsel %vm3054_vm3, %v355_v27, -1e+09  ;;  %v2119_v29 = vpop.f32.mrb[1].mxu1 }
 0x397   :  { %v358_v30 = vpop.f32.mrb[2].mxu1  ;;  %v415_v31 = vsel %vm414_vm4, %v412_v28, -inf }
 0x398   :  { %416 = vmax.xlane.f32.xlu0 %v415_v31  ;;  %v2120_v32 = vpop.f32.mrb[3].mxu1 }
 0x399   :  { %v404_v33 = vpop.f32.mrb[4].mxu0 }
 0x39a   :  { %v413_v34 = vsel %vm3054_vm3, %v404_v33, -1e+09  ;;  %v2125_v35 = vpop.f32.mrb[5].mxu0 }
 0x39b   :  { %v407_v36 = vpop.f32.mrb[6].mxu0  ;;  %v418_v37 = vsel %vm414_vm4, %v413_v34, -inf }
 0x39c   :  { %419 = vmax.xlane.f32.xlu1 %v418_v37  ;;  %v2126_v38 = vpop.f32.mrb[7].mxu0 }
 0x3ad   :  { %439 = vrot.lane.b32.xlu1 %v3034_v14, %s2696_s26 }
 0x3b1   :  { %539 = vrot.lane.b32.xlu1 %v3034_v14, %s2714_s1 }
 0x3b5   :  { %589 = vrot.lane.b32.xlu1 %v3038_v18, %s2714_s1 }
 0x3b9   :  { %587 = vrot.lane.b32.xlu1 %v3038_v18, %s2715_s29 }
 0x425   :  { %v417_v39 = vpop.xlane.xlu0 %416 }
 0x426   :  { %v421_v40 = vsub.f32 %v412_v28, %v417_v39 }
 0x428   :  { %v423_v41 = vmul.f32 1.442695, %v421_v40 }
 0x429   :  { %v420_v42 = vpop.xlane.xlu1 %419 }
 0x42a   :  { %2319 = vpow2.f32 %v423_v41  ;;  %v422_v43 = vsub.f32 %v413_v34, %v420_v42 }
 0x42c   :  { %v425_v44 = vmul.f32 1.442695, %v422_v43 }
 0x42d   :  { %v440_v45 = vpop.permute.xlu1 %439 }
 0x42e   :  { %2321 = vpow2.f32 %v425_v44  ;;  %v446_v46 = vsel %vm444_vm5, %v440_v45, 0 }
 0x42f   :  { %2128 = vmatpush3.bf16.msra.mxu1 %v446_v46 }
 0x430   :  { %2139 = vmatprep.subr.bf16.mxu1 %v2711_v3 }
 0x431   :  { %v540_v56 = vpop.permute.xlu1 %539 }
 0x432   :  { %v545_v60 = vsel %vm314_vm2, %v540_v56, 0 }
 0x434   :  { %v2320_v47 = vpop.eup %2319 }
 0x435   :  { %v427_v48 = vsel %vm414_vm4, %v2320_v47, 0.0  ;;  %v590_v62 = vpop.permute.xlu1 %589 }
 0x436   :  { %428 = vadd.xlane.f32.xlu0 %v427_v48  ;;  %v595_v0 = vsel %vm314_vm2, %v590_v62, 0 }
 0x438   :  { %v2322_v49 = vpop.eup %2321 }
 0x439   :  { %v430_v50 = vsel %vm414_vm4, %v2322_v49, 0.0  ;;  %v588_v2 = vpop.permute.xlu1 %587 }
 0x43a   :  { %431 = vadd.xlane.f32.xlu0 %v430_v50 }
 0x450   :  { %488 = vrot.lane.b32.xlu0 %v3038_v18, %s2696_s26 }
 0x454   :  { %537 = vrot.lane.b32.xlu0 %v3034_v14, %s2715_s29 }
 0x4c3   :  { %v429_v51 = vpop.xlane.xlu0 %428 }
 0x4c4   :  { %2323 = vrcp.f32 %v429_v51 }
 0x4c7   :  { %v432_v52 = vpop.xlane.xlu0 %431 }
 0x4c8   :  { %2325 = vrcp.f32 %v432_v52  ;;  %v2305_v52 = vld [vmem:[#allocation8] sm:$0xff]  }
 0x4cb   :  { %v489_v53 = vpop.permute.xlu0 %488 }
 0x4cc   :  { %v494_v54 = vsel %vm444_vm5, %v489_v53, 0  ;;  %v2306_v53 = vld [vmem:[#allocation8 + $0x8] sm:$0xff]  }
 0x4cd   :  { %2134 = vmatpush3.bf16.msra.mxu0 %v494_v54 }
 0x4ce   :  { %v2324_v55 = vpop.eup %2323  ;;  %2145 = vmatprep.subr.bf16.mxu0 %v2711_v3 }
 0x4cf   :  { %v435_v57 = vmul.f32 %v2324_v55, %v2320_v47  ;;  %v538_v1 = vpop.permute.xlu0 %537 }
 0x4d1   :  { %v437_v58 = vpack.c.bf16 %v435_v57, %v435_v57 }
 0x4d2   :  { %v2326_v59 = vpop.eup %2325 }
 0x4d3   :  { %v436_v61 = vmul.f32 %v2326_v59, %v2322_v49  ;;  %2130 = vmatmul.mubr.msk.bf16.vlgmr.msra.gmra.mrb[4].mxu1 %vm414_vm4, %v437_v58 }
 0x4d4   :  { %2140 = vmatpush3.bf16.xpose.msra.mxu1 %v545_v60  ;;  %2141 = vmatprep.mubr.msk.bf16.mxu1 %vm2712_vm0, %v2711_v3 }
 0x4d5   :  { %v438_v63 = vpack.c.bf16 %v436_v61, %v436_v61  ;;  %2151 = vmatprep.subr.bf16.mxu1 %v2711_v3 }
 0x4d7   :  { %2136 = vmatmul.mubr.msk.bf16.vlgmr.msra.gmra.mrb[8].mxu0 %vm414_vm4, %v438_v63 }
 0x4d8   :  { %2146 = vmatpush3.bf16.xpose.msra.mxu0 %v595_v0  ;;  %2147 = vmatprep.mubr.msk.bf16.mxu0 %vm2712_vm0, %v2711_v3 }
 0x4d9   :  { %2157 = vmatprep.subr.bf16.mxu0 %v2711_v3 }
 0x4db   :  { %2142 = vmatmul.mubr.msk.bf16.vlgmr.msra.gmra.mrb[8].mxu1 %vm314_vm2, %v538_v1 }
 0x4dc   :  { %2153 = vmatprep.mubr.msk.bf16.mxu1 %vm2712_vm0, %v2711_v3 }
 0x4df   :  { %2148 = vmatmul.mubr.msk.bf16.vlgmr.msra.gmra.mrb[12].mxu0 %vm314_vm2, %v588_v2 }
 0x4e0   :  { %2159 = vmatprep.mubr.msk.bf16.mxu0 %vm2712_vm0, %v2711_v3 }
 0x5a6   :  { %v3098_v4 = vpop.f32.mrb[4].mxu1 }
 0x5a7   :  { %v2131_v5 = vpop.f32.mrb[5].mxu1 }
 0x5a8   :  { %v485_v7 = vpop.f32.mrb[6].mxu1  ;;  %v2008_v5 = vld [vmem:[#allocation10] ss:$0 sm:$0xff] }
 0x5a9   :  { %v2132_v8 = vpop.f32.mrb[7].mxu1 }
 0x5aa   :  { %v530_v12 = vpop.f32.mrb[8].mxu0 }
 0x5ab   :  { %v536_v13 = vpack.c.bf16 %v530_v12, %v3098_v4  ;;  %v2137_v15 = vpop.f32.mrb[9].mxu0 }
 0x5ac   :  { %v533_v16 = vpop.f32.mrb[10].mxu0 }
 0x5ad   :  { %v2138_v17 = vpop.f32.mrb[11].mxu0 }
 0x5ae   :  { %v581_v19 = vpop.f32.mrb[8].mxu1 }
 0x5af   :  { %v637_v20 = vsel %vm3054_vm3, %v581_v19, -1e+09  ;;  %v2143_v21 = vpop.f32.mrb[9].mxu1 }
 0x5b0   :  { %v584_v22 = vpop.f32.mrb[10].mxu1  ;;  %v639_v23 = vsel %vm414_vm4, %v637_v20, -inf }
 0x5b1   :  { %640 = vmax.xlane.f32.xlu0 %v639_v23  ;;  %v2144_v24 = vpop.f32.mrb[11].mxu1 }
 0x5b2   :  { %v631_v25 = vpop.f32.mrb[12].mxu0 }
 0x5b3   :  { %v638_v27 = vsel %vm3054_vm3, %v631_v25, -1e+09  ;;  %v2149_v28 = vpop.f32.mrb[13].mxu0 }
 0x5b4   :  { %v634_v29 = vpop.f32.mrb[14].mxu0  ;;  %v642_v30 = vsel %vm414_vm4, %v638_v27, -inf }
 0x5b5   :  { %643 = vmax.xlane.f32.xlu1 %v642_v30  ;;  %v2150_v31 = vpop.f32.mrb[15].mxu0 }
 0x5c6   :  { %663 = vrot.lane.b32.xlu1 %v3034_v14, %s2716_s6 }
 0x63e   :  { %v641_v32 = vpop.xlane.xlu0 %640 }
 0x63f   :  { %v645_v33 = vsub.f32 %v637_v20, %v641_v32 }
 0x641   :  { %v647_v34 = vmul.f32 1.442695, %v645_v33  ;;  %v2307_v33 = vld [vmem:[#allocation11] sm:$0xff]  }
 0x642   :  { %v644_v35 = vpop.xlane.xlu1 %643 }
 0x643   :  { %2327 = vpow2.f32 %v647_v34  ;;  %v646_v36 = vsub.f32 %v638_v27, %v644_v35 }
 0x645   :  { %v649_v37 = vmul.f32 1.442695, %v646_v36 }
 0x646   :  { %v664_v38 = vpop.permute.xlu1 %663 }
 0x647   :  { %2329 = vpow2.f32 %v649_v37  ;;  %v669_v39 = vsel %vm444_vm5, %v664_v38, 0 }
 0x648   :  { %2152 = vmatpush3.bf16.msra.mxu1 %v669_v39 }
 0x649   :  { %2163 = vmatprep.subr.bf16.mxu1 %v2711_v3 }
 0x64d   :  { %v2328_v40 = vpop.eup %2327 }
 0x64e   :  { %v651_v41 = vsel %vm414_vm4, %v2328_v40, 0.0 }
 0x64f   :  { %652 = vadd.xlane.f32.xlu0 %v651_v41  ;;  %v2009_v41 = vld [vmem:[#allocation17] ss:$0 sm:$0xff] }
 0x651   :  { %v2330_v42 = vpop.eup %2329 }
 0x652   :  { %v654_v14 = vsel %vm414_vm4, %v2330_v42, 0.0 }
 0x653   :  { %655 = vadd.xlane.f32.xlu0 %v654_v14 }
 0x669   :  { %711 = vrot.lane.b32.xlu0 %v3038_v18, %s2716_s6 }
 0x6dc   :  { %v653_v43 = vpop.xlane.xlu0 %652 }
 0x6dd   :  { %2331 = vrcp.f32 %v653_v43 }
 0x6e0   :  { %v656_v44 = vpop.xlane.xlu0 %655 }
 0x6e1   :  { %2333 = vrcp.f32 %v656_v44 }
 0x6e4   :  { %v712_v45 = vpop.permute.xlu0 %711 }
 0x6e5   :  { %v717_v46 = vsel %vm444_vm5, %v712_v45, 0  ;;  %v2010_v45 = vld [vmem:[#allocation19] ss:$0 sm:$0xff] }
 0x6e6   :  { %2158 = vmatpush3.bf16.msra.mxu0 %v717_v46 }
 0x6e7   :  { %v2332_v47 = vpop.eup %2331  ;;  %2169 = vmatprep.subr.bf16.mxu0 %v2711_v3 }
 0x6e8   :  { %v659_v48 = vmul.f32 %v2332_v47, %v2328_v40 }
 0x6ea   :  { %v661_v49 = vpack.c.bf16 %v659_v48, %v659_v48 }
 0x6eb   :  { %v2334_v50 = vpop.eup %2333 }
 0x6ec   :  { %v660_v51 = vmul.f32 %v2334_v50, %v2330_v42  ;;  %2154 = vmatmul.mubr.msk.bf16.vlgmr.msra.gmra.mrb[12].mxu1 %vm414_vm4, %v661_v49  ;;  %v2309_v50 = vld [vmem:[#allocation14] sm:$0xff]  }
 0x6ed   :  { %2165 = vmatprep.mubr.msk.bf16.mxu1 %vm2712_vm0, %v2711_v3  ;;  %2164 = vmatpush3.bf16.msra.mxu1 %v2306_v53 }
 0x6ee   :  { %v662_v18 = vpack.c.bf16 %v660_v51, %v660_v51  ;;  %2175 = vmatprep.subr.bf16.mxu1 %v2711_v3  ;;  %v2310_v51 = vld [vmem:[#allocation14 + $0x8] sm:$0xff]  }
 0x6f0   :  { %2160 = vmatmul.mubr.msk.bf16.vlgmr.msra.gmra.mrb[16].mxu0 %vm414_vm4, %v662_v18 }
 0x6f1   :  { %2170 = vmatpush3.bf16.msra.mxu0 %v2305_v52  ;;  %2171 = vmatprep.mubr.msk.bf16.mxu0 %vm2712_vm0, %v2711_v3  ;;  %v2011_v52 = vld [vmem:[#allocation13] ss:$0 sm:$0xff] }
 0x6f2   :  { %2183 = vmatprep.subr.bf16.mxu0 %v2711_v3 }
 0x6f8   :  { %2172 = vmatmul.mubr.msk.bf16.vlgmr.msra.gmra.mrb[20].mxu0 %vm314_vm2, %v536_v13 }
 0x6f9   :  { %2187 = vmatprep.mubr.msk.bf16.mxu0 %vm2712_vm0, %v2711_v3  ;;  %2184 = vmatpush3.bf16.msra.mxu0 %v2309_v50 }
 0x6fa   :  { %2185 = vmatprep.subr.bf16.mxu0 %v2711_v3 }
 0x6fd   :  { %2186 = vmatpush3.bf16.msra.mxu0 %v2310_v51 }
 0x6fe   :  { %2199 = vmatprep.subr.bf16.mxu0 %v2711_v3 }
 0x7bf   :  { %v705_v54 = vpop.f32.mrb[12].mxu1 }
 0x7c0   :  { %v2155_v55 = vpop.f32.mrb[13].mxu1 }
 0x7c1   :  { %v708_v56 = vpop.f32.mrb[14].mxu1 }
 0x7c2   :  { %v2156_v57 = vpop.f32.mrb[15].mxu1 }
 0x7c3   :  { %v753_v58 = vpop.f32.mrb[16].mxu0 }
 0x7c4   :  { %v759_v59 = vpack.c.bf16 %v753_v58, %v705_v54  ;;  %v2161_v60 = vpop.f32.mrb[17].mxu0 }
 0x7c5   :  { %v756_v61 = vpop.f32.mrb[18].mxu0 }
 0x7c6   :  { %v2162_v62 = vpop.f32.mrb[19].mxu0  ;;  %2166 = vmatmul.mubr.msk.bf16.vlgmr.msra.gmra.mrb[16].mxu1 %vm314_vm2, %v759_v59  ;;  %v2015_v61 = vld [vmem:[#allocation16] ss:$0 sm:$0xff] }
 0x7c7   :  { %2179 = vmatprep.mubr.msk.bf16.mxu1 %vm2712_vm0, %v2711_v3  ;;  %2176 = vmatpush3.bf16.msra.mxu1 %v2307_v33 }
 0x7c8   :  { %2177 = vmatprep.subr.bf16.mxu1 %v2711_v3 }
 0x7cb   :  { %v853_v63 = vpop.f32.mrb[20].mxu0 }
 0x7cc   :  { %v2173_v0 = vpop.f32.mrb[21].mxu0 }
 0x7cd   :  { %v856_v1 = vpop.f32.mrb[22].mxu0 }
 0x7ce   :  { %v2174_v2 = vpop.f32.mrb[23].mxu0 }
 0x899   :  { %v803_v4 = vpop.f32.mrb[16].mxu1 }
 0x89a   :  { %v854_v7 = vadd.f32 %v853_v63, %v803_v4  ;;  %v2167_v8 = vpop.f32.mrb[17].mxu1 }
 0x89b   :  { %v806_v12 = vpop.f32.mrb[18].mxu1 }
 0x89c   :  { %v867_v13 = vadd.f32 %v2008_v5, %v854_v7  ;;  %v857_v15 = vadd.f32 %v856_v1, %v806_v12  ;;  %v2168_v16 = vpop.f32.mrb[19].mxu1 }
 0x89e   :  { %v868_v17 = vadd.f32 %v2008_v5, %v857_v15  ;;  %v869_v19 = vadd.f32 %v867_v13, %v3024_v10 }
 0x8a0   :  { %v873_v20 = vsel %vm260_vm1, %v869_v19, 0.0  ;;  %v870_v21 = vadd.f32 %v868_v17, %v3027_v11  ;;  %v2308_v11 = vld [vmem:[#allocation11 + $0x8] sm:$0xff]  }
 0x8a1   :  { %874 = vadd.xlane.f32.xlu1 %v873_v20  ;;  %2178 = vmatpush3.bf16.msra.mxu1 %v2308_v11  ;;  %v2019_v11 = vld [vmem:[#allocation20] ss:$0 sm:$0xff] }
 0x8a2   :  { %v876_v22 = vsel %vm260_vm1, %v870_v21, 0.0  ;;  %2191 = vmatprep.subr.bf16.mxu1 %v2711_v3 }
 0x8a3   :  { %877 = vadd.xlane.f32.xlu0 %v876_v22 }
 0x92e   :  { %v875_v23 = vpop.xlane.xlu1 %874 }
 0x92f   :  { %v880_v24 = vmul.f32 0.03125, %v875_v23 }
 0x930   :  { %v878_v25 = vpop.xlane.xlu0 %877 }
 0x931   :  { %v882_v27 = vsub.f32 %v869_v19, %v880_v24  ;;  %v881_v28 = vmul.f32 0.03125, %v878_v25  ;;  %v2311_v25 = vld [vmem:[#allocation7 + $0x10] sm:$0xff]  }
 0x933   :  { %v883_v29 = vsub.f32 %v870_v21, %v881_v28  ;;  %v884_v30 = vmul.f32 %v882_v27, %v882_v27 }
 0x935   :  { %v886_v31 = vsel %vm260_vm1, %v884_v30, 0.0  ;;  %v885_v32 = vmul.f32 %v883_v29, %v883_v29 }
 0x936   :  { %887 = vadd.xlane.f32.xlu1 %v886_v31 }
 0x937   :  { %v889_v10 = vsel %vm260_vm1, %v885_v32, 0.0 }
 0x938   :  { %890 = vadd.xlane.f32.xlu0 %v889_v10 }
 0x9c3   :  { %v888_v34 = vpop.xlane.xlu1 %887 }
 0x9c4   :  { %v892_v35 = vmul.f32 0.03125, %v888_v34 }
 0x9c5   :  { %v891_v36 = vpop.xlane.xlu0 %890 }
 0x9c6   :  { %v894_v37 = vadd.f32 1e-05, %v892_v35  ;;  %v893_v38 = vmul.f32 0.03125, %v891_v36  ;;  %v2020_v36 = vld [vmem:[#allocation22] ss:$0 sm:$0xff] }
 0x9c8   :  { %2335 = vrsqrt.f32 %v894_v37  ;;  %v895_v39 = vadd.f32 1e-05, %v893_v38 }
 0x9ca   :  { %2337 = vrsqrt.f32 %v895_v39 }
 0x9d2   :  { %v2336_v40 = vpop.eup %2335 }
 0x9d3   :  { %v898_v42 = vmul.f32 %v2336_v40, %v882_v27  ;;  %v2312_v27 = vld [vmem:[#allocation7 + $0x18] sm:$0xff]  }
 0x9d4   :  { %v2338_v14 = vpop.eup %2337 }
 0x9d5   :  { %v906_v43 = vmul.f32 %v2009_v41, %v898_v42  ;;  %v899_v44 = vmul.f32 %v2338_v14, %v883_v29 }
 0x9d7   :  { %v907_v46 = vmul.f32 %v2009_v41, %v899_v44  ;;  %v914_v47 = vadd.f32 %v2010_v45, %v906_v43 }
 0x9d9   :  { %v915_v48 = vadd.f32 %v2010_v45, %v907_v46 }
 0x9db   :  { %v920_v49 = vpack.c.bf16 %v915_v48, %v914_v47 }
 0x9dd   :  { %2180 = vmatmul.mubr.msk.bf16.vlgmr.msra.gmra.mrb[20].mxu1 %vm260_vm1, %v920_v49 }
 0x9de   :  { %2195 = vmatprep.mubr.msk.bf16.mxu1 %vm2712_vm0, %v2711_v3  ;;  %2192 = vmatpush3.bf16.msra.mxu1 %v2311_v25 }
 0x9df   :  { %2193 = vmatprep.subr.bf16.mxu1 %v2711_v3 }
 0x9e2   :  { %2194 = vmatpush3.bf16.msra.mxu1 %v2312_v27 }
 0x9e3   :  { %2205 = vmatprep.subr.bf16.mxu1 %v2711_v3 }
 0xab0   :  { %v977_v18 = vpop.f32.mrb[20].mxu1 }
 0xab1   :  { %v978_v53 = vadd.f32 %v2011_v52, %v977_v18  ;;  %v2181_v54 = vpop.f32.mrb[21].mxu1 }
 0xab2   :  { %v980_v55 = vpop.f32.mrb[22].mxu1 }
 0xab3   :  { %v981_v56 = vadd.f32 %v2011_v52, %v980_v55  ;;  %v2182_v57 = vpop.f32.mrb[23].mxu1  ;;  %v984_v58 = vmax.f32 %v978_v53, 0.0 }
 0xab5   :  { %v985_v59 = vmax.f32 %v981_v56, 0.0 }
 0xab7   :  { %v990_v60 = vpack.c.bf16 %v985_v59, %v984_v58 }
 0xab9   :  { %2188 = vmatmul.mubr.msk.bf16.vlgmr.msra.gmra.mrb[24].mxu0 %vm260_vm1, %v990_v60 }
 0xaba   :  { %2201 = vmatprep.mubr.msk.bf16.mxu0 %vm2712_vm0, %v2711_v3 }
 0xb8c   :  { %v1047_v62 = vpop.f32.mrb[24].mxu0 }
 0xb8d   :  { %v1048_v63 = vadd.f32 %v2015_v61, %v1047_v62  ;;  %v2189_v0 = vpop.f32.mrb[25].mxu0 }
 0xb8e   :  { %v1050_v1 = vpop.f32.mrb[26].mxu0 }
 0xb8f   :  { %v1051_v2 = vadd.f32 %v2015_v61, %v1050_v1  ;;  %v2190_v4 = vpop.f32.mrb[27].mxu0  ;;  %v1054_v5 = vadd.f32 %v1048_v63, %v914_v47 }
 0xb91   :  { %v1058_v7 = vsel %vm260_vm1, %v1054_v5, 0.0  ;;  %v1055_v8 = vadd.f32 %v1051_v2, %v915_v48 }
 0xb92   :  { %1059 = vadd.xlane.f32.xlu1 %v1058_v7 }
 0xb93   :  { %v1061_v12 = vsel %vm260_vm1, %v1055_v8, 0.0 }
 0xb94   :  { %1062 = vadd.xlane.f32.xlu0 %v1061_v12 }
 0xc1f   :  { %v1060_v13 = vpop.xlane.xlu1 %1059 }
 0xc20   :  { %v1064_v15 = vmul.f32 0.03125, %v1060_v13 }
 0xc21   :  { %v1063_v16 = vpop.xlane.xlu0 %1062 }
 0xc22   :  { %v1066_v17 = vsub.f32 %v1054_v5, %v1064_v15  ;;  %v1065_v19 = vmul.f32 0.03125, %v1063_v16 }
 0xc24   :  { %v1067_v20 = vsub.f32 %v1055_v8, %v1065_v19  ;;  %v1068_v21 = vmul.f32 %v1066_v17, %v1066_v17 }
 0xc26   :  { %v1070_v22 = vsel %vm260_vm1, %v1068_v21, 0.0  ;;  %v1069_v23 = vmul.f32 %v1067_v20, %v1067_v20 }
 0xc27   :  { %1071 = vadd.xlane.f32.xlu1 %v1070_v22 }
 0xc28   :  { %v1073_v24 = vsel %vm260_vm1, %v1069_v23, 0.0 }
 0xc29   :  { %1074 = vadd.xlane.f32.xlu0 %v1073_v24 }
 0xcb4   :  { %v1072_v28 = vpop.xlane.xlu1 %1071 }
 0xcb5   :  { %v1076_v29 = vmul.f32 0.03125, %v1072_v28 }
 0xcb6   :  { %v1075_v30 = vpop.xlane.xlu0 %1074 }
 0xcb7   :  { %v1078_v31 = vadd.f32 1e-05, %v1076_v29  ;;  %v1077_v32 = vmul.f32 0.03125, %v1075_v30 }
 0xcb9   :  { %2339 = vrsqrt.f32 %v1078_v31  ;;  %v1079_v10 = vadd.f32 1e-05, %v1077_v32 }
 0xcbb   :  { %2341 = vrsqrt.f32 %v1079_v10 }
 0xcc3   :  { %v2340_v33 = vpop.eup %2339 }
 0xcc4   :  { %v1082_v34 = vmul.f32 %v2340_v33, %v1066_v17 }
 0xcc5   :  { %v2342_v35 = vpop.eup %2341 }
 0xcc6   :  { %v1090_v37 = vmul.f32 %v2019_v11, %v1082_v34  ;;  %v1083_v38 = vmul.f32 %v2342_v35, %v1067_v20 }
 0xcc8   :  { %v1091_v39 = vmul.f32 %v2019_v11, %v1083_v38  ;;  %v1098_v40 = vadd.f32 %v2020_v36, %v1090_v37 }
 0xcca   :  { %v1099_v41 = vadd.f32 %v2020_v36, %v1091_v39  ;;  %v3154_v42 = vmul.f32 %v1098_v40, %v3019_v6 }
 0xccc   :  { %v3157_v14 = vmul.f32 %v1099_v41, %v3021_v9 }
 0xcce   :  { %v1107_v43 = vpack.c.bf16 %v3157_v14, %v3154_v42 }
 0xcd0   :  { %2196 = vmatmul.mubr.msk.bf16.vlgmr.msra.gmra.mrb[24].mxu1 %vm260_vm1, %v1107_v43 }
 0xcd1   :  { %2207 = vmatprep.mubr.msk.bf16.mxu1 %vm2712_vm0, %v2711_v3 }
 0xda3   :  { %v1157_v44 = vpop.f32.mrb[24].mxu1 }
 0xda4   :  { %v3164_v45 = vpack.c.bf16 %v1157_v44, %v1157_v44  ;;  %v2197_v46 = vpop.f32.mrb[25].mxu1 }
 0xda5   :  { %v1160_v47 = vpop.f32.mrb[26].mxu1 }
 0xda6   :  { %v3166_v48 = vpack.c.bf16 %v1160_v47, %v1160_v47  ;;  %1172 = vrot.lane.b32.xlu1 %v3164_v45, %s2713_s12  ;;  %v2198_v49 = vpop.f32.mrb[27].mxu1 }
 0xda8   :  { %1221 = vrot.lane.b32.xlu0 %v3166_v48, %s2713_s12 }
 0xe18   :  { %v1173_v50 = vpop.permute.xlu1 %1172 }
 0xe19   :  { %v1178_v51 = vsel %vm314_vm2, %v1173_v50, 0 }
 0xe1a   :  { %2200 = vmatpush3.bf16.xpose.msra.mxu0 %v1178_v51  ;;  %v1222_v52 = vpop.permute.xlu0 %1221 }
 0xe1b   :  { %v1227_v18 = vsel %vm314_vm2, %v1222_v52, 0  ;;  %2211 = vmatprep.subr.bf16.mxu0 %v2711_v3 }
 0xe1c   :  { %2206 = vmatpush3.bf16.xpose.msra.mxu1 %v1227_v18 }
 0xe1d   :  { %2217 = vmatprep.subr.bf16.mxu1 %v2711_v3 }
 0xe21   :  { %2202 = vmatmul.mubr.msk.bf16.vlgmr.msra.gmra.mrb[28].mxu0 %vm314_vm2, %v3164_v45 }
 0xe22   :  { %2213 = vmatprep.mubr.msk.bf16.mxu0 %vm2712_vm0, %v2711_v3 }
 0xe23   :  { %2208 = vmatmul.mubr.msk.bf16.vlgmr.msra.gmra.mrb[28].mxu1 %vm314_vm2, %v3166_v48 }
 0xe24   :  { %2219 = vmatprep.mubr.msk.bf16.mxu1 %vm2712_vm0, %v2711_v3 }
 0xef4   :  { %v1214_v53 = vpop.f32.mrb[28].mxu0 }
 0xef5   :  { %v1269_v54 = vsel %vm3054_vm3, %v1214_v53, -1e+09  ;;  %v2203_v55 = vpop.f32.mrb[29].mxu0 }
 0xef6   :  { %v1217_v56 = vpop.f32.mrb[30].mxu0  ;;  %v1263_v57 = vpop.f32.mrb[28].mxu1  ;;  %v1271_v58 = vsel %vm414_vm4, %v1269_v54, -inf }
 0xef7   :  { %v1270_v59 = vsel %vm3054_vm3, %v1263_v57, -1e+09  ;;  %v2209_v60 = vpop.f32.mrb[29].mxu1  ;;  %1272 = vmax.xlane.f32.xlu1 %v1271_v58  ;;  %v2204_v61 = vpop.f32.mrb[31].mxu0 }
 0xef8   :  { %v1266_v62 = vpop.f32.mrb[30].mxu1  ;;  %v1274_v63 = vsel %vm414_vm4, %v1270_v59, -inf }
 0xef9   :  { %1275 = vmax.xlane.f32.xlu0 %v1274_v63  ;;  %v2210_v0 = vpop.f32.mrb[31].mxu1 }
 0xf08   :  { %1295 = vrot.lane.b32.xlu1 %v3164_v45, %s2696_s26 }
 0xf84   :  { %v1273_v1 = vpop.xlane.xlu1 %1272 }
 0xf85   :  { %v1277_v2 = vsub.f32 %v1269_v54, %v1273_v1 }
 0xf86   :  { %v1276_v4 = vpop.xlane.xlu0 %1275 }
 0xf87   :  { %v1279_v5 = vmul.f32 1.442695, %v1277_v2  ;;  %v1278_v7 = vsub.f32 %v1270_v59, %v1276_v4 }
 0xf88   :  { %v1296_v8 = vpop.permute.xlu1 %1295 }
 0xf89   :  { %2343 = vpow2.f32 %v1279_v5  ;;  %v1281_v12 = vmul.f32 1.442695, %v1278_v7  ;;  %v1301_v13 = vsel %vm444_vm5, %v1296_v8, 0 }
 0xf8a   :  { %2212 = vmatpush3.bf16.msra.mxu0 %v1301_v13 }
 0xf8b   :  { %2345 = vpow2.f32 %v1281_v12  ;;  %2223 = vmatprep.subr.bf16.mxu0 %v2711_v3 }
 0xf93   :  { %v2344_v15 = vpop.eup %2343 }
 0xf94   :  { %v1283_v16 = vsel %vm414_vm4, %v2344_v15, 0.0 }
 0xf95   :  { %v2346_v17 = vpop.eup %2345  ;;  %1284 = vadd.xlane.f32.xlu1 %v1283_v16 }
 0xf96   :  { %v1286_v19 = vsel %vm414_vm4, %v2346_v17, 0.0 }
 0xf97   :  { %1287 = vadd.xlane.f32.xlu0 %v1286_v19 }
 0xfa6   :  { %1394 = vrot.lane.b32.xlu1 %v3164_v45, %s2714_s1 }
 0xfaa   :  { %1444 = vrot.lane.b32.xlu1 %v3166_v48, %s2714_s1 }
 0xfad   :  { %1343 = vrot.lane.b32.xlu0 %v3166_v48, %s2696_s26 }
 0xfae   :  { %1442 = vrot.lane.b32.xlu1 %v3166_v48, %s2715_s29 }
 0xfb1   :  { %1392 = vrot.lane.b32.xlu0 %v3164_v45, %s2715_s29 }
0x1022   :  { %v1285_v20 = vpop.xlane.xlu1 %1284 }
0x1023   :  { %2347 = vrcp.f32 %v1285_v20  ;;  %v2313_v20 = vld [vmem:[#allocation8 + $0x10] sm:$0xff]  }
0x1024   :  { %v1288_v21 = vpop.xlane.xlu0 %1287 }
0x1025   :  { %2349 = vrcp.f32 %v1288_v21  ;;  %v2314_v21 = vld [vmem:[#allocation8 + $0x18] sm:$0xff]  }
0x1026   :  { %v1395_v24 = vpop.permute.xlu1 %1394 }
0x1027   :  { %v1400_v32 = vsel %vm314_vm2, %v1395_v24, 0 }
0x1028   :  { %v1344_v22 = vpop.permute.xlu0 %1343 }
0x1029   :  { %v1349_v23 = vsel %vm444_vm5, %v1344_v22, 0 }
0x102a   :  { %2218 = vmatpush3.bf16.msra.mxu1 %v1349_v23  ;;  %v1445_v31 = vpop.permute.xlu1 %1444 }
0x102b   :  { %2229 = vmatprep.subr.bf16.mxu1 %v2711_v3  ;;  %v1450_v33 = vsel %vm314_vm2, %v1445_v31, 0 }
0x102c   :  { %v1393_v11 = vpop.permute.xlu0 %1392 }
0x102d   :  { %v2348_v25 = vpop.eup %2347 }
0x102e   :  { %v1291_v27 = vmul.f32 %v2348_v25, %v2344_v15  ;;  %v1443_v34 = vpop.permute.xlu1 %1442 }
0x102f   :  { %v2350_v28 = vpop.eup %2349 }
0x1030   :  { %v1292_v29 = vmul.f32 %v2350_v28, %v2346_v17  ;;  %v1293_v30 = vpack.c.bf16 %v1291_v27, %v1291_v27 }
0x1032   :  { %2214 = vmatmul.mubr.msk.bf16.vlgmr.msra.gmra.mrb[32].mxu0 %vm414_vm4, %v1293_v30  ;;  %v1294_v10 = vpack.c.bf16 %v1292_v29, %v1292_v29 }
0x1033   :  { %2224 = vmatpush3.bf16.xpose.msra.mxu0 %v1400_v32  ;;  %2225 = vmatprep.mubr.msk.bf16.mxu0 %vm2712_vm0, %v2711_v3 }
0x1034   :  { %2220 = vmatmul.mubr.msk.bf16.vlgmr.msra.gmra.mrb[32].mxu1 %vm414_vm4, %v1294_v10  ;;  %2235 = vmatprep.subr.bf16.mxu0 %v2711_v3 }
0x1035   :  { %2230 = vmatpush3.bf16.xpose.msra.mxu1 %v1450_v33  ;;  %2231 = vmatprep.mubr.msk.bf16.mxu1 %vm2712_vm0, %v2711_v3 }
0x1036   :  { %2241 = vmatprep.subr.bf16.mxu1 %v2711_v3 }
0x103a   :  { %2226 = vmatmul.mubr.msk.bf16.vlgmr.msra.gmra.mrb[36].mxu0 %vm314_vm2, %v1393_v11 }
0x103b   :  { %2237 = vmatprep.mubr.msk.bf16.mxu0 %vm2712_vm0, %v2711_v3 }
0x103c   :  { %2232 = vmatmul.mubr.msk.bf16.vlgmr.msra.gmra.mrb[36].mxu1 %vm314_vm2, %v1443_v34 }
0x103d   :  { %2243 = vmatprep.mubr.msk.bf16.mxu1 %vm2712_vm0, %v2711_v3 }
0x1105   :  { %v3224_v35 = vpop.f32.mrb[32].mxu0 }
0x1106   :  { %v2215_v36 = vpop.f32.mrb[33].mxu0 }
0x1107   :  { %v1340_v37 = vpop.f32.mrb[34].mxu0  ;;  %v1385_v38 = vpop.f32.mrb[32].mxu1 }
0x1108   :  { %v1391_v39 = vpack.c.bf16 %v1385_v38, %v3224_v35  ;;  %v2216_v40 = vpop.f32.mrb[35].mxu0  ;;  %v2221_v41 = vpop.f32.mrb[33].mxu1  ;;  %v2036_v35 = vld [vmem:[#allocation10 + $0x1] ss:$0 sm:$0xff] }
0x1109   :  { %v1388_v43 = vpop.f32.mrb[34].mxu1 }
0x110a   :  { %v2222_v44 = vpop.f32.mrb[35].mxu1 }
0x110d   :  { %v1436_v46 = vpop.f32.mrb[36].mxu0 }
0x110e   :  { %v1492_v47 = vsel %vm3054_vm3, %v1436_v46, -1e+09  ;;  %v2227_v49 = vpop.f32.mrb[37].mxu0 }
0x110f   :  { %v1439_v50 = vpop.f32.mrb[38].mxu0  ;;  %v1486_v51 = vpop.f32.mrb[36].mxu1  ;;  %v1494_v52 = vsel %vm414_vm4, %v1492_v47, -inf }
0x1110   :  { %v1493_v18 = vsel %vm3054_vm3, %v1486_v51, -1e+09  ;;  %v2233_v53 = vpop.f32.mrb[37].mxu1  ;;  %1495 = vmax.xlane.f32.xlu0 %v1494_v52  ;;  %v2228_v54 = vpop.f32.mrb[39].mxu0 }
0x1111   :  { %v1489_v55 = vpop.f32.mrb[38].mxu1  ;;  %v1497_v56 = vsel %vm414_vm4, %v1493_v18, -inf }
0x1112   :  { %1498 = vmax.xlane.f32.xlu1 %v1497_v56  ;;  %v2234_v57 = vpop.f32.mrb[39].mxu1 }
0x1123   :  { %1518 = vrot.lane.b32.xlu1 %v3164_v45, %s2716_s6 }
0x119d   :  { %v1496_v58 = vpop.xlane.xlu0 %1495 }
0x119e   :  { %v1500_v59 = vsub.f32 %v1492_v47, %v1496_v58  ;;  %v2315_v58 = vld [vmem:[#allocation11 + $0x10] sm:$0xff]  }
0x119f   :  { %v1499_v60 = vpop.xlane.xlu1 %1498 }
0x11a0   :  { %v1502_v61 = vmul.f32 1.442695, %v1500_v59  ;;  %v1501_v62 = vsub.f32 %v1493_v18, %v1499_v60 }
0x11a2   :  { %2351 = vpow2.f32 %v1502_v61  ;;  %v1504_v63 = vmul.f32 1.442695, %v1501_v62 }
0x11a3   :  { %v1519_v26 = vpop.permute.xlu1 %1518 }
0x11a4   :  { %2353 = vpow2.f32 %v1504_v63  ;;  %v1524_v0 = vsel %vm444_vm5, %v1519_v26, 0 }
0x11a5   :  { %2236 = vmatpush3.bf16.msra.mxu0 %v1524_v0 }
0x11a6   :  { %2247 = vmatprep.subr.bf16.mxu0 %v2711_v3 }
0x11ac   :  { %v2352_v1 = vpop.eup %2351 }
0x11ad   :  { %v1506_v2 = vsel %vm414_vm4, %v2352_v1, 0.0 }
0x11ae   :  { %v2354_v4 = vpop.eup %2353  ;;  %1507 = vadd.xlane.f32.xlu0 %v1506_v2 }
0x11af   :  { %v1509_v45 = vsel %vm414_vm4, %v2354_v4, 0.0 }
0x11b2   :  { %1510 = vadd.xlane.f32.xlu0 %v1509_v45 }
0x11c8   :  { %1566 = vrot.lane.b32.xlu0 %v3166_v48, %s2716_s6 }
0x123b   :  { %v1508_v5 = vpop.xlane.xlu0 %1507 }
0x123c   :  { %2355 = vrcp.f32 %v1508_v5 }
0x123f   :  { %v1511_v7 = vpop.xlane.xlu0 %1510 }
0x1240   :  { %2357 = vrcp.f32 %v1511_v7  ;;  %v2038_v7 = vld [vmem:[#allocation19 + $0x1] ss:$0 sm:$0xff] }
0x1243   :  { %v1567_v8 = vpop.permute.xlu0 %1566 }
0x1244   :  { %v1572_v12 = vsel %vm444_vm5, %v1567_v8, 0 }
0x1245   :  { %2242 = vmatpush3.bf16.msra.mxu1 %v1572_v12 }
0x1246   :  { %v2356_v13 = vpop.eup %2355  ;;  %2253 = vmatprep.subr.bf16.mxu1 %v2711_v3 }
0x1247   :  { %v1514_v15 = vmul.f32 %v2356_v13, %v2352_v1  ;;  %v2037_v1 = vld [vmem:[#allocation17 + $0x1] ss:$0 sm:$0xff] }
0x1249   :  { %v1516_v16 = vpack.c.bf16 %v1514_v15, %v1514_v15 }
0x124a   :  { %v2358_v17 = vpop.eup %2357 }
0x124b   :  { %v1515_v19 = vmul.f32 %v2358_v17, %v2354_v4  ;;  %2238 = vmatmul.mubr.msk.bf16.vlgmr.msra.gmra.mrb[40].mxu0 %vm414_vm4, %v1516_v16  ;;  %v2317_v16 = vld [vmem:[#allocation14 + $0x10] sm:$0xff]   ;;  %v2318_v17 = vld [vmem:[#allocation14 + $0x18] sm:$0xff]  }
0x124c   :  { %2249 = vmatprep.mubr.msk.bf16.mxu0 %vm2712_vm0, %v2711_v3  ;;  %2248 = vmatpush3.bf16.msra.mxu0 %v2314_v21 }
0x124d   :  { %v1517_v48 = vpack.c.bf16 %v1515_v19, %v1515_v19  ;;  %2259 = vmatprep.subr.bf16.mxu0 %v2711_v3  ;;  %v2039_v19 = vld [vmem:[#allocation13 + $0x1] ss:$0 sm:$0xff] }
0x124f   :  { %2244 = vmatmul.mubr.msk.bf16.vlgmr.msra.gmra.mrb[40].mxu1 %vm414_vm4, %v1517_v48 }
0x1250   :  { %2254 = vmatpush3.bf16.msra.mxu1 %v2313_v20  ;;  %2255 = vmatprep.mubr.msk.bf16.mxu1 %vm2712_vm0, %v2711_v3 }
0x1251   :  { %2267 = vmatprep.subr.bf16.mxu1 %v2711_v3 }
0x1257   :  { %2256 = vmatmul.mubr.msk.bf16.vlgmr.msra.gmra.mrb[44].mxu1 %vm314_vm2, %v1391_v39 }
0x1258   :  { %2271 = vmatprep.mubr.msk.bf16.mxu1 %vm2712_vm0, %v2711_v3  ;;  %2268 = vmatpush3.bf16.msra.mxu1 %v2317_v16 }
0x1259   :  { %2269 = vmatprep.subr.bf16.mxu1 %v2711_v3 }
0x125c   :  { %2270 = vmatpush3.bf16.msra.mxu1 %v2318_v17 }
0x131e   :  { %v1560_v22 = vpop.f32.mrb[40].mxu0 }
0x131f   :  { %v2239_v23 = vpop.f32.mrb[41].mxu0 }
0x1320   :  { %v1563_v24 = vpop.f32.mrb[42].mxu0 }
0x1321   :  { %v2240_v25 = vpop.f32.mrb[43].mxu0 }
0x1322   :  { %v1608_v27 = vpop.f32.mrb[40].mxu1 }
0x1323   :  { %v1614_v28 = vpack.c.bf16 %v1608_v27, %v1560_v22  ;;  %v2245_v29 = vpop.f32.mrb[41].mxu1 }
0x1324   :  { %v1611_v30 = vpop.f32.mrb[42].mxu1  ;;  %v2043_v29 = vld [vmem:[#allocation16 + $0x1] ss:$0 sm:$0xff] }
0x1325   :  { %v2246_v31 = vpop.f32.mrb[43].mxu1  ;;  %2250 = vmatmul.mubr.msk.bf16.vlgmr.msra.gmra.mrb[44].mxu0 %vm314_vm2, %v1614_v28 }
0x1326   :  { %2263 = vmatprep.mubr.msk.bf16.mxu0 %vm2712_vm0, %v2711_v3  ;;  %2260 = vmatpush3.bf16.msra.mxu0 %v2315_v58  ;;  %v2048_v58 = vld [vmem:[#allocation22 + $0x1] ss:$0 sm:$0xff] }
0x1327   :  { %2261 = vmatprep.subr.bf16.mxu0 %v2711_v3 }
0x132a   :  { %v1708_v32 = vpop.f32.mrb[44].mxu1 }
0x132b   :  { %v2257_v10 = vpop.f32.mrb[45].mxu1 }
0x132c   :  { %v1711_v33 = vpop.f32.mrb[46].mxu1 }
0x132d   :  { %v2258_v11 = vpop.f32.mrb[47].mxu1 }
0x13f8   :  { %v1658_v34 = vpop.f32.mrb[44].mxu0 }
0x13f9   :  { %v1709_v36 = vadd.f32 %v1708_v32, %v1658_v34  ;;  %v2251_v37 = vpop.f32.mrb[45].mxu0 }
0x13fa   :  { %v1661_v38 = vpop.f32.mrb[46].mxu0 }
0x13fb   :  { %v1723_v39 = vadd.f32 %v2036_v35, %v1709_v36  ;;  %v1712_v40 = vadd.f32 %v1711_v33, %v1661_v38  ;;  %v2252_v41 = vpop.f32.mrb[47].mxu0 }
0x13fd   :  { %v1724_v43 = vadd.f32 %v2036_v35, %v1712_v40  ;;  %v1725_v44 = vadd.f32 %v1723_v39, %v3154_v42 }
0x13ff   :  { %v1731_v46 = vsel %vm260_vm1, %v1725_v44, 0.0  ;;  %v1726_v47 = vadd.f32 %v1724_v43, %v3157_v14  ;;  %v2316_v14 = vld [vmem:[#allocation11 + $0x18] sm:$0xff]  }
0x1400   :  { %1732 = vadd.xlane.f32.xlu1 %v1731_v46  ;;  %2262 = vmatpush3.bf16.msra.mxu0 %v2316_v14 }
0x1401   :  { %v1734_v49 = vsel %vm260_vm1, %v1726_v47, 0.0 }
0x1402   :  { %1735 = vadd.xlane.f32.xlu0 %v1734_v49 }
0x148d   :  { %v1733_v50 = vpop.xlane.xlu1 %1732 }
0x148e   :  { %v1737_v51 = vmul.f32 0.03125, %v1733_v50 }
0x148f   :  { %v1736_v52 = vpop.xlane.xlu0 %1735 }
0x1490   :  { %v1739_v18 = vsub.f32 %v1725_v44, %v1737_v51  ;;  %v1738_v53 = vmul.f32 0.03125, %v1736_v52 }
0x1492   :  { %v1740_v54 = vsub.f32 %v1726_v47, %v1738_v53  ;;  %v1741_v55 = vmul.f32 %v1739_v18, %v1739_v18 }
0x1494   :  { %v1743_v56 = vsel %vm260_vm1, %v1741_v55, 0.0  ;;  %v1742_v57 = vmul.f32 %v1740_v54, %v1740_v54 }
0x1495   :  { %1744 = vadd.xlane.f32.xlu1 %v1743_v56  ;;  %v2047_v56 = vld [vmem:[#allocation20 + $0x1] ss:$0 sm:$0xff] }
0x1496   :  { %v1746_v42 = vsel %vm260_vm1, %v1742_v57, 0.0 }
0x1497   :  { %1747 = vadd.xlane.f32.xlu0 %v1746_v42 }
0x1522   :  { %v1745_v59 = vpop.xlane.xlu1 %1744 }
0x1523   :  { %v1749_v60 = vmul.f32 0.03125, %v1745_v59 }
0x1524   :  { %v1748_v61 = vpop.xlane.xlu0 %1747 }
0x1525   :  { %v1751_v62 = vadd.f32 1e-05, %v1749_v60  ;;  %v1750_v63 = vmul.f32 0.03125, %v1748_v61 }
0x1527   :  { %2359 = vrsqrt.f32 %v1751_v62  ;;  %v1752_v26 = vadd.f32 1e-05, %v1750_v63 }
0x1529   :  { %2361 = vrsqrt.f32 %v1752_v26 }
0x1531   :  { %v2360_v0 = vpop.eup %2359 }
0x1532   :  { %v1755_v2 = vmul.f32 %v2360_v0, %v1739_v18 }
0x1533   :  { %v2362_v4 = vpop.eup %2361 }
0x1534   :  { %v1763_v45 = vmul.f32 %v2037_v1, %v1755_v2  ;;  %v1756_v5 = vmul.f32 %v2362_v4, %v1740_v54 }
0x1536   :  { %v1764_v8 = vmul.f32 %v2037_v1, %v1756_v5  ;;  %v1771_v12 = vadd.f32 %v2038_v7, %v1763_v45 }
0x1538   :  { %v1772_v13 = vadd.f32 %v2038_v7, %v1764_v8 }
0x153a   :  { %v1778_v15 = vpack.c.bf16 %v1772_v13, %v1771_v12 }
0x153c   :  { %2264 = vmatmul.mubr.msk.bf16.vlgmr.msra.gmra.mrb[48].mxu0 %vm260_vm1, %v1778_v15 }
0x160f   :  { %v1836_v20 = vpop.f32.mrb[48].mxu0 }
0x1610   :  { %v1837_v48 = vadd.f32 %v2039_v19, %v1836_v20  ;;  %v2265_v21 = vpop.f32.mrb[49].mxu0 }
0x1611   :  { %v1839_v22 = vpop.f32.mrb[50].mxu0 }
0x1612   :  { %v1840_v23 = vadd.f32 %v2039_v19, %v1839_v22  ;;  %v2266_v24 = vpop.f32.mrb[51].mxu0  ;;  %v1843_v25 = vmax.f32 %v1837_v48, 0.0 }
0x1614   :  { %v1844_v27 = vmax.f32 %v1840_v23, 0.0 }
0x1616   :  { %v1850_v28 = vpack.c.bf16 %v1844_v27, %v1843_v25 }
0x1618   :  { %2272 = vmatmul.mubr.msk.bf16.vlgmr.msra.gmra.mrb[48].mxu1 %vm260_vm1, %v1850_v28 }
0x16eb   :  { %v1908_v30 = vpop.f32.mrb[48].mxu1 }
0x16ec   :  { %v1909_v31 = vadd.f32 %v2043_v29, %v1908_v30  ;;  %v2273_v32 = vpop.f32.mrb[49].mxu1 }
0x16ed   :  { %v1911_v10 = vpop.f32.mrb[50].mxu1 }
0x16ee   :  { %v1912_v3 = vadd.f32 %v2043_v29, %v1911_v10  ;;  %v2274_v33 = vpop.f32.mrb[51].mxu1  ;;  %v1915_v11 = vadd.f32 %v1909_v31, %v1771_v12 }
0x16f0   :  { %v1921_v34 = vsel %vm260_vm1, %v1915_v11, 0.0  ;;  %v1916_v35 = vadd.f32 %v1912_v3, %v1772_v13 }
0x16f1   :  { %1922 = vadd.xlane.f32.xlu1 %v1921_v34 }
0x16f2   :  { %v1924_v36 = vsel %vm260_vm1, %v1916_v35, 0.0 }
0x16f3   :  { %1925 = vadd.xlane.f32.xlu0 %v1924_v36 }
0x177e   :  { %v1923_v37 = vpop.xlane.xlu1 %1922 }
0x177f   :  { %v1927_v38 = vmul.f32 0.03125, %v1923_v37 }
0x1780   :  { %v1926_v39 = vpop.xlane.xlu0 %1925 }
0x1781   :  { %v1929_v40 = vsub.f32 %v1915_v11, %v1927_v38  ;;  %v1928_v41 = vmul.f32 0.03125, %v1926_v39 }
0x1783   :  { %v1930_v43 = vsub.f32 %v1916_v35, %v1928_v41  ;;  %v1931_v44 = vmul.f32 %v1929_v40, %v1929_v40 }
0x1785   :  { %v1933_v46 = vsel %vm260_vm1, %v1931_v44, 0.0  ;;  %v1932_v47 = vmul.f32 %v1930_v43, %v1930_v43 }
0x1786   :  { %1934 = vadd.xlane.f32.xlu1 %v1933_v46 }
0x1787   :  { %v1936_v49 = vsel %vm260_vm1, %v1932_v47, 0.0 }
0x1788   :  { %1937 = vadd.xlane.f32.xlu0 %v1936_v49 }
0x1813   :  { %v1935_v50 = vpop.xlane.xlu1 %1934 }
0x1814   :  { %v1939_v51 = vmul.f32 0.03125, %v1935_v50 }
0x1815   :  { %v1938_v52 = vpop.xlane.xlu0 %1937 }
0x1816   :  { %v1941_v18 = vadd.f32 1e-05, %v1939_v51  ;;  %v1940_v53 = vmul.f32 0.03125, %v1938_v52 }
0x1818   :  { %2363 = vrsqrt.f32 %v1941_v18  ;;  %v1942_v54 = vadd.f32 1e-05, %v1940_v53 }
0x181a   :  { %2365 = vrsqrt.f32 %v1942_v54 }
0x1822   :  { %v2364_v55 = vpop.eup %2363 }
0x1823   :  { %v1945_v57 = vmul.f32 %v2364_v55, %v1929_v40 }
0x1824   :  { %v2366_v42 = vpop.eup %2365 }
0x1825   :  { %v1946_v14 = vmul.f32 %v2366_v42, %v1930_v43  ;;  %v1953_v59 = vmul.f32 %v2047_v56, %v1945_v57 }
0x1827   :  { %v1954_v60 = vmul.f32 %v2047_v56, %v1946_v14  ;;  %v1961_v61 = vadd.f32 %v2048_v58, %v1953_v59 }
0x1829   :  { %v1962_v62 = vadd.f32 %v2048_v58, %v1954_v60  ;;  %v1963_v63 = vmul.f32 %v1961_v61, %v3019_v6 }
0x182b   :  { %v1964_v26 = vmul.f32 %v1962_v62, %v3021_v9  ;;  %v1965_v0 = vpack.c.bf16 %v1963_v63, %v1963_v63 }
0x182d   :  { %v1966_v1 = vpack.c.bf16 %v1964_v26, %v1964_v26  ;;  %1968 = vst.msk [vmem:[#allocation23] sm:$0xf] %vm1967_vm6, %v1965_v0 }
0x182f   :  { %1969 = vst.msk [vmem:[#allocation23 + $0x4] sm:$0xf] %vm1967_vm6, %v1966_v1 }
0x1830   :  { %2664 = shalt.err (!%p2661_p10)
}
0x1831   :  { %s2665_s14 = scalar_lea.hbm %s3301_s13, 128 }
0x1832   :  { %p2666_p11 = scmp.ne.s32.totalorder %s3301_s13, %s2665_s14  ;;  %p2669_p12 = scmp.lt.u32.totalorder %s2665_s14, %s3301_s13 }
0x1834   :  { %p2671_p13 = pnand %p2669_p12, %p2666_p11 }
0x1836   :  { %2674 = shalt.err (!%p2671_p13)
}
0x1837   :  { %1981 = dma.vmem_to_hbm [thread:$0]  %s1976_s27, 128, %s3301_s13, [#allocation4], %s2696_s26, %s2696_s26, %s2697_s17  }
0x1838   :  { %2689 = dma.done.wait [#allocation4], 128  }
0x1839   :  { %2690 = vsyncadd [#allocation4], 4294967168 }
0x183a   :  { %1985 = vsyncpa [#allocation3], 1 }
0x183b   :  { %1986 = vsyncpa [#allocation6], 1 }
0x183c   :  { %1987 = vsyncpa [#allocation9], 1 }
0x183d   :  { %1988 = vsyncpa [#allocation12], 1 }
0x183e   :  { %1989 = vsyncpa [#allocation15], 1 }
0x183f   :  { %1990 = vsyncpa [#allocation18], 1 }
0x1840   :  { %1991 = vsyncpa [#allocation21], 1 }
0x1841   :  { %1992 = vsyncpa [#allocation4], 1 }

// kernel: tctrec_forward.7
= control target key start
LH: loop header
LB: loop body
LE: loop exit
PB: predicated region body
PF: predicated region fallthrough
CT: control target
= control target key end

     0   :  { %17 = vsyncpa [#allocation3], 0  ;;  %s3174_s0 = inlined_call_operand.hbm [shape: bf16[2,8,32], index: 0, kind: input, shape index: {}]   ;;  %s3175_s1 = inlined_call_operand.hbm [shape: bf16[2,32,96], index: 1, kind: input, shape index: {}]   ;;  %s3176_s2 = inlined_call_operand.hbm [shape: bf16[2,32,32], index: 2, kind: input, shape index: {}]   ;;  %s3177_s3 = inlined_call_operand.hbm [shape: f32[2,1,32], index: 3, kind: input, shape index: {}]   ;;  %s3178_s4 = inlined_call_operand.hbm [shape: bf16[2,32,32], index: 4, kind: input, shape index: {}]   ;;  %s3179_s5 = inlined_call_operand.hbm [shape: f32[2,1,32], index: 5, kind: input, shape index: {}]   ;;  %s3180_s6 = inlined_call_operand.hbm [shape: bf16[2,32,32], index: 6, kind: input, shape index: {}]   ;;  %s3181_s7 = inlined_call_operand.hbm [shape: f32[2,1,32], index: 7, kind: input, shape index: {}]   ;;  %s3182_s8 = inlined_call_operand.hbm [shape: f32[2,1,32], index: 8, kind: input, shape index: {}]   ;;  %s3183_s9 = inlined_call_operand.hbm [shape: f32[2,1,32], index: 9, kind: input, shape index: {}]   ;;  %s3184_s10 = inlined_call_operand.hbm [shape: f32[2,1,32], index: 10, kind: input, shape index: {}]   ;;  %s3185_s11 = inlined_call_operand.hbm [shape: f32[2,1,32], index: 11, kind: input, shape index: {}]   ;;  %s3186_s12 = inlined_call_operand.hbm [shape: bf16[2,8,32], index: 12, kind: output, shape index: {}]  }
   0x1   :  { %18 = vsyncpa [#allocation6], 0 }
   0x2   :  { %19 = vsyncpa [#allocation9], 0 }
   0x3   :  { %20 = vsyncpa [#allocation12], 0 }
   0x4   :  { %21 = vsyncpa [#allocation15], 0 }
   0x5   :  { %22 = vsyncpa [#allocation18], 0 }
   0x6   :  { %23 = vsyncpa [#allocation21], 0 }
   0x7   :  { %24 = vsyncpa [#allocation4], 0  ;;  %s2620_s21 = smov [#allocation5]   ;;  %s2621_s23 = smov [#allocation8]  }
   0x8   :  { %s42_s22 = sshll.u32 %s2620_s21, 4  ;;  %s66_s24 = sshll.u32 %s2621_s23, 4  ;;  %s43_s22 = int_to_ptr.vmem [resolvable:$true] %s42_s22  ;;  %s2708_s24 = int_to_ptr.vmem [resolvable:$true] %s66_s24 }
   0x9   :  { %s2318_s27 = scalar_lea.hbm %s3175_s1, 512 }
   0xa   :  { %p2319_p0 = scmp.ne.s32.totalorder %s3175_s1, %s2318_s27  ;;  %p2322_p1 = scmp.lt.u32.totalorder %s2318_s27, %s3175_s1 }
   0xc   :  { %p2324_p2 = pnand %p2322_p1, %p2319_p0 }
   0xe   :  { %2327 = shalt.err (!%p2324_p2)
}
   0xf   :  { %s2328_s14 = scalar_lea.vmem %s43_s22, 512  ;;  %p2333_p4 = scmp.lt.s32.totalorder %s43_s22, %s43_s22 }
  0x10   :  { %p2329_p3 = scmp.ne.s32.totalorder %s43_s22, %s2328_s14  ;;  %p2334_p5 = scmp.lt.s32.totalorder %s2328_s14, %s2328_s14 }
  0x12   :  { %p2335_p6 = por %p2334_p5, %p2333_p4 }
  0x14   :  { %p2336_p7 = pnand %p2335_p6, %p2329_p3 }
  0x16   :  { %2339 = shalt.err (!%p2336_p7)
}
  0x17   :  { %s2622_s15 = smov 64   ;;  %s2623_s16 = smov 4  }
  0x18   :  { %48 = dma.hbm_to_vmem [thread:$0]  %s3175_s1, 512, %s43_s22, [#allocation6], %s2622_s15, %s2622_s15, %s2623_s16  }
  0x19   :  { %s2340_s21 = scalar_lea.hbm %s3177_s3, 32 }
  0x1a   :  { %p2341_p8 = scmp.ne.s32.totalorder %s3177_s3, %s2340_s21  ;;  %p2344_p9 = scmp.lt.u32.totalorder %s2340_s21, %s3177_s3 }
  0x1c   :  { %p2346_p10 = pnand %p2344_p9, %p2341_p8 }
  0x1e   :  { %2349 = shalt.err (!%p2346_p10)
}
  0x1f   :  { %s2350_s28 = scalar_lea.vmem %s2708_s24, 32  ;;  %p2355_p12 = scmp.lt.s32.totalorder %s2708_s24, %s2708_s24 }
  0x20   :  { %p2351_p11 = scmp.ne.s32.totalorder %s2708_s24, %s2350_s28  ;;  %p2356_p13 = scmp.lt.s32.totalorder %s2350_s28, %s2350_s28 }
  0x22   :  { %p2357_p0 = por %p2356_p13, %p2355_p12 }
  0x24   :  { %p2358_p1 = pnand %p2357_p0, %p2351_p11 }
  0x26   :  { %2361 = shalt.err (!%p2358_p1)
}
  0x27   :  { %s2624_s1 = smov 16   ;;  %s2625_s22 = smov 1  }
  0x28   :  { %72 = dma.hbm_to_vmem [thread:$0]  %s3177_s3, 32, %s2708_s24, [#allocation9], %s2624_s1, %s2624_s1, %s2625_s22  }
  0x29   :  { %s2626_s13 = smov [#allocation11]   ;;  %s2627_s17 = smov [#allocation14]  }
  0x2a   :  { %s90_s14 = sshll.u32 %s2626_s13, 4  ;;  %s114_s18 = sshll.u32 %s2627_s17, 4  ;;  %s91_s14 = int_to_ptr.vmem [resolvable:$true] %s90_s14  ;;  %s2745_s18 = int_to_ptr.vmem [resolvable:$true] %s114_s18 }
  0x2b   :  { %s2362_s21 = scalar_lea.hbm %s3179_s5, 32 }
  0x2c   :  { %p2363_p2 = scmp.ne.s32.totalorder %s3179_s5, %s2362_s21  ;;  %p2366_p3 = scmp.lt.u32.totalorder %s2362_s21, %s3179_s5 }
  0x2e   :  { %p2368_p4 = pnand %p2366_p3, %p2363_p2 }
  0x30   :  { %2371 = shalt.err (!%p2368_p4)
}
  0x31   :  { %s2372_s3 = scalar_lea.vmem %s91_s14, 32  ;;  %p2377_p6 = scmp.lt.s32.totalorder %s91_s14, %s91_s14 }
  0x32   :  { %p2373_p5 = scmp.ne.s32.totalorder %s91_s14, %s2372_s3  ;;  %p2378_p7 = scmp.lt.s32.totalorder %s2372_s3, %s2372_s3 }
  0x34   :  { %p2379_p8 = por %p2378_p7, %p2377_p6 }
  0x36   :  { %p2380_p9 = pnand %p2379_p8, %p2373_p5 }
  0x38   :  { %2383 = shalt.err (!%p2380_p9)
}
  0x39   :  { %96 = dma.hbm_to_vmem [thread:$0]  %s3179_s5, 32, %s91_s14, [#allocation12], %s2624_s1, %s2624_s1, %s2625_s22  }
  0x3a   :  { %s2384_s13 = scalar_lea.hbm %s3181_s7, 32 }
  0x3b   :  { %p2385_p10 = scmp.ne.s32.totalorder %s3181_s7, %s2384_s13  ;;  %p2388_p11 = scmp.lt.u32.totalorder %s2384_s13, %s3181_s7 }
  0x3d   :  { %p2390_p12 = pnand %p2388_p11, %p2385_p10 }
  0x3f   :  { %2393 = shalt.err (!%p2390_p12)
}
  0x40   :  { %s2394_s23 = scalar_lea.vmem %s2745_s18, 32  ;;  %p2399_p0 = scmp.lt.s32.totalorder %s2745_s18, %s2745_s18 }
  0x41   :  { %p2395_p13 = scmp.ne.s32.totalorder %s2745_s18, %s2394_s23  ;;  %p2400_p1 = scmp.lt.s32.totalorder %s2394_s23, %s2394_s23 }
  0x43   :  { %p2401_p2 = por %p2400_p1, %p2399_p0 }
  0x45   :  { %p2402_p3 = pnand %p2401_p2, %p2395_p13 }
  0x47   :  { %2405 = shalt.err (!%p2402_p3)
}
  0x48   :  { %120 = dma.hbm_to_vmem [thread:$0]  %s3181_s7, 32, %s2745_s18, [#allocation15], %s2624_s1, %s2624_s1, %s2625_s22  }
  0x49   :  { %s2628_s25 = smov [#allocation17]   ;;  %s2629_s27 = smov [#allocation2]  }
  0x4a   :  { %s138_s26 = sshll.u32 %s2628_s25, 4  ;;  %s30_s3 = sshll.u32 %s2629_s27, 4  ;;  %s139_s26 = int_to_ptr.vmem [resolvable:$true] %s138_s26  ;;  %s2782_s3 = int_to_ptr.vmem [resolvable:$true] %s30_s3 }
  0x4b   :  { %s2406_s29 = scalar_lea.hbm %s3183_s9, 32 }
  0x4c   :  { %p2407_p4 = scmp.ne.s32.totalorder %s3183_s9, %s2406_s29  ;;  %p2410_p5 = scmp.lt.u32.totalorder %s2406_s29, %s3183_s9 }
  0x4e   :  { %p2412_p6 = pnand %p2410_p5, %p2407_p4 }
  0x50   :  { %2415 = shalt.err (!%p2412_p6)
}
  0x51   :  { %s2416_s7 = scalar_lea.vmem %s139_s26, 32  ;;  %p2421_p8 = scmp.lt.s32.totalorder %s139_s26, %s139_s26 }
  0x52   :  { %p2417_p7 = scmp.ne.s32.totalorder %s139_s26, %s2416_s7  ;;  %p2422_p9 = scmp.lt.s32.totalorder %s2416_s7, %s2416_s7 }
  0x54   :  { %p2423_p10 = por %p2422_p9, %p2421_p8 }
  0x56   :  { %p2424_p11 = pnand %p2423_p10, %p2417_p7 }
  0x58   :  { %2427 = shalt.err (!%p2424_p11)
}
  0x59   :  { %144 = dma.hbm_to_vmem [thread:$0]  %s3183_s9, 32, %s139_s26, [#allocation18], %s2624_s1, %s2624_s1, %s2625_s22  }
  0x5a   :  { %s2428_s5 = scalar_lea.hbm %s3174_s0, 128 }
  0x5b   :  { %p2429_p12 = scmp.ne.s32.totalorder %s3174_s0, %s2428_s5  ;;  %p2432_p13 = scmp.lt.u32.totalorder %s2428_s5, %s3174_s0 }
  0x5d   :  { %p2434_p0 = pnand %p2432_p13, %p2429_p12 }
  0x5f   :  { %2437 = shalt.err (!%p2434_p0)
}
  0x60   :  { %s2438_s28 = scalar_lea.vmem %s2782_s3, 128  ;;  %p2443_p2 = scmp.lt.s32.totalorder %s2782_s3, %s2782_s3 }
  0x61   :  { %p2439_p1 = scmp.ne.s32.totalorder %s2782_s3, %s2438_s28  ;;  %p2444_p3 = scmp.lt.s32.totalorder %s2438_s28, %s2438_s28 }
  0x63   :  { %p2445_p4 = por %p2444_p3, %p2443_p2 }
  0x65   :  { %p2446_p5 = pnand %p2445_p4, %p2439_p1 }
  0x67   :  { %2449 = shalt.err (!%p2446_p5)
}
  0x68   :  { %36 = dma.hbm_to_vmem [thread:$0]  %s3174_s0, 128, %s2782_s3, [#allocation3], %s2622_s15, %s2622_s15, %s2623_s16  }
  0x69   :  { %s2630_s29 = smov [#allocation7]   ;;  %s2631_s13 = smov [#allocation10]  }
  0x6a   :  { %s54_s30 = sshll.u32 %s2630_s29, 4  ;;  %s78_s17 = sshll.u32 %s2631_s13, 4  ;;  %s55_s30 = int_to_ptr.vmem [resolvable:$true] %s54_s30  ;;  %s2819_s17 = int_to_ptr.vmem [resolvable:$true] %s78_s17 }
  0x6b   :  { %s2450_s18 = scalar_lea.hbm %s3176_s2, 512 }
  0x6c   :  { %p2451_p6 = scmp.ne.s32.totalorder %s3176_s2, %s2450_s18  ;;  %p2454_p7 = scmp.lt.u32.totalorder %s2450_s18, %s3176_s2 }
  0x6e   :  { %p2456_p8 = pnand %p2454_p7, %p2451_p6 }
  0x70   :  { %2459 = shalt.err (!%p2456_p8)
}
  0x71   :  { %s2460_s0 = scalar_lea.vmem %s55_s30, 512  ;;  %p2465_p10 = scmp.lt.s32.totalorder %s55_s30, %s55_s30 }
  0x72   :  { %p2461_p9 = scmp.ne.s32.totalorder %s55_s30, %s2460_s0  ;;  %p2466_p11 = scmp.lt.s32.totalorder %s2460_s0, %s2460_s0 }
  0x74   :  { %p2467_p12 = por %p2466_p11, %p2465_p10 }
  0x76   :  { %p2468_p13 = pnand %p2467_p12, %p2461_p9 }
  0x78   :  { %2471 = shalt.err (!%p2468_p13)
}
  0x79   :  { %60 = dma.hbm_to_vmem [thread:$0]  %s3176_s2, 512, %s55_s30, [#allocation6], %s2622_s15, %s2622_s15, %s2623_s16  }
  0x7a   :  { %s2472_s24 = scalar_lea.hbm %s3178_s4, 512 }
  0x7b   :  { %p2473_p0 = scmp.ne.s32.totalorder %s3178_s4, %s2472_s24  ;;  %p2476_p1 = scmp.lt.u32.totalorder %s2472_s24, %s3178_s4 }
  0x7d   :  { %p2478_p2 = pnand %p2476_p1, %p2473_p0 }
  0x7f   :  { %2481 = shalt.err (!%p2478_p2)
}
  0x80   :  { %s2482_s13 = scalar_lea.vmem %s2819_s17, 512  ;;  %p2487_p4 = scmp.lt.s32.totalorder %s2819_s17, %s2819_s17 }
  0x81   :  { %p2483_p3 = scmp.ne.s32.totalorder %s2819_s17, %s2482_s13  ;;  %p2488_p5 = scmp.lt.s32.totalorder %s2482_s13, %s2482_s13 }
  0x83   :  { %p2489_p6 = por %p2488_p5, %p2487_p4 }
  0x85   :  { %p2490_p7 = pnand %p2489_p6, %p2483_p3 }
  0x87   :  { %2493 = shalt.err (!%p2490_p7)
}
  0x88   :  { %84 = dma.hbm_to_vmem [thread:$0]  %s3178_s4, 512, %s2819_s17, [#allocation9], %s2622_s15, %s2622_s15, %s2623_s16  }
  0x89   :  { %s2632_s19 = smov [#allocation13]   ;;  %s2633_s18 = smov [#allocation16]  }
  0x8a   :  { %s102_s7 = sshll.u32 %s2632_s19, 4  ;;  %s126_s20 = sshll.u32 %s2633_s18, 4  ;;  %s103_s7 = int_to_ptr.vmem [resolvable:$true] %s102_s7  ;;  %s2856_s20 = int_to_ptr.vmem [resolvable:$true] %s126_s20 }
  0x8b   :  { %s2494_s5 = scalar_lea.hbm %s3180_s6, 512 }
  0x8c   :  { %p2495_p8 = scmp.ne.s32.totalorder %s3180_s6, %s2494_s5  ;;  %p2498_p9 = scmp.lt.u32.totalorder %s2494_s5, %s3180_s6 }
  0x8e   :  { %p2500_p10 = pnand %p2498_p9, %p2495_p8 }
  0x90   :  { %2503 = shalt.err (!%p2500_p10)
}
  0x91   :  { %s2504_s4 = scalar_lea.vmem %s103_s7, 512  ;;  %p2509_p12 = scmp.lt.s32.totalorder %s103_s7, %s103_s7 }
  0x92   :  { %p2505_p11 = scmp.ne.s32.totalorder %s103_s7, %s2504_s4  ;;  %p2510_p13 = scmp.lt.s32.totalorder %s2504_s4, %s2504_s4 }
  0x94   :  { %p2511_p0 = por %p2510_p13, %p2509_p12 }
  0x96   :  { %p2512_p1 = pnand %p2511_p0, %p2505_p11 }
  0x98   :  { %2515 = shalt.err (!%p2512_p1)
}
  0x99   :  { %108 = dma.hbm_to_vmem [thread:$0]  %s3180_s6, 512, %s103_s7, [#allocation12], %s2622_s15, %s2622_s15, %s2623_s16  }
  0x9a   :  { %s2516_s9 = scalar_lea.hbm %s3182_s8, 32 }
  0x9b   :  { %p2517_p2 = scmp.ne.s32.totalorder %s3182_s8, %s2516_s9  ;;  %p2520_p3 = scmp.lt.u32.totalorder %s2516_s9, %s3182_s8 }
  0x9d   :  { %p2522_p4 = pnand %p2520_p3, %p2517_p2 }
  0x9f   :  { %2525 = shalt.err (!%p2522_p4)
}
  0xa0   :  { %s2526_s30 = scalar_lea.vmem %s2856_s20, 32  ;;  %p2531_p6 = scmp.lt.s32.totalorder %s2856_s20, %s2856_s20 }
  0xa1   :  { %p2527_p5 = scmp.ne.s32.totalorder %s2856_s20, %s2526_s30  ;;  %p2532_p7 = scmp.lt.s32.totalorder %s2526_s30, %s2526_s30 }
  0xa3   :  { %p2533_p8 = por %p2532_p7, %p2531_p6 }
  0xa5   :  { %p2534_p9 = pnand %p2533_p8, %p2527_p5 }
  0xa7   :  { %2537 = shalt.err (!%p2534_p9)
}
  0xa8   :  { %132 = dma.hbm_to_vmem [thread:$0]  %s3182_s8, 32, %s2856_s20, [#allocation15], %s2624_s1, %s2624_s1, %s2625_s22  }
  0xa9   :  { %s2634_s7 = smov [#allocation19]   ;;  %s2635_s21 = smov [#allocation20]  }
  0xaa   :  { %s150_s18 = sshll.u32 %s2634_s7, 4  ;;  %s162_s23 = sshll.u32 %s2635_s21, 4  ;;  %s151_s18 = int_to_ptr.vmem [resolvable:$true] %s150_s18  ;;  %s2893_s23 = int_to_ptr.vmem [resolvable:$true] %s162_s23 }
  0xab   :  { %s2538_s3 = scalar_lea.hbm %s3184_s10, 32 }
  0xac   :  { %p2539_p10 = scmp.ne.s32.totalorder %s3184_s10, %s2538_s3  ;;  %p2542_p11 = scmp.lt.u32.totalorder %s2538_s3, %s3184_s10 }
  0xae   :  { %p2544_p12 = pnand %p2542_p11, %p2539_p10 }
  0xb0   :  { %2547 = shalt.err (!%p2544_p12)
}
  0xb1   :  { %s2548_s8 = scalar_lea.vmem %s151_s18, 32  ;;  %p2553_p0 = scmp.lt.s32.totalorder %s151_s18, %s151_s18 }
  0xb2   :  { %p2549_p13 = scmp.ne.s32.totalorder %s151_s18, %s2548_s8  ;;  %p2554_p1 = scmp.lt.s32.totalorder %s2548_s8, %s2548_s8 }
  0xb4   :  { %p2555_p2 = por %p2554_p1, %p2553_p0 }
  0xb6   :  { %p2556_p3 = pnand %p2555_p2, %p2549_p13 }
  0xb8   :  { %2559 = shalt.err (!%p2556_p3)
}
  0xb9   :  { %156 = dma.hbm_to_vmem [thread:$0]  %s3184_s10, 32, %s151_s18, [#allocation18], %s2624_s1, %s2624_s1, %s2625_s22  }
  0xba   :  { %s2560_s9 = scalar_lea.hbm %s3185_s11, 32 }
  0xbb   :  { %p2561_p4 = scmp.ne.s32.totalorder %s3185_s11, %s2560_s9  ;;  %p2564_p5 = scmp.lt.u32.totalorder %s2560_s9, %s3185_s11 }
  0xbd   :  { %p2566_p6 = pnand %p2564_p5, %p2561_p4 }
  0xbf   :  { %2569 = shalt.err (!%p2566_p6)
}
  0xc0   :  { %s2570_s30 = scalar_lea.vmem %s2893_s23, 32  ;;  %p2575_p8 = scmp.lt.s32.totalorder %s2893_s23, %s2893_s23 }
  0xc1   :  { %p2571_p7 = scmp.ne.s32.totalorder %s2893_s23, %s2570_s30  ;;  %p2576_p9 = scmp.lt.s32.totalorder %s2570_s30, %s2570_s30 }
  0xc3   :  { %p2577_p10 = por %p2576_p9, %p2575_p8 }
  0xc5   :  { %p2578_p11 = pnand %p2577_p10, %p2571_p7 }
  0xc7   :  { %2581 = shalt.err (!%p2578_p11)
}
  0xc8   :  { %168 = dma.hbm_to_vmem [thread:$0]  %s3185_s11, 32, %s2893_s23, [#allocation21], %s2624_s1, %s2624_s1, %s2625_s22  }
  0xc9   :  { %2604 = dma.done.wait [#allocation3], 128  }
  0xca   :  { %2605 = vsyncadd [#allocation3], 4294967168 }
  0xcb   :  { %2606 = dma.done.wait [#allocation6], 1024  }
  0xcc   :  { %2607 = vsyncadd [#allocation6], 4294966272 }
  0xcd   :  { %2608 = dma.done.wait [#allocation9], 544  }
  0xce   :  { %2609 = vsyncadd [#allocation9], 4294966752 }
  0xcf   :  { %2610 = dma.done.wait [#allocation12], 544  }
  0xd0   :  { %2611 = vsyncadd [#allocation12], 4294966752 }
  0xd1   :  { %2612 = dma.done.wait [#allocation15], 64  }
  0xd2   :  { %2613 = vsyncadd [#allocation15], 4294967232 }
  0xd3   :  { %2614 = dma.done.wait [#allocation18], 64  }
  0xd4   :  { %2615 = vsyncadd [#allocation18], 4294967232 }
  0xd5   :  { %2616 = dma.done.wait [#allocation21], 32  }
  0xd6   :  { %2617 = vsyncadd [#allocation21], 4294967264  ;;  %v2636_v0 = vmov 0.0   ;;  %vm2637_vm0 = vmmov 0   ;;  %v2252_v1 = vld [vmem:[#allocation5] sm:$0xff]   ;;  %v2253_v2 = vld [vmem:[#allocation5 + $0x8] sm:$0xff]  }
  0xd7   :  { %2061 = vmatprep.subr.bf16.mxu0 %v2636_v0  ;;  %2065 = vmatprep.mubr.msk.bf16.mxu0 %vm2637_vm0, %v2636_v0  ;;  %v2936_v3 = vld [vmem:[#allocation2] sm:$0xff]   ;;  %vm227_vm1 = vcmask 261120   ;;  %s2638_s11 = smov 96   ;;  %vm281_vm2 = vcmask 130048   ;;  %vm377_vm3 = vcmask 64512   ;;  %s2639_s1 = smov 80  }
  0xd8   :  { %2069 = vmatprep.subr.bf16.mxu1 %v2636_v0  ;;  %2071 = vmatprep.mubr.msk.bf16.mxu1 %vm2637_vm0, %v2636_v0  ;;  %vm407_vm4 = vcmask 1043456   ;;  %s2640_s22 = smov 112   ;;  %s2641_s19 = smov 48   ;;  %vm1920_vm5 = vcmask 257024  }
  0xd9   :  { %2062 = vmatpush3.bf16.msra.mxu0 %v2252_v1  ;;  %s2642_s7 = smov [#allocation22]  }
  0xda   :  { %2063 = vmatprep.subr.bf16.mxu0 %v2636_v0  ;;  %s1928_s18 = sshll.u32 %s2642_s7, 4  ;;  %s1929_s18 = int_to_ptr.vmem [resolvable:$true] %s1928_s18 }
  0xdb   :  { %s2582_s21 = scalar_lea.vmem %s1929_s18, 128  ;;  %p2587_p13 = scmp.lt.s32.totalorder %s1929_s18, %s1929_s18 }
  0xdc   :  { %p2583_p12 = scmp.ne.s32.totalorder %s1929_s18, %s2582_s21  ;;  %p2588_p0 = scmp.lt.s32.totalorder %s2582_s21, %s2582_s21 }
  0xdd   :  { %2064 = vmatpush3.bf16.msra.mxu0 %v2253_v2 }
  0xde   :  { %2075 = vmatprep.subr.bf16.mxu0 %v2636_v0  ;;  %p2589_p1 = por %p2588_p0, %p2587_p13 }
  0xe0   :  { %2066 = vmatmul.mubr.msk.bf16.vlgmr.msra.gmra.mrb[0].mxu0 %vm227_vm1, %v2936_v3  ;;  %p2590_p2 = pnand %p2589_p1, %p2583_p12 }
  0xe1   :  { %2077 = vmatprep.mubr.msk.bf16.mxu0 %vm2637_vm0, %v2636_v0 }
 0x1b3   :  { %v265_v4 = vpop.f32.mrb[0].mxu0 }
 0x1b4   :  { %v2944_v5 = vpack.c.bf16 %v265_v4, %v265_v4  ;;  %v2067_v6 = vpop.f32.mrb[1].mxu0 }
 0x1b5   :  { %v268_v7 = vpop.f32.mrb[2].mxu0 }
 0x1b6   :  { %279 = vrot.lane.b32.xlu0 %v2944_v5, %s2638_s11  ;;  %v2068_v8 = vpop.f32.mrb[3].mxu0  ;;  %v2948_v9 = vpack.c.bf16 %v268_v7, %v268_v7 }
 0x1ba   :  { %329 = vrot.lane.b32.xlu0 %v2948_v9, %s2638_s11 }
 0x228   :  { %v280_v10 = vpop.permute.xlu0 %279 }
 0x229   :  { %v286_v11 = vsel %vm281_vm2, %v280_v10, 0 }
 0x22a   :  { %2070 = vmatpush3.bf16.xpose.msra.mxu1 %v286_v11 }
 0x22b   :  { %2081 = vmatprep.subr.bf16.mxu1 %v2636_v0 }
 0x22c   :  { %v330_v12 = vpop.permute.xlu0 %329 }
 0x22d   :  { %v335_v13 = vsel %vm281_vm2, %v330_v12, 0 }
 0x22e   :  { %2076 = vmatpush3.bf16.xpose.msra.mxu0 %v335_v13 }
 0x22f   :  { %2087 = vmatprep.subr.bf16.mxu0 %v2636_v0 }
 0x231   :  { %2072 = vmatmul.mubr.msk.bf16.vlgmr.msra.gmra.mrb[0].mxu1 %vm281_vm2, %v2944_v5 }
 0x232   :  { %2083 = vmatprep.mubr.msk.bf16.mxu1 %vm2637_vm0, %v2636_v0 }
 0x235   :  { %2078 = vmatmul.mubr.msk.bf16.vlgmr.msra.gmra.mrb[4].mxu0 %vm281_vm2, %v2948_v9 }
 0x236   :  { %2089 = vmatprep.mubr.msk.bf16.mxu0 %vm2637_vm0, %v2636_v0 }
 0x304   :  { %v322_v14 = vpop.f32.mrb[0].mxu1 }
 0x305   :  { %v2073_v15 = vpop.f32.mrb[1].mxu1  ;;  %v378_v16 = vsel %vm377_vm3, %v322_v14, -inf }
 0x306   :  { %379 = vmax.xlane.f32.xlu1 %v378_v16  ;;  %v325_v17 = vpop.f32.mrb[2].mxu1 }
 0x307   :  { %v2074_v18 = vpop.f32.mrb[3].mxu1 }
 0x308   :  { %v371_v19 = vpop.f32.mrb[4].mxu0 }
 0x309   :  { %v2079_v20 = vpop.f32.mrb[5].mxu0  ;;  %v381_v21 = vsel %vm377_vm3, %v371_v19, -inf }
 0x30a   :  { %382 = vmax.xlane.f32.xlu1 %v381_v21  ;;  %v374_v22 = vpop.f32.mrb[6].mxu0 }
 0x30b   :  { %v2080_v23 = vpop.f32.mrb[7].mxu0 }
 0x31b   :  { %402 = vrot.lane.b32.xlu1 %v2944_v5, %s2622_s15 }
 0x31f   :  { %451 = vrot.lane.b32.xlu1 %v2948_v9, %s2622_s15 }
 0x323   :  { %502 = vrot.lane.b32.xlu1 %v2944_v5, %s2639_s1 }
 0x393   :  { %v380_v24 = vpop.xlane.xlu1 %379 }
 0x394   :  { %v384_v25 = vsub.f32 %v322_v14, %v380_v24 }
 0x396   :  { %v386_v26 = vmul.f32 1.442695, %v384_v25 }
 0x397   :  { %v383_v27 = vpop.xlane.xlu1 %382 }
 0x398   :  { %2270 = vpow2.f32 %v386_v26  ;;  %v385_v28 = vsub.f32 %v371_v19, %v383_v27 }
 0x39a   :  { %v388_v29 = vmul.f32 1.442695, %v385_v28 }
 0x39b   :  { %v403_v30 = vpop.permute.xlu1 %402 }
 0x39c   :  { %2272 = vpow2.f32 %v388_v29  ;;  %v409_v31 = vsel %vm407_vm4, %v403_v30, 0 }
 0x39d   :  { %2082 = vmatpush3.bf16.msra.mxu1 %v409_v31  ;;  %v2255_v31 = vld [vmem:[#allocation7] sm:$0xff]  }
 0x39e   :  { %2093 = vmatprep.subr.bf16.mxu1 %v2636_v0 }
 0x39f   :  { %v452_v32 = vpop.permute.xlu1 %451 }
 0x3a0   :  { %v457_v33 = vsel %vm407_vm4, %v452_v32, 0  ;;  %v2256_v32 = vld [vmem:[#allocation7 + $0x8] sm:$0xff]  }
 0x3a1   :  { %2088 = vmatpush3.bf16.msra.mxu0 %v457_v33 }
 0x3a2   :  { %v2271_v34 = vpop.eup %2270  ;;  %2099 = vmatprep.subr.bf16.mxu0 %v2636_v0 }
 0x3a3   :  { %v390_v35 = vsel %vm377_vm3, %v2271_v34, 0.0  ;;  %v503_v38 = vpop.permute.xlu1 %502 }
 0x3a4   :  { %391 = vadd.xlane.f32.xlu0 %v390_v35  ;;  %v508_v45 = vsel %vm281_vm2, %v503_v38, 0 }
 0x3a6   :  { %v2273_v36 = vpop.eup %2272 }
 0x3a7   :  { %v393_v37 = vsel %vm377_vm3, %v2273_v36, 0.0 }
 0x3a8   :  { %394 = vadd.xlane.f32.xlu1 %v393_v37 }
 0x3b9   :  { %552 = vrot.lane.b32.xlu1 %v2948_v9, %s2639_s1 }
 0x3ba   :  { %500 = vrot.lane.b32.xlu0 %v2944_v5, %s2640_s22 }
 0x3bd   :  { %550 = vrot.lane.b32.xlu1 %v2948_v9, %s2640_s22 }
 0x431   :  { %v392_v39 = vpop.xlane.xlu0 %391 }
 0x432   :  { %2274 = vrcp.f32 %v392_v39 }
 0x435   :  { %v395_v40 = vpop.xlane.xlu1 %394  ;;  %v501_v50 = vpop.permute.xlu0 %500 }
 0x436   :  { %2276 = vrcp.f32 %v395_v40 }
 0x439   :  { %v553_v47 = vpop.permute.xlu1 %552 }
 0x43a   :  { %v558_v49 = vsel %vm281_vm2, %v553_v47, 0  ;;  %v1962_v47 = vld [vmem:[#allocation8] ss:$0 sm:$0xff] }
 0x43c   :  { %v2275_v41 = vpop.eup %2274 }
 0x43d   :  { %v398_v42 = vmul.f32 %v2275_v41, %v2271_v34  ;;  %v551_v51 = vpop.permute.xlu1 %550 }
 0x43f   :  { %v400_v43 = vpack.c.bf16 %v398_v42, %v398_v42 }
 0x440   :  { %v2277_v44 = vpop.eup %2276 }
 0x441   :  { %v399_v46 = vmul.f32 %v2277_v44, %v2273_v36  ;;  %2084 = vmatmul.mubr.msk.bf16.vlgmr.msra.gmra.mrb[4].mxu1 %vm377_vm3, %v400_v43 }
 0x442   :  { %2094 = vmatpush3.bf16.xpose.msra.mxu1 %v508_v45  ;;  %2095 = vmatprep.mubr.msk.bf16.mxu1 %vm2637_vm0, %v2636_v0 }
 0x443   :  { %v401_v48 = vpack.c.bf16 %v399_v46, %v399_v46  ;;  %2105 = vmatprep.subr.bf16.mxu1 %v2636_v0 }
 0x445   :  { %2090 = vmatmul.mubr.msk.bf16.vlgmr.msra.gmra.mrb[8].mxu0 %vm377_vm3, %v401_v48 }
 0x446   :  { %2100 = vmatpush3.bf16.xpose.msra.mxu0 %v558_v49  ;;  %2101 = vmatprep.mubr.msk.bf16.mxu0 %vm2637_vm0, %v2636_v0 }
 0x447   :  { %2111 = vmatprep.subr.bf16.mxu0 %v2636_v0 }
 0x449   :  { %2096 = vmatmul.mubr.msk.bf16.vlgmr.msra.gmra.mrb[8].mxu1 %vm281_vm2, %v501_v50  ;;  %v208_v50 = vunpack.c.l.bf16 %v2936_v3 }
 0x44a   :  { %2107 = vmatprep.mubr.msk.bf16.mxu1 %vm2637_vm0, %v2636_v0 }
 0x44d   :  { %2102 = vmatmul.mubr.msk.bf16.vlgmr.msra.gmra.mrb[12].mxu0 %vm281_vm2, %v551_v51 }
 0x44e   :  { %2113 = vmatprep.mubr.msk.bf16.mxu0 %vm2637_vm0, %v2636_v0 }
 0x514   :  { %v3000_v52 = vpop.f32.mrb[4].mxu1 }
 0x515   :  { %v2085_v53 = vpop.f32.mrb[5].mxu1 }
 0x516   :  { %v448_v54 = vpop.f32.mrb[6].mxu1 }
 0x517   :  { %v2086_v55 = vpop.f32.mrb[7].mxu1 }
 0x518   :  { %v493_v56 = vpop.f32.mrb[8].mxu0  ;;  %v209_v55 = vunpack.c.h.bf16 %v2936_v3 }
 0x519   :  { %v499_v57 = vpack.c.bf16 %v493_v56, %v3000_v52  ;;  %v2091_v58 = vpop.f32.mrb[9].mxu0 }
 0x51a   :  { %v496_v59 = vpop.f32.mrb[10].mxu0 }
 0x51b   :  { %v2092_v60 = vpop.f32.mrb[11].mxu0 }
 0x51c   :  { %v544_v61 = vpop.f32.mrb[8].mxu1 }
 0x51d   :  { %v2097_v62 = vpop.f32.mrb[9].mxu1  ;;  %v600_v63 = vsel %vm377_vm3, %v544_v61, -inf }
 0x51e   :  { %601 = vmax.xlane.f32.xlu1 %v600_v63  ;;  %v547_v1 = vpop.f32.mrb[10].mxu1 }
 0x51f   :  { %v2098_v2 = vpop.f32.mrb[11].mxu1 }
 0x520   :  { %v594_v4 = vpop.f32.mrb[12].mxu0 }
 0x521   :  { %v2103_v6 = vpop.f32.mrb[13].mxu0  ;;  %v603_v7 = vsel %vm377_vm3, %v594_v4, -inf }
 0x522   :  { %604 = vmax.xlane.f32.xlu0 %v603_v7  ;;  %v597_v8 = vpop.f32.mrb[14].mxu0 }
 0x523   :  { %v2104_v10 = vpop.f32.mrb[15].mxu0 }
 0x524   :  { %v2257_v10 = vld [vmem:[#allocation10] sm:$0xff]  }
 0x538   :  { %672 = vrot.lane.b32.xlu0 %v2948_v9, %s2641_s19 }
 0x5ab   :  { %v602_v11 = vpop.xlane.xlu1 %601 }
 0x5ac   :  { %v606_v12 = vsub.f32 %v544_v61, %v602_v11  ;;  %v2258_v11 = vld [vmem:[#allocation10 + $0x8] sm:$0xff]  }
 0x5ae   :  { %v608_v13 = vmul.f32 1.442695, %v606_v12 }
 0x5af   :  { %v605_v14 = vpop.xlane.xlu0 %604 }
 0x5b0   :  { %2278 = vpow2.f32 %v608_v13  ;;  %v607_v15 = vsub.f32 %v594_v4, %v605_v14 }
 0x5b2   :  { %v610_v16 = vmul.f32 1.442695, %v607_v15 }
 0x5b3   :  { %v673_v17 = vpop.permute.xlu0 %672 }
 0x5b4   :  { %2280 = vpow2.f32 %v610_v16  ;;  %v678_v18 = vsel %vm407_vm4, %v673_v17, 0 }
 0x5b5   :  { %2112 = vmatpush3.bf16.msra.mxu0 %v678_v18 }
 0x5b6   :  { %2123 = vmatprep.subr.bf16.mxu0 %v2636_v0 }
 0x5ba   :  { %v2279_v19 = vpop.eup %2278 }
 0x5bb   :  { %v612_v20 = vsel %vm377_vm3, %v2279_v19, 0.0 }
 0x5bc   :  { %613 = vadd.xlane.f32.xlu1 %v612_v20 }
 0x5be   :  { %v2281_v21 = vpop.eup %2280 }
 0x5bf   :  { %v615_v9 = vsel %vm377_vm3, %v2281_v21, 0.0 }
 0x5c0   :  { %616 = vadd.xlane.f32.xlu1 %v615_v9 }
 0x5d1   :  { %624 = vrot.lane.b32.xlu1 %v2944_v5, %s2641_s19 }
 0x649   :  { %v614_v22 = vpop.xlane.xlu1 %613 }
 0x64a   :  { %2282 = vrcp.f32 %v614_v22 }
 0x64d   :  { %v617_v23 = vpop.xlane.xlu1 %616 }
 0x64e   :  { %2284 = vrcp.f32 %v617_v23  ;;  %v1964_v23 = vld [vmem:[#allocation17] ss:$0 sm:$0xff] }
 0x651   :  { %v625_v24 = vpop.permute.xlu1 %624 }
 0x652   :  { %v630_v25 = vsel %vm407_vm4, %v625_v24, 0 }
 0x653   :  { %2106 = vmatpush3.bf16.msra.mxu1 %v630_v25 }
 0x654   :  { %v2283_v26 = vpop.eup %2282  ;;  %2117 = vmatprep.subr.bf16.mxu1 %v2636_v0 }
 0x655   :  { %v620_v27 = vmul.f32 %v2283_v26, %v2279_v19  ;;  %v1963_v19 = vld [vmem:[#allocation16] ss:$0 sm:$0xff] }
 0x657   :  { %v622_v28 = vpack.c.bf16 %v620_v27, %v620_v27 }
 0x658   :  { %v2285_v29 = vpop.eup %2284 }
 0x659   :  { %v621_v30 = vmul.f32 %v2285_v29, %v2281_v21  ;;  %2108 = vmatmul.mubr.msk.bf16.vlgmr.msra.gmra.mrb[12].mxu1 %vm377_vm3, %v622_v28  ;;  %v2259_v28 = vld [vmem:[#allocation13] sm:$0xff]   ;;  %v2260_v29 = vld [vmem:[#allocation13 + $0x8] sm:$0xff]  }
 0x65a   :  { %2119 = vmatprep.mubr.msk.bf16.mxu1 %vm2637_vm0, %v2636_v0  ;;  %2118 = vmatpush3.bf16.msra.mxu1 %v2256_v32 }
 0x65b   :  { %v623_v5 = vpack.c.bf16 %v621_v30, %v621_v30  ;;  %2129 = vmatprep.subr.bf16.mxu1 %v2636_v0  ;;  %v1965_v30 = vld [vmem:[#allocation11] ss:$0 sm:$0xff] }
 0x65d   :  { %2114 = vmatmul.mubr.msk.bf16.vlgmr.msra.gmra.mrb[16].mxu0 %vm377_vm3, %v623_v5 }
 0x65e   :  { %2124 = vmatpush3.bf16.msra.mxu0 %v2255_v31  ;;  %2125 = vmatprep.mubr.msk.bf16.mxu0 %vm2637_vm0, %v2636_v0 }
 0x65f   :  { %2137 = vmatprep.subr.bf16.mxu0 %v2636_v0 }
 0x665   :  { %2126 = vmatmul.mubr.msk.bf16.vlgmr.msra.gmra.mrb[20].mxu0 %vm281_vm2, %v499_v57 }
 0x666   :  { %2141 = vmatprep.mubr.msk.bf16.mxu0 %vm2637_vm0, %v2636_v0  ;;  %2138 = vmatpush3.bf16.msra.mxu0 %v2259_v28 }
 0x667   :  { %2139 = vmatprep.subr.bf16.mxu0 %v2636_v0 }
 0x66a   :  { %2140 = vmatpush3.bf16.msra.mxu0 %v2260_v29 }
 0x66b   :  { %2153 = vmatprep.subr.bf16.mxu0 %v2636_v0 }
 0x72c   :  { %v666_v33 = vpop.f32.mrb[12].mxu1 }
 0x72d   :  { %v2109_v34 = vpop.f32.mrb[13].mxu1 }
 0x72e   :  { %v669_v35 = vpop.f32.mrb[14].mxu1 }
 0x72f   :  { %v2110_v36 = vpop.f32.mrb[15].mxu1 }
 0x730   :  { %v714_v37 = vpop.f32.mrb[16].mxu0 }
 0x731   :  { %v720_v38 = vpack.c.bf16 %v714_v37, %v666_v33  ;;  %v2115_v39 = vpop.f32.mrb[17].mxu0 }
 0x732   :  { %v717_v40 = vpop.f32.mrb[18].mxu0  ;;  %v1969_v39 = vld [vmem:[#allocation14] ss:$0 sm:$0xff] }
 0x733   :  { %v2116_v41 = vpop.f32.mrb[19].mxu0  ;;  %2120 = vmatmul.mubr.msk.bf16.vlgmr.msra.gmra.mrb[16].mxu1 %vm281_vm2, %v720_v38 }
 0x734   :  { %2133 = vmatprep.mubr.msk.bf16.mxu1 %vm2637_vm0, %v2636_v0  ;;  %2130 = vmatpush3.bf16.msra.mxu1 %v2257_v10 }
 0x735   :  { %2131 = vmatprep.subr.bf16.mxu1 %v2636_v0 }
 0x738   :  { %v814_v42 = vpop.f32.mrb[20].mxu0  ;;  %2132 = vmatpush3.bf16.msra.mxu1 %v2258_v11 }
 0x739   :  { %v2127_v43 = vpop.f32.mrb[21].mxu0  ;;  %2145 = vmatprep.subr.bf16.mxu1 %v2636_v0 }
 0x73a   :  { %v817_v44 = vpop.f32.mrb[22].mxu0 }
 0x73b   :  { %v2128_v45 = vpop.f32.mrb[23].mxu0 }
 0x806   :  { %v764_v46 = vpop.f32.mrb[16].mxu1 }
 0x807   :  { %v815_v48 = vadd.f32 %v814_v42, %v764_v46  ;;  %v2121_v49 = vpop.f32.mrb[17].mxu1 }
 0x808   :  { %v767_v51 = vpop.f32.mrb[18].mxu1 }
 0x809   :  { %v828_v52 = vadd.f32 %v1962_v47, %v815_v48  ;;  %v818_v53 = vadd.f32 %v817_v44, %v767_v51  ;;  %v2122_v54 = vpop.f32.mrb[19].mxu1 }
 0x80b   :  { %v829_v56 = vadd.f32 %v1962_v47, %v818_v53  ;;  %v830_v57 = vadd.f32 %v828_v52, %v208_v50 }
 0x80d   :  { %v834_v58 = vsel %vm227_vm1, %v830_v57, 0.0  ;;  %v831_v59 = vadd.f32 %v829_v56, %v209_v55 }
 0x80e   :  { %835 = vadd.xlane.f32.xlu1 %v834_v58 }
 0x80f   :  { %v837_v60 = vsel %vm227_vm1, %v831_v59, 0.0 }
 0x810   :  { %838 = vadd.xlane.f32.xlu0 %v837_v60  ;;  %v2261_v60 = vld [vmem:[#allocation5 + $0x10] sm:$0xff]  }
 0x89b   :  { %v836_v61 = vpop.xlane.xlu1 %835 }
 0x89c   :  { %v841_v62 = vmul.f32 0.03125, %v836_v61  ;;  %v2262_v61 = vld [vmem:[#allocation5 + $0x18] sm:$0xff]  }
 0x89d   :  { %v839_v63 = vpop.xlane.xlu0 %838 }
 0x89e   :  { %v843_v1 = vsub.f32 %v830_v57, %v841_v62  ;;  %v842_v2 = vmul.f32 0.03125, %v839_v63 }
 0x8a0   :  { %v844_v4 = vsub.f32 %v831_v59, %v842_v2  ;;  %v845_v6 = vmul.f32 %v843_v1, %v843_v1 }
 0x8a2   :  { %v847_v7 = vsel %vm227_vm1, %v845_v6, 0.0  ;;  %v846_v8 = vmul.f32 %v844_v4, %v844_v4 }
 0x8a3   :  { %848 = vadd.xlane.f32.xlu1 %v847_v7 }
 0x8a4   :  { %v850_v3 = vsel %vm227_vm1, %v846_v8, 0.0  ;;  %v1973_v8 = vld [vmem:[#allocation19] ss:$0 sm:$0xff] }
 0x8a5   :  { %851 = vadd.xlane.f32.xlu0 %v850_v3 }
 0x930   :  { %v849_v12 = vpop.xlane.xlu1 %848 }
 0x931   :  { %v853_v13 = vmul.f32 0.03125, %v849_v12 }
 0x932   :  { %v852_v14 = vpop.xlane.xlu0 %851 }
 0x933   :  { %v855_v15 = vadd.f32 1e-05, %v853_v13  ;;  %v854_v16 = vmul.f32 0.03125, %v852_v14  ;;  %v1974_v13 = vld [vmem:[#allocation20] ss:$0 sm:$0xff] }
 0x935   :  { %2286 = vrsqrt.f32 %v855_v15  ;;  %v856_v17 = vadd.f32 1e-05, %v854_v16 }
 0x937   :  { %2288 = vrsqrt.f32 %v856_v17 }
 0x93f   :  { %v2287_v18 = vpop.eup %2286 }
 0x940   :  { %v859_v20 = vmul.f32 %v2287_v18, %v843_v1 }
 0x941   :  { %v2289_v21 = vpop.eup %2288 }
 0x942   :  { %v867_v9 = vmul.f32 %v1963_v19, %v859_v20  ;;  %v860_v22 = vmul.f32 %v2289_v21, %v844_v4 }
 0x944   :  { %v868_v24 = vmul.f32 %v1963_v19, %v860_v22  ;;  %v875_v25 = vadd.f32 %v1964_v23, %v867_v9 }
 0x946   :  { %v876_v26 = vadd.f32 %v1964_v23, %v868_v24 }
 0x948   :  { %v881_v27 = vpack.c.bf16 %v876_v26, %v875_v25 }
 0x94a   :  { %2134 = vmatmul.mubr.msk.bf16.vlgmr.msra.gmra.mrb[20].mxu1 %vm227_vm1, %v881_v27 }
 0x94b   :  { %2149 = vmatprep.mubr.msk.bf16.mxu1 %vm2637_vm0, %v2636_v0  ;;  %2146 = vmatpush3.bf16.msra.mxu1 %v2261_v60 }
 0x94c   :  { %2147 = vmatprep.subr.bf16.mxu1 %v2636_v0 }
 0x94f   :  { %2148 = vmatpush3.bf16.msra.mxu1 %v2262_v61 }
 0x950   :  { %2159 = vmatprep.subr.bf16.mxu1 %v2636_v0 }
 0xa1d   :  { %v938_v31 = vpop.f32.mrb[20].mxu1 }
 0xa1e   :  { %v939_v5 = vadd.f32 %v1965_v30, %v938_v31  ;;  %v2135_v32 = vpop.f32.mrb[21].mxu1 }
 0xa1f   :  { %v941_v33 = vpop.f32.mrb[22].mxu1 }
 0xa20   :  { %v942_v34 = vadd.f32 %v1965_v30, %v941_v33  ;;  %v2136_v35 = vpop.f32.mrb[23].mxu1  ;;  %v945_v36 = vmax.f32 %v939_v5, 0.0 }
 0xa22   :  { %v946_v37 = vmax.f32 %v942_v34, 0.0 }
 0xa24   :  { %v951_v38 = vpack.c.bf16 %v946_v37, %v945_v36 }
 0xa26   :  { %2142 = vmatmul.mubr.msk.bf16.vlgmr.msra.gmra.mrb[24].mxu0 %vm227_vm1, %v951_v38 }
 0xa27   :  { %2155 = vmatprep.mubr.msk.bf16.mxu0 %vm2637_vm0, %v2636_v0 }
 0xaf9   :  { %v1008_v40 = vpop.f32.mrb[24].mxu0 }
 0xafa   :  { %v1009_v41 = vadd.f32 %v1969_v39, %v1008_v40  ;;  %v2143_v42 = vpop.f32.mrb[25].mxu0 }
 0xafb   :  { %v1011_v43 = vpop.f32.mrb[26].mxu0 }
 0xafc   :  { %v1012_v44 = vadd.f32 %v1969_v39, %v1011_v43  ;;  %v2144_v45 = vpop.f32.mrb[27].mxu0  ;;  %v1015_v46 = vadd.f32 %v1009_v41, %v875_v25 }
 0xafe   :  { %v1019_v47 = vsel %vm227_vm1, %v1015_v46, 0.0  ;;  %v1016_v48 = vadd.f32 %v1012_v44, %v876_v26 }
 0xaff   :  { %1020 = vadd.xlane.f32.xlu1 %v1019_v47 }
 0xb00   :  { %v1022_v49 = vsel %vm227_vm1, %v1016_v48, 0.0 }
 0xb01   :  { %1023 = vadd.xlane.f32.xlu0 %v1022_v49 }
 0xb8c   :  { %v1021_v50 = vpop.xlane.xlu1 %1020 }
 0xb8d   :  { %v1025_v51 = vmul.f32 0.03125, %v1021_v50 }
 0xb8e   :  { %v1024_v52 = vpop.xlane.xlu0 %1023 }
 0xb8f   :  { %v1027_v53 = vsub.f32 %v1015_v46, %v1025_v51  ;;  %v1026_v54 = vmul.f32 0.03125, %v1024_v52 }
 0xb91   :  { %v1028_v55 = vsub.f32 %v1016_v48, %v1026_v54  ;;  %v1029_v56 = vmul.f32 %v1027_v53, %v1027_v53 }
 0xb93   :  { %v1031_v57 = vsel %vm227_vm1, %v1029_v56, 0.0  ;;  %v1030_v58 = vmul.f32 %v1028_v55, %v1028_v55 }
 0xb94   :  { %1032 = vadd.xlane.f32.xlu1 %v1031_v57 }
 0xb95   :  { %v1034_v59 = vsel %vm227_vm1, %v1030_v58, 0.0 }
 0xb96   :  { %1035 = vadd.xlane.f32.xlu0 %v1034_v59 }
 0xc21   :  { %v1033_v62 = vpop.xlane.xlu1 %1032 }
 0xc22   :  { %v1037_v63 = vmul.f32 0.03125, %v1033_v62 }
 0xc23   :  { %v1036_v1 = vpop.xlane.xlu0 %1035 }
 0xc24   :  { %v1039_v2 = vadd.f32 1e-05, %v1037_v63  ;;  %v1038_v4 = vmul.f32 0.03125, %v1036_v1 }
 0xc26   :  { %2290 = vrsqrt.f32 %v1039_v2  ;;  %v1040_v6 = vadd.f32 1e-05, %v1038_v4 }
 0xc28   :  { %2292 = vrsqrt.f32 %v1040_v6 }
 0xc30   :  { %v2291_v7 = vpop.eup %2290 }
 0xc31   :  { %v1043_v3 = vmul.f32 %v2291_v7, %v1027_v53 }
 0xc32   :  { %v2293_v10 = vpop.eup %2292 }
 0xc33   :  { %v1051_v11 = vmul.f32 %v1973_v8, %v1043_v3  ;;  %v1044_v12 = vmul.f32 %v2293_v10, %v1028_v55 }
 0xc35   :  { %v1052_v14 = vmul.f32 %v1973_v8, %v1044_v12  ;;  %v3051_v15 = vadd.f32 %v1974_v13, %v1051_v11 }
 0xc37   :  { %v3053_v16 = vadd.f32 %v1974_v13, %v1052_v14 }
 0xc39   :  { %v1066_v17 = vpack.c.bf16 %v3053_v16, %v3051_v15 }
 0xc3b   :  { %2150 = vmatmul.mubr.msk.bf16.vlgmr.msra.gmra.mrb[24].mxu1 %vm227_vm1, %v1066_v17 }
 0xc3c   :  { %2161 = vmatprep.mubr.msk.bf16.mxu1 %vm2637_vm0, %v2636_v0 }
 0xd0e   :  { %v1116_v18 = vpop.f32.mrb[24].mxu1 }
 0xd0f   :  { %v3060_v19 = vpack.c.bf16 %v1116_v18, %v1116_v18  ;;  %v2151_v20 = vpop.f32.mrb[25].mxu1 }
 0xd10   :  { %v1119_v21 = vpop.f32.mrb[26].mxu1 }
 0xd11   :  { %v3062_v9 = vpack.c.bf16 %v1119_v21, %v1119_v21  ;;  %1131 = vrot.lane.b32.xlu1 %v3060_v19, %s2638_s11  ;;  %v2152_v22 = vpop.f32.mrb[27].mxu1 }
 0xd13   :  { %1180 = vrot.lane.b32.xlu0 %v3062_v9, %s2638_s11 }
 0xd83   :  { %v1132_v23 = vpop.permute.xlu1 %1131 }
 0xd84   :  { %v1137_v24 = vsel %vm281_vm2, %v1132_v23, 0 }
 0xd85   :  { %2154 = vmatpush3.bf16.xpose.msra.mxu0 %v1137_v24  ;;  %v1181_v25 = vpop.permute.xlu0 %1180 }
 0xd86   :  { %v1186_v26 = vsel %vm281_vm2, %v1181_v25, 0  ;;  %2165 = vmatprep.subr.bf16.mxu0 %v2636_v0 }
 0xd87   :  { %2160 = vmatpush3.bf16.xpose.msra.mxu1 %v1186_v26 }
 0xd88   :  { %2171 = vmatprep.subr.bf16.mxu1 %v2636_v0 }
 0xd8c   :  { %2156 = vmatmul.mubr.msk.bf16.vlgmr.msra.gmra.mrb[28].mxu0 %vm281_vm2, %v3060_v19 }
 0xd8d   :  { %2167 = vmatprep.mubr.msk.bf16.mxu0 %vm2637_vm0, %v2636_v0 }
 0xd8e   :  { %2162 = vmatmul.mubr.msk.bf16.vlgmr.msra.gmra.mrb[28].mxu1 %vm281_vm2, %v3062_v9 }
 0xd8f   :  { %2173 = vmatprep.mubr.msk.bf16.mxu1 %vm2637_vm0, %v2636_v0 }
 0xe5f   :  { %v1173_v27 = vpop.f32.mrb[28].mxu0 }
 0xe60   :  { %v2157_v28 = vpop.f32.mrb[29].mxu0  ;;  %v1228_v29 = vsel %vm377_vm3, %v1173_v27, -inf }
 0xe61   :  { %1229 = vmax.xlane.f32.xlu1 %v1228_v29  ;;  %v1176_v30 = vpop.f32.mrb[30].mxu0  ;;  %v1222_v31 = vpop.f32.mrb[28].mxu1 }
 0xe62   :  { %v2158_v5 = vpop.f32.mrb[31].mxu0  ;;  %v2163_v32 = vpop.f32.mrb[29].mxu1  ;;  %v1231_v33 = vsel %vm377_vm3, %v1222_v31, -inf }
 0xe63   :  { %1232 = vmax.xlane.f32.xlu0 %v1231_v33  ;;  %v1225_v34 = vpop.f32.mrb[30].mxu1 }
 0xe64   :  { %v2164_v35 = vpop.f32.mrb[31].mxu1 }
 0xe72   :  { %1252 = vrot.lane.b32.xlu1 %v3060_v19, %s2622_s15 }
 0xeee   :  { %v1230_v36 = vpop.xlane.xlu1 %1229 }
 0xeef   :  { %v1234_v37 = vsub.f32 %v1173_v27, %v1230_v36 }
 0xef0   :  { %v1233_v38 = vpop.xlane.xlu0 %1232 }
 0xef1   :  { %v1236_v39 = vmul.f32 1.442695, %v1234_v37  ;;  %v1235_v40 = vsub.f32 %v1222_v31, %v1233_v38 }
 0xef2   :  { %v1253_v41 = vpop.permute.xlu1 %1252 }
 0xef3   :  { %2294 = vpow2.f32 %v1236_v39  ;;  %v1238_v42 = vmul.f32 1.442695, %v1235_v40  ;;  %v1258_v43 = vsel %vm407_vm4, %v1253_v41, 0 }
 0xef4   :  { %2166 = vmatpush3.bf16.msra.mxu0 %v1258_v43 }
 0xef5   :  { %2296 = vpow2.f32 %v1238_v42  ;;  %2177 = vmatprep.subr.bf16.mxu0 %v2636_v0 }
 0xefd   :  { %v2295_v44 = vpop.eup %2294 }
 0xefe   :  { %v1240_v45 = vsel %vm377_vm3, %v2295_v44, 0.0 }
 0xeff   :  { %v2297_v46 = vpop.eup %2296  ;;  %1241 = vadd.xlane.f32.xlu1 %v1240_v45  ;;  %v2264_v45 = vld [vmem:[#allocation7 + $0x18] sm:$0xff]  }
 0xf00   :  { %v1243_v47 = vsel %vm377_vm3, %v2297_v46, 0.0 }
 0xf01   :  { %1244 = vadd.xlane.f32.xlu0 %v1243_v47 }
 0xf10   :  { %1351 = vrot.lane.b32.xlu1 %v3060_v19, %s2639_s1 }
 0xf14   :  { %1401 = vrot.lane.b32.xlu1 %v3062_v9, %s2639_s1 }
 0xf17   :  { %1300 = vrot.lane.b32.xlu0 %v3062_v9, %s2622_s15 }
 0xf18   :  { %1399 = vrot.lane.b32.xlu1 %v3062_v9, %s2640_s22 }
 0xf1b   :  { %1349 = vrot.lane.b32.xlu0 %v3060_v19, %s2640_s22 }
 0xf8c   :  { %v1242_v48 = vpop.xlane.xlu1 %1241 }
 0xf8d   :  { %2298 = vrcp.f32 %v1242_v48 }
 0xf8e   :  { %v1245_v49 = vpop.xlane.xlu0 %1244 }
 0xf8f   :  { %2300 = vrcp.f32 %v1245_v49 }
 0xf90   :  { %v1352_v52 = vpop.permute.xlu1 %1351 }
 0xf91   :  { %v1357_v59 = vsel %vm281_vm2, %v1352_v52, 0 }
 0xf92   :  { %v1301_v50 = vpop.permute.xlu0 %1300 }
 0xf93   :  { %v1306_v51 = vsel %vm407_vm4, %v1301_v50, 0 }
 0xf94   :  { %2172 = vmatpush3.bf16.msra.mxu1 %v1306_v51  ;;  %v1402_v58 = vpop.permute.xlu1 %1401 }
 0xf95   :  { %2183 = vmatprep.subr.bf16.mxu1 %v2636_v0  ;;  %v1407_v61 = vsel %vm281_vm2, %v1402_v58, 0 }
 0xf96   :  { %v1350_v62 = vpop.permute.xlu0 %1349 }
 0xf97   :  { %v2299_v53 = vpop.eup %2298 }
 0xf98   :  { %v1248_v54 = vmul.f32 %v2299_v53, %v2295_v44  ;;  %v1400_v63 = vpop.permute.xlu1 %1399  ;;  %v2263_v44 = vld [vmem:[#allocation7 + $0x10] sm:$0xff]  }
 0xf99   :  { %v2301_v55 = vpop.eup %2300 }
 0xf9a   :  { %v1249_v56 = vmul.f32 %v2301_v55, %v2297_v46  ;;  %v1250_v57 = vpack.c.bf16 %v1248_v54, %v1248_v54 }
 0xf9c   :  { %2168 = vmatmul.mubr.msk.bf16.vlgmr.msra.gmra.mrb[32].mxu0 %vm377_vm3, %v1250_v57  ;;  %v1251_v60 = vpack.c.bf16 %v1249_v56, %v1249_v56 }
 0xf9d   :  { %2178 = vmatpush3.bf16.xpose.msra.mxu0 %v1357_v59  ;;  %2179 = vmatprep.mubr.msk.bf16.mxu0 %vm2637_vm0, %v2636_v0 }
 0xf9e   :  { %2174 = vmatmul.mubr.msk.bf16.vlgmr.msra.gmra.mrb[32].mxu1 %vm377_vm3, %v1251_v60  ;;  %2189 = vmatprep.subr.bf16.mxu0 %v2636_v0  ;;  %v1990_v60 = vld [vmem:[#allocation8 + $0x1] ss:$0 sm:$0xff] }
 0xf9f   :  { %2184 = vmatpush3.bf16.xpose.msra.mxu1 %v1407_v61  ;;  %2185 = vmatprep.mubr.msk.bf16.mxu1 %vm2637_vm0, %v2636_v0 }
 0xfa0   :  { %2195 = vmatprep.subr.bf16.mxu1 %v2636_v0 }
 0xfa4   :  { %2180 = vmatmul.mubr.msk.bf16.vlgmr.msra.gmra.mrb[36].mxu0 %vm281_vm2, %v1350_v62 }
 0xfa5   :  { %2191 = vmatprep.mubr.msk.bf16.mxu0 %vm2637_vm0, %v2636_v0 }
 0xfa6   :  { %2186 = vmatmul.mubr.msk.bf16.vlgmr.msra.gmra.mrb[36].mxu1 %vm281_vm2, %v1400_v63 }
 0xfa7   :  { %2197 = vmatprep.mubr.msk.bf16.mxu1 %vm2637_vm0, %v2636_v0 }
0x106f   :  { %v3116_v1 = vpop.f32.mrb[32].mxu0 }
0x1070   :  { %v2169_v2 = vpop.f32.mrb[33].mxu0 }
0x1071   :  { %v1297_v4 = vpop.f32.mrb[34].mxu0  ;;  %v1342_v6 = vpop.f32.mrb[32].mxu1 }
0x1072   :  { %v1348_v7 = vpack.c.bf16 %v1342_v6, %v3116_v1  ;;  %v2170_v8 = vpop.f32.mrb[35].mxu0  ;;  %v2175_v3 = vpop.f32.mrb[33].mxu1 }
0x1073   :  { %v1345_v10 = vpop.f32.mrb[34].mxu1 }
0x1074   :  { %v2176_v11 = vpop.f32.mrb[35].mxu1 }
0x1077   :  { %v1393_v12 = vpop.f32.mrb[36].mxu0 }
0x1078   :  { %v2181_v13 = vpop.f32.mrb[37].mxu0  ;;  %v1449_v14 = vsel %vm377_vm3, %v1393_v12, -inf }
0x1079   :  { %1450 = vmax.xlane.f32.xlu0 %v1449_v14  ;;  %v1396_v17 = vpop.f32.mrb[38].mxu0  ;;  %v1443_v18 = vpop.f32.mrb[36].mxu1 }
0x107a   :  { %v2182_v20 = vpop.f32.mrb[39].mxu0  ;;  %v2187_v21 = vpop.f32.mrb[37].mxu1  ;;  %v1452_v22 = vsel %vm377_vm3, %v1443_v18, -inf }
0x107b   :  { %1453 = vmax.xlane.f32.xlu1 %v1452_v22  ;;  %v1446_v23 = vpop.f32.mrb[38].mxu1 }
0x107c   :  { %v2188_v24 = vpop.f32.mrb[39].mxu1  ;;  %v2265_v23 = vld [vmem:[#allocation10 + $0x10] sm:$0xff]  }
0x108c   :  { %1473 = vrot.lane.b32.xlu1 %v3060_v19, %s2641_s19 }
0x1106   :  { %v1451_v25 = vpop.xlane.xlu0 %1450 }
0x1107   :  { %v1455_v26 = vsub.f32 %v1393_v12, %v1451_v25 }
0x1108   :  { %v1454_v27 = vpop.xlane.xlu1 %1453 }
0x1109   :  { %v1457_v28 = vmul.f32 1.442695, %v1455_v26  ;;  %v1456_v29 = vsub.f32 %v1443_v18, %v1454_v27 }
0x110b   :  { %2302 = vpow2.f32 %v1457_v28  ;;  %v1459_v30 = vmul.f32 1.442695, %v1456_v29 }
0x110c   :  { %v1474_v31 = vpop.permute.xlu1 %1473 }
0x110d   :  { %2304 = vpow2.f32 %v1459_v30  ;;  %v1479_v5 = vsel %vm407_vm4, %v1474_v31, 0  ;;  %v1991_v31 = vld [vmem:[#allocation16 + $0x1] ss:$0 sm:$0xff] }
0x110e   :  { %2190 = vmatpush3.bf16.msra.mxu0 %v1479_v5 }
0x110f   :  { %2201 = vmatprep.subr.bf16.mxu0 %v2636_v0 }
0x1115   :  { %v2303_v32 = vpop.eup %2302 }
0x1116   :  { %v1461_v33 = vsel %vm377_vm3, %v2303_v32, 0.0 }
0x1117   :  { %v2305_v34 = vpop.eup %2304  ;;  %1462 = vadd.xlane.f32.xlu0 %v1461_v33 }
0x1118   :  { %v1464_v19 = vsel %vm377_vm3, %v2305_v34, 0.0 }
0x111b   :  { %1465 = vadd.xlane.f32.xlu0 %v1464_v19  ;;  %v1992_v19 = vld [vmem:[#allocation17 + $0x1] ss:$0 sm:$0xff] }
0x1131   :  { %1521 = vrot.lane.b32.xlu0 %v3062_v9, %s2641_s19 }
0x11a4   :  { %v1463_v35 = vpop.xlane.xlu0 %1462 }
0x11a5   :  { %2306 = vrcp.f32 %v1463_v35 }
0x11a8   :  { %v1466_v36 = vpop.xlane.xlu0 %1465 }
0x11a9   :  { %2308 = vrcp.f32 %v1466_v36 }
0x11ac   :  { %v1522_v37 = vpop.permute.xlu0 %1521 }
0x11ad   :  { %v1527_v38 = vsel %vm407_vm4, %v1522_v37, 0 }
0x11ae   :  { %2196 = vmatpush3.bf16.msra.mxu1 %v1527_v38 }
0x11af   :  { %v2307_v39 = vpop.eup %2306  ;;  %2207 = vmatprep.subr.bf16.mxu1 %v2636_v0 }
0x11b0   :  { %v1469_v40 = vmul.f32 %v2307_v39, %v2303_v32  ;;  %v2267_v39 = vld [vmem:[#allocation13 + $0x10] sm:$0xff]  }
0x11b2   :  { %v1471_v41 = vpack.c.bf16 %v1469_v40, %v1469_v40  ;;  %v2268_v40 = vld [vmem:[#allocation13 + $0x18] sm:$0xff]  }
0x11b3   :  { %v2309_v42 = vpop.eup %2308 }
0x11b4   :  { %v1470_v43 = vmul.f32 %v2309_v42, %v2305_v34  ;;  %2192 = vmatmul.mubr.msk.bf16.vlgmr.msra.gmra.mrb[40].mxu0 %vm377_vm3, %v1471_v41  ;;  %v1993_v41 = vld [vmem:[#allocation11 + $0x1] ss:$0 sm:$0xff] }
0x11b5   :  { %2203 = vmatprep.mubr.msk.bf16.mxu0 %vm2637_vm0, %v2636_v0  ;;  %2202 = vmatpush3.bf16.msra.mxu0 %v2264_v45 }
0x11b6   :  { %v1472_v9 = vpack.c.bf16 %v1470_v43, %v1470_v43  ;;  %2213 = vmatprep.subr.bf16.mxu0 %v2636_v0 }
0x11b8   :  { %2198 = vmatmul.mubr.msk.bf16.vlgmr.msra.gmra.mrb[40].mxu1 %vm377_vm3, %v1472_v9 }
0x11b9   :  { %2208 = vmatpush3.bf16.msra.mxu1 %v2263_v44  ;;  %2209 = vmatprep.mubr.msk.bf16.mxu1 %vm2637_vm0, %v2636_v0 }
0x11ba   :  { %2221 = vmatprep.subr.bf16.mxu1 %v2636_v0 }
0x11c0   :  { %2210 = vmatmul.mubr.msk.bf16.vlgmr.msra.gmra.mrb[44].mxu1 %vm281_vm2, %v1348_v7 }
0x11c1   :  { %2225 = vmatprep.mubr.msk.bf16.mxu1 %vm2637_vm0, %v2636_v0  ;;  %2222 = vmatpush3.bf16.msra.mxu1 %v2267_v39 }
0x11c2   :  { %2223 = vmatprep.subr.bf16.mxu1 %v2636_v0 }
0x11c5   :  { %2224 = vmatpush3.bf16.msra.mxu1 %v2268_v40 }
0x1287   :  { %v1515_v46 = vpop.f32.mrb[40].mxu0 }
0x1288   :  { %v2193_v47 = vpop.f32.mrb[41].mxu0 }
0x1289   :  { %v1518_v48 = vpop.f32.mrb[42].mxu0 }
0x128a   :  { %v2194_v49 = vpop.f32.mrb[43].mxu0 }
0x128b   :  { %v1563_v50 = vpop.f32.mrb[40].mxu1 }
0x128c   :  { %v1569_v51 = vpack.c.bf16 %v1563_v50, %v1515_v46  ;;  %v2199_v52 = vpop.f32.mrb[41].mxu1  ;;  %v1997_v50 = vld [vmem:[#allocation14 + $0x1] ss:$0 sm:$0xff] }
0x128d   :  { %v1566_v53 = vpop.f32.mrb[42].mxu1 }
0x128e   :  { %v2200_v54 = vpop.f32.mrb[43].mxu1  ;;  %2204 = vmatmul.mubr.msk.bf16.vlgmr.msra.gmra.mrb[44].mxu0 %vm281_vm2, %v1569_v51 }
0x128f   :  { %2217 = vmatprep.mubr.msk.bf16.mxu0 %vm2637_vm0, %v2636_v0  ;;  %2214 = vmatpush3.bf16.msra.mxu0 %v2265_v23 }
0x1290   :  { %2215 = vmatprep.subr.bf16.mxu0 %v2636_v0 }
0x1293   :  { %v1663_v55 = vpop.f32.mrb[44].mxu1 }
0x1294   :  { %v2211_v56 = vpop.f32.mrb[45].mxu1 }
0x1295   :  { %v1666_v57 = vpop.f32.mrb[46].mxu1 }
0x1296   :  { %v2212_v58 = vpop.f32.mrb[47].mxu1 }
0x1361   :  { %v1613_v59 = vpop.f32.mrb[44].mxu0 }
0x1362   :  { %v1664_v61 = vadd.f32 %v1663_v55, %v1613_v59  ;;  %v2205_v62 = vpop.f32.mrb[45].mxu0 }
0x1363   :  { %v1616_v63 = vpop.f32.mrb[46].mxu0 }
0x1364   :  { %v1678_v1 = vadd.f32 %v1990_v60, %v1664_v61  ;;  %v1667_v2 = vadd.f32 %v1666_v57, %v1616_v63  ;;  %v2206_v4 = vpop.f32.mrb[47].mxu0 }
0x1366   :  { %v1679_v6 = vadd.f32 %v1990_v60, %v1667_v2  ;;  %v1680_v7 = vadd.f32 %v1678_v1, %v3051_v15 }
0x1368   :  { %v1686_v8 = vsel %vm227_vm1, %v1680_v7, 0.0  ;;  %v1681_v3 = vadd.f32 %v1679_v6, %v3053_v16  ;;  %v2266_v16 = vld [vmem:[#allocation10 + $0x18] sm:$0xff]  }
0x1369   :  { %1687 = vadd.xlane.f32.xlu1 %v1686_v8  ;;  %2216 = vmatpush3.bf16.msra.mxu0 %v2266_v16 }
0x136a   :  { %v1689_v10 = vsel %vm227_vm1, %v1681_v3, 0.0 }
0x136b   :  { %1690 = vadd.xlane.f32.xlu0 %v1689_v10 }
0x13f6   :  { %v1688_v11 = vpop.xlane.xlu1 %1687 }
0x13f7   :  { %v1692_v12 = vmul.f32 0.03125, %v1688_v11 }
0x13f8   :  { %v1691_v13 = vpop.xlane.xlu0 %1690 }
0x13f9   :  { %v1694_v14 = vsub.f32 %v1680_v7, %v1692_v12  ;;  %v1693_v17 = vmul.f32 0.03125, %v1691_v13 }
0x13fb   :  { %v1695_v18 = vsub.f32 %v1681_v3, %v1693_v17  ;;  %v1696_v20 = vmul.f32 %v1694_v14, %v1694_v14 }
0x13fd   :  { %v1698_v21 = vsel %vm227_vm1, %v1696_v20, 0.0  ;;  %v1697_v22 = vmul.f32 %v1695_v18, %v1695_v18 }
0x13fe   :  { %1699 = vadd.xlane.f32.xlu1 %v1698_v21 }
0x13ff   :  { %v1701_v15 = vsel %vm227_vm1, %v1697_v22, 0.0  ;;  %v2002_v22 = vld [vmem:[#allocation20 + $0x1] ss:$0 sm:$0xff] }
0x1400   :  { %1702 = vadd.xlane.f32.xlu0 %v1701_v15 }
0x148b   :  { %v1700_v24 = vpop.xlane.xlu1 %1699 }
0x148c   :  { %v1704_v25 = vmul.f32 0.03125, %v1700_v24 }
0x148d   :  { %v1703_v26 = vpop.xlane.xlu0 %1702 }
0x148e   :  { %v1706_v27 = vadd.f32 1e-05, %v1704_v25  ;;  %v1705_v28 = vmul.f32 0.03125, %v1703_v26 }
0x1490   :  { %2310 = vrsqrt.f32 %v1706_v27  ;;  %v1707_v29 = vadd.f32 1e-05, %v1705_v28 }
0x1492   :  { %2312 = vrsqrt.f32 %v1707_v29 }
0x149a   :  { %v2311_v30 = vpop.eup %2310 }
0x149b   :  { %v1710_v5 = vmul.f32 %v2311_v30, %v1694_v14 }
0x149c   :  { %v2313_v32 = vpop.eup %2312 }
0x149d   :  { %v1718_v33 = vmul.f32 %v1991_v31, %v1710_v5  ;;  %v1711_v34 = vmul.f32 %v2313_v32, %v1695_v18  ;;  %v2001_v18 = vld [vmem:[#allocation19 + $0x1] ss:$0 sm:$0xff] }
0x149f   :  { %v1719_v35 = vmul.f32 %v1991_v31, %v1711_v34  ;;  %v1726_v36 = vadd.f32 %v1992_v19, %v1718_v33 }
0x14a1   :  { %v1727_v37 = vadd.f32 %v1992_v19, %v1719_v35 }
0x14a3   :  { %v1733_v38 = vpack.c.bf16 %v1727_v37, %v1726_v36 }
0x14a5   :  { %2218 = vmatmul.mubr.msk.bf16.vlgmr.msra.gmra.mrb[48].mxu0 %vm227_vm1, %v1733_v38 }
0x1578   :  { %v1791_v42 = vpop.f32.mrb[48].mxu0 }
0x1579   :  { %v1792_v43 = vadd.f32 %v1993_v41, %v1791_v42  ;;  %v2219_v44 = vpop.f32.mrb[49].mxu0 }
0x157a   :  { %v1794_v9 = vpop.f32.mrb[50].mxu0 }
0x157b   :  { %v1795_v45 = vadd.f32 %v1993_v41, %v1794_v9  ;;  %v2220_v46 = vpop.f32.mrb[51].mxu0  ;;  %v1798_v47 = vmax.f32 %v1792_v43, 0.0 }
0x157d   :  { %v1799_v48 = vmax.f32 %v1795_v45, 0.0 }
0x157f   :  { %v1805_v49 = vpack.c.bf16 %v1799_v48, %v1798_v47 }
0x1581   :  { %2226 = vmatmul.mubr.msk.bf16.vlgmr.msra.gmra.mrb[48].mxu1 %vm227_vm1, %v1805_v49 }
0x1654   :  { %v1863_v51 = vpop.f32.mrb[48].mxu1 }
0x1655   :  { %v1864_v52 = vadd.f32 %v1997_v50, %v1863_v51  ;;  %v2227_v53 = vpop.f32.mrb[49].mxu1 }
0x1656   :  { %v1866_v54 = vpop.f32.mrb[50].mxu1 }
0x1657   :  { %v1867_v0 = vadd.f32 %v1997_v50, %v1866_v54  ;;  %v2228_v55 = vpop.f32.mrb[51].mxu1  ;;  %v1870_v56 = vadd.f32 %v1864_v52, %v1726_v36 }
0x1659   :  { %v1876_v57 = vsel %vm227_vm1, %v1870_v56, 0.0  ;;  %v1871_v58 = vadd.f32 %v1867_v0, %v1727_v37 }
0x165a   :  { %1877 = vadd.xlane.f32.xlu1 %v1876_v57 }
0x165b   :  { %v1879_v59 = vsel %vm227_vm1, %v1871_v58, 0.0 }
0x165c   :  { %1880 = vadd.xlane.f32.xlu0 %v1879_v59 }
0x16e7   :  { %v1878_v60 = vpop.xlane.xlu1 %1877 }
0x16e8   :  { %v1882_v61 = vmul.f32 0.03125, %v1878_v60 }
0x16e9   :  { %v1881_v62 = vpop.xlane.xlu0 %1880 }
0x16ea   :  { %v1884_v63 = vsub.f32 %v1870_v56, %v1882_v61  ;;  %v1883_v1 = vmul.f32 0.03125, %v1881_v62 }
0x16ec   :  { %v1885_v2 = vsub.f32 %v1871_v58, %v1883_v1  ;;  %v1886_v4 = vmul.f32 %v1884_v63, %v1884_v63 }
0x16ee   :  { %v1888_v6 = vsel %vm227_vm1, %v1886_v4, 0.0  ;;  %v1887_v7 = vmul.f32 %v1885_v2, %v1885_v2 }
0x16ef   :  { %1889 = vadd.xlane.f32.xlu1 %v1888_v6 }
0x16f0   :  { %v1891_v8 = vsel %vm227_vm1, %v1887_v7, 0.0 }
0x16f1   :  { %1892 = vadd.xlane.f32.xlu0 %v1891_v8 }
0x177c   :  { %v1890_v3 = vpop.xlane.xlu1 %1889 }
0x177d   :  { %v1894_v10 = vmul.f32 0.03125, %v1890_v3 }
0x177e   :  { %v1893_v11 = vpop.xlane.xlu0 %1892 }
0x177f   :  { %v1896_v12 = vadd.f32 1e-05, %v1894_v10  ;;  %v1895_v13 = vmul.f32 0.03125, %v1893_v11 }
0x1781   :  { %2314 = vrsqrt.f32 %v1896_v12  ;;  %v1897_v14 = vadd.f32 1e-05, %v1895_v13 }
0x1783   :  { %2316 = vrsqrt.f32 %v1897_v14 }
0x178b   :  { %v2315_v17 = vpop.eup %2314 }
0x178c   :  { %v1900_v20 = vmul.f32 %v2315_v17, %v1884_v63 }
0x178d   :  { %v2317_v21 = vpop.eup %2316 }
0x178e   :  { %v1901_v15 = vmul.f32 %v2317_v21, %v1885_v2  ;;  %v1908_v23 = vmul.f32 %v2001_v18, %v1900_v20 }
0x1790   :  { %v1909_v16 = vmul.f32 %v2001_v18, %v1901_v15  ;;  %v1916_v24 = vadd.f32 %v2002_v22, %v1908_v23 }
0x1792   :  { %v1917_v25 = vadd.f32 %v2002_v22, %v1909_v16  ;;  %v1918_v26 = vpack.c.bf16 %v1916_v24, %v1916_v24 }
0x1794   :  { %v1919_v27 = vpack.c.bf16 %v1917_v25, %v1917_v25  ;;  %1921 = vst.msk [vmem:[#allocation22] sm:$0xf] %vm1920_vm5, %v1918_v26 }
0x1796   :  { %1922 = vst.msk [vmem:[#allocation22 + $0x4] sm:$0xf] %vm1920_vm5, %v1919_v27 }
0x1797   :  { %2593 = shalt.err (!%p2590_p2)
}
0x1798   :  { %s2594_s0 = scalar_lea.hbm %s3186_s12, 128 }
0x1799   :  { %p2595_p3 = scmp.ne.s32.totalorder %s3186_s12, %s2594_s0  ;;  %p2598_p4 = scmp.lt.u32.totalorder %s2594_s0, %s3186_s12 }
0x179b   :  { %p2600_p5 = pnand %p2598_p4, %p2595_p3 }
0x179d   :  { %2603 = shalt.err (!%p2600_p5)
}
0x179e   :  { %1934 = dma.vmem_to_hbm [thread:$0]  %s1929_s18, 128, %s3186_s12, [#allocation4], %s2622_s15, %s2622_s15, %s2623_s16  }
0x179f   :  { %2618 = dma.done.wait [#allocation4], 128  }
0x17a0   :  { %2619 = vsyncadd [#allocation4], 4294967168 }
0x17a1   :  { %1938 = vsyncpa [#allocation3], 1 }
0x17a2   :  { %1939 = vsyncpa [#allocation6], 1 }
0x17a3   :  { %1940 = vsyncpa [#allocation9], 1 }
0x17a4   :  { %1941 = vsyncpa [#allocation12], 1 }
0x17a5   :  { %1942 = vsyncpa [#allocation15], 1 }
0x17a6   :  { %1943 = vsyncpa [#allocation18], 1 }
0x17a7   :  { %1944 = vsyncpa [#allocation21], 1 }
0x17a8   :  { %1945 = vsyncpa [#allocation4], 1 }

// kernel: tctrec_forward.9
= control target key start
LH: loop header
LB: loop body
LE: loop exit
PB: predicated region body
PF: predicated region fallthrough
CT: control target
= control target key end

     0   :  { %13 = vsyncpa [#allocation3], 0  ;;  %s702_s0 = inlined_call_operand.hbm [shape: f32[2,2,8,32], index: 0, kind: input, shape index: {}]   ;;  %s703_s1 = inlined_call_operand.hbm [shape: bf16[2,8,32], index: 1, kind: input, shape index: {}]   ;;  %s704_s2 = inlined_call_operand.hbm [shape: f32[2,2,8,5], index: 2, kind: input, shape index: {}]   ;;  %s705_s3 = inlined_call_operand.hbm [shape: bf16[2,8,5], index: 3, kind: input, shape index: {}]   ;;  %s706_s4 = inlined_call_operand.hbm [shape: f32[2,2,8], index: 4, kind: input, shape index: {}]   ;;  %s707_s5 = inlined_call_operand.hbm [shape: f32[2,8], index: 5, kind: input, shape index: {}]   ;;  %s708_s6 = inlined_call_operand.hbm [shape: f32[1,1,1], index: 6, kind: output, shape index: {0}]   ;;  %s709_s7 = inlined_call_operand.hbm [shape: f32[1,1,1], index: 7, kind: output, shape index: {1}]  }
   0x1   :  { %14 = vsyncpa [#allocation6], 0 }
   0x2   :  { %15 = vsyncpa [#allocation9], 0 }
   0x3   :  { %16 = vsyncpa [#allocation12], 0 }
   0x4   :  { %17 = vsyncpa [#allocation4], 0 }
   0x5   :  { %18 = vsyncpa [#allocation15], 0  ;;  %s530_s24 = smov [#allocation5]   ;;  %s342_s28 = scalar_lea.hbm %s703_s1, 128 }
   0x6   :  { %s36_s25 = sshll.u32 %s530_s24, 4  ;;  %p343_p0 = scmp.ne.s32.totalorder %s703_s1, %s342_s28  ;;  %s37_s25 = int_to_ptr.vmem [resolvable:$true] %s36_s25 }
   0x7   :  { %p346_p1 = scmp.lt.u32.totalorder %s342_s28, %s703_s1 }
   0x9   :  { %p348_p2 = pnand %p346_p1, %p343_p0 }
   0xb   :  { %351 = shalt.err (!%p348_p2)
}
   0xc   :  { %s352_s10 = scalar_lea.vmem %s37_s25, 128  ;;  %p357_p4 = scmp.lt.s32.totalorder %s37_s25, %s37_s25 }
   0xd   :  { %p353_p3 = scmp.ne.s32.totalorder %s37_s25, %s352_s10  ;;  %p358_p5 = scmp.lt.s32.totalorder %s352_s10, %s352_s10 }
   0xf   :  { %p359_p6 = por %p358_p5, %p357_p4 }
  0x11   :  { %p360_p7 = pnand %p359_p6, %p353_p3 }
  0x13   :  { %363 = shalt.err (!%p360_p7)
}
  0x14   :  { %s531_s11 = smov 64   ;;  %s532_s12 = smov 4  }
  0x15   :  { %42 = dma.hbm_to_vmem [thread:$0]  %s703_s1, 128, %s37_s25, [#allocation6], %s531_s11, %s531_s11, %s532_s12  }
  0x16   :  { %s533_s15 = smov [#allocation8]   ;;  %s534_s17 = smov [#allocation2]  }
  0x17   :  { %s60_s16 = sshll.u32 %s533_s15, 4  ;;  %s24_s18 = sshll.u32 %s534_s17, 4  ;;  %s61_s16 = int_to_ptr.vmem [resolvable:$true] %s60_s16  ;;  %s25_s18 = int_to_ptr.vmem [resolvable:$true] %s24_s18 }
  0x18   :  { %s364_s21 = scalar_lea.hbm %s705_s3, 128 }
  0x19   :  { %p365_p8 = scmp.ne.s32.totalorder %s705_s3, %s364_s21  ;;  %p368_p9 = scmp.lt.u32.totalorder %s364_s21, %s705_s3 }
  0x1b   :  { %p370_p10 = pnand %p368_p9, %p365_p8 }
  0x1d   :  { %373 = shalt.err (!%p370_p10)
}
  0x1e   :  { %s374_s1 = scalar_lea.vmem %s61_s16, 128  ;;  %p379_p12 = scmp.lt.s32.totalorder %s61_s16, %s61_s16 }
  0x1f   :  { %p375_p11 = scmp.ne.s32.totalorder %s61_s16, %s374_s1  ;;  %p380_p13 = scmp.lt.s32.totalorder %s374_s1, %s374_s1 }
  0x21   :  { %p381_p0 = por %p380_p13, %p379_p12 }
  0x23   :  { %p382_p1 = pnand %p381_p0, %p375_p11 }
  0x25   :  { %385 = shalt.err (!%p382_p1)
}
  0x26   :  { %66 = dma.hbm_to_vmem [thread:$0]  %s705_s3, 128, %s61_s16, [#allocation9], %s531_s11, %s531_s11, %s532_s12  }
  0x27   :  { %s386_s30 = scalar_lea.hbm %s702_s0, 512 }
  0x28   :  { %p387_p2 = scmp.ne.s32.totalorder %s702_s0, %s386_s30  ;;  %p390_p3 = scmp.lt.u32.totalorder %s386_s30, %s702_s0 }
  0x2a   :  { %p392_p4 = pnand %p390_p3, %p387_p2 }
  0x2c   :  { %395 = shalt.err (!%p392_p4)
}
  0x2d   :  { %s396_s14 = scalar_lea.vmem %s25_s18, 512  ;;  %p401_p6 = scmp.lt.s32.totalorder %s25_s18, %s25_s18 }
  0x2e   :  { %p397_p5 = scmp.ne.s32.totalorder %s25_s18, %s396_s14  ;;  %p402_p7 = scmp.lt.s32.totalorder %s396_s14, %s396_s14 }
  0x30   :  { %p403_p8 = por %p402_p7, %p401_p6 }
  0x32   :  { %p404_p9 = pnand %p403_p8, %p397_p5 }
  0x34   :  { %407 = shalt.err (!%p404_p9)
}
  0x35   :  { %s535_s3 = smov 128   ;;  %s536_s11 = smov 8  }
  0x36   :  { %30 = dma.hbm_to_vmem [thread:$0]  %s702_s0, 512, %s25_s18, [#allocation3], %s535_s3, %s535_s3, %s536_s11  }
  0x37   :  { %s537_s16 = smov [#allocation7]   ;;  %s538_s19 = smov [#allocation10]  }
  0x38   :  { %s48_s17 = sshll.u32 %s537_s16, 4  ;;  %s72_s20 = sshll.u32 %s538_s19, 4  ;;  %s49_s17 = int_to_ptr.vmem [resolvable:$true] %s48_s17  ;;  %s73_s20 = int_to_ptr.vmem [resolvable:$true] %s72_s20 }
  0x39   :  { %s408_s23 = scalar_lea.hbm %s704_s2, 512 }
  0x3a   :  { %p409_p10 = scmp.ne.s32.totalorder %s704_s2, %s408_s23  ;;  %p412_p11 = scmp.lt.u32.totalorder %s408_s23, %s704_s2 }
  0x3c   :  { %p414_p12 = pnand %p412_p11, %p409_p10 }
  0x3e   :  { %417 = shalt.err (!%p414_p12)
}
  0x3f   :  { %s418_s0 = scalar_lea.vmem %s49_s17, 512  ;;  %p423_p0 = scmp.lt.s32.totalorder %s49_s17, %s49_s17 }
  0x40   :  { %p419_p13 = scmp.ne.s32.totalorder %s49_s17, %s418_s0  ;;  %p424_p1 = scmp.lt.s32.totalorder %s418_s0, %s418_s0 }
  0x42   :  { %p425_p2 = por %p424_p1, %p423_p0 }
  0x44   :  { %p426_p3 = pnand %p425_p2, %p419_p13 }
  0x46   :  { %429 = shalt.err (!%p426_p3)
}
  0x47   :  { %54 = dma.hbm_to_vmem [thread:$0]  %s704_s2, 512, %s49_s17, [#allocation6], %s535_s3, %s535_s3, %s536_s11  }
  0x48   :  { %s430_s30 = scalar_lea.hbm %s706_s4, 64 }
  0x49   :  { %p431_p4 = scmp.ne.s32.totalorder %s706_s4, %s430_s30  ;;  %p434_p5 = scmp.lt.u32.totalorder %s430_s30, %s706_s4 }
  0x4b   :  { %p436_p6 = pnand %p434_p5, %p431_p4 }
  0x4d   :  { %439 = shalt.err (!%p436_p6)
}
  0x4e   :  { %s440_s14 = scalar_lea.vmem %s73_s20, 64  ;;  %p445_p8 = scmp.lt.s32.totalorder %s73_s20, %s73_s20 }
  0x4f   :  { %p441_p7 = scmp.ne.s32.totalorder %s73_s20, %s440_s14  ;;  %p446_p9 = scmp.lt.s32.totalorder %s440_s14, %s440_s14 }
  0x51   :  { %p447_p10 = por %p446_p9, %p445_p8 }
  0x53   :  { %p448_p11 = pnand %p447_p10, %p441_p7 }
  0x55   :  { %451 = shalt.err (!%p448_p11)
}
  0x56   :  { %s539_s2 = smov 32   ;;  %s540_s3 = smov 2  }
  0x57   :  { %78 = dma.hbm_to_vmem [thread:$0]  %s706_s4, 64, %s73_s20, [#allocation9], %s539_s2, %s539_s2, %s540_s3  }
  0x58   :  { %s541_s15 = smov [#allocation11]   ;;  %s452_s21 = scalar_lea.hbm %s707_s5, 32 }
  0x59   :  { %s85_s16 = sshll.u32 %s541_s15, 4  ;;  %p453_p12 = scmp.ne.s32.totalorder %s707_s5, %s452_s21  ;;  %s86_s16 = int_to_ptr.vmem [resolvable:$true] %s85_s16 }
  0x5a   :  { %p456_p13 = scmp.lt.u32.totalorder %s452_s21, %s707_s5 }
  0x5c   :  { %p458_p0 = pnand %p456_p13, %p453_p12 }
  0x5e   :  { %461 = shalt.err (!%p458_p0)
}
  0x5f   :  { %s462_s1 = scalar_lea.vmem %s86_s16, 32  ;;  %p467_p2 = scmp.lt.s32.totalorder %s86_s16, %s86_s16 }
  0x60   :  { %p463_p1 = scmp.ne.s32.totalorder %s86_s16, %s462_s1  ;;  %p468_p3 = scmp.lt.s32.totalorder %s462_s1, %s462_s1 }
  0x62   :  { %p469_p4 = por %p468_p3, %p467_p2 }
  0x64   :  { %p470_p5 = pnand %p469_p4, %p463_p1 }
  0x66   :  { %473 = shalt.err (!%p470_p5)
}
  0x67   :  { %88 = dma.hbm_to_vmem [thread:$0]  %s707_s5, 32, %s86_s16, [#allocation12]  }
  0x68   :  { %518 = dma.done.wait [#allocation3], 512  }
  0x69   :  { %519 = vsyncadd [#allocation3], 4294966784 }
  0x6a   :  { %520 = dma.done.wait [#allocation6], 640  }
  0x6b   :  { %521 = vsyncadd [#allocation6], 4294966656 }
  0x6c   :  { %522 = dma.done.wait [#allocation9], 192  }
  0x6d   :  { %523 = vsyncadd [#allocation9], 4294967104 }
  0x6e   :  { %524 = dma.done.wait [#allocation12], 32  }
  0x6f   :  { %525 = vsyncadd [#allocation12], 4294967264  ;;  %v109_v0 = vld [vmem:[#allocation2 + $0x10] sm:$0xff]  ;;  %v305_v1 = vld [vmem:[#allocation5] sm:$0xff]   ;;  %vm130_vm0 = vcmask 261120   ;;  %vm180_vm1 = vcmask 39936   ;;  %v151_v32 = vlaneseq }
  0x70   :  { %v107_v2 = vld [vmem:[#allocation2] sm:$0xff]  ;;  %v306_v3 = vunpack.c.l.bf16 %v305_v1  ;;  %v110_v4 = vld [vmem:[#allocation2 + $0x18] sm:$0xff]  ;;  %v307_v5 = vunpack.c.h.bf16 %v305_v1  ;;  %v108_v6 = vld [vmem:[#allocation2 + $0x8] sm:$0xff]  ;;  %vm244_vm2 = vcmask 58368   ;;  %vm169_vm3 = vcmask 1041409   ;;  %s542_s5 = smov [#allocation13]  }
  0x71   :  { %v309_v7 = vld [vmem:[#allocation8] sm:$0xff]   ;;  %v116_v12 = vld [vmem:[#allocation7 + $0x8] sm:$0xff]  ;;  %v118_v22 = vld [vmem:[#allocation7 + $0x18] sm:$0xff]  ;;  %v152_v33 = vand.u32 127, %v151_v32  ;;  %v154_v34 = vshrl.u32 %v151_v32, 7  ;;  %s278_s25 = sshll.u32 %s542_s5, 4  ;;  %s279_s25 = int_to_ptr.vmem [resolvable:$true] %s278_s25 }
  0x72   :  { %v128_v8 = vmul.f32 %v306_v3, %v109_v0  ;;  %v126_v9 = vmul.f32 %v306_v3, %v107_v2  ;;  %v129_v10 = vmul.f32 %v307_v5, %v110_v4  ;;  %v127_v11 = vmul.f32 %v307_v5, %v108_v6  ;;  %v115_v14 = vld [vmem:[#allocation7] sm:$0xff]  ;;  %v117_v23 = vld [vmem:[#allocation7 + $0x10] sm:$0xff]  ;;  %v656_v30 = vld [vmem:[#allocation11] sm:$0x3]  ;;  %s543_s0 = smov [#allocation14]   ;;  %s474_s29 = scalar_lea.vmem %s279_s25, 16 }
  0x73   :  { %v311_v13 = vunpack.c.h.bf16 %v309_v7  ;;  %v310_v15 = vunpack.c.l.bf16 %v309_v7  ;;  %v260_v31 = vsel %vm244_vm2, %v656_v30, 0.0  ;;  %v155_v37 = vsub.s32 %v152_v33, %v154_v34  ;;  %v123_v49 = vld [vmem:[#allocation10] sm:$0x3]  ;;  %v124_v59 = vld [vmem:[#allocation10 + $0x2] sm:$0x3]  ;;  %s288_s18 = sshll.u32 %s543_s0, 4  ;;  %p475_p6 = scmp.ne.s32.totalorder %s279_s25, %s474_s29  ;;  %s668_s18 = int_to_ptr.vmem [resolvable:$true] %s288_s18 }
  0x74   :  { %v137_v16 = vsel %vm130_vm0, %v128_v8, 0.0  ;;  %v131_v17 = vsel %vm130_vm0, %v126_v9, 0.0  ;;  %v140_v18 = vsel %vm130_vm0, %v129_v10, 0.0  ;;  %v134_v19 = vsel %vm130_vm0, %v127_v11, 0.0  ;;  %s478_s30 = scalar_lea.vmem %s279_s25, 32  ;;  %p479_p7 = scmp.lt.s32.totalorder %s279_s25, %s279_s25 }
  0x75   :  { %138 = vadd.xlane.f32.xlu1 %v137_v16  ;;  %132 = vadd.xlane.f32.xlu0 %v131_v17  ;;  %v177_v20 = vmul.f32 %v311_v13, %v116_v12  ;;  %v176_v21 = vmul.f32 %v310_v15, %v115_v14  ;;  %v179_v26 = vmul.f32 %v311_v13, %v118_v22  ;;  %vm258_vm4 = vcmask 0   ;;  %p480_p8 = scmp.lt.s32.totalorder %s478_s30, %s474_s29 }
  0x76   :  { %v178_v27 = vmul.f32 %v310_v15, %v117_v23 }
  0x77   :  { %v184_v24 = vsel %vm180_vm1, %v177_v20, 0.0  ;;  %v181_v25 = vsel %vm180_vm1, %v176_v21, 0.0  ;;  %v190_v28 = vsel %vm180_vm1, %v179_v26, 0.0  ;;  %p481_p9 = por %p480_p8, %p479_p7 }
  0x78   :  { %v187_v29 = vsel %vm180_vm1, %v178_v27, 0.0 }
  0x79   :  { %141 = vadd.xlane.f32.xlu1 %v140_v18  ;;  %135 = vadd.xlane.f32.xlu0 %v134_v19  ;;  %p482_p10 = pnand %p481_p9, %p475_p6 }
  0x7d   :  { %185 = vadd.xlane.f32.xlu1 %v184_v24  ;;  %182 = vadd.xlane.f32.xlu0 %v181_v25 }
  0x81   :  { %191 = vadd.xlane.f32.xlu1 %v190_v28  ;;  %188 = vadd.xlane.f32.xlu0 %v187_v29 }
  0x85   :  { %261 = vadd.xlane.f32.xlu1 %v260_v31 }
 0x102   :  { %v139_v35 = vpop.xlane.xlu1 %138  ;;  %v133_v36 = vpop.xlane.xlu0 %132 }
 0x103   :  { %v143_v38 = vmul.f32 0.5, %v133_v36  ;;  %v145_v43 = vmul.f32 0.5, %v139_v35 }
 0x105   :  { %v156_v44 = vrot.slane %v143_v38, %v155_v37  ;;  %v164_v53 = vrot.slane %v145_v43, %v155_v37 }
 0x106   :  { %v142_v39 = vpop.xlane.xlu1 %141  ;;  %v136_v40 = vpop.xlane.xlu0 %135 }
 0x107   :  { %v146_v41 = vmul.f32 0.5, %v142_v39  ;;  %v144_v42 = vmul.f32 0.5, %v136_v40 }
 0x109   :  { %v160_v45 = vrot.slane %v144_v42, %v155_v37  ;;  %v168_v48 = vrot.slane %v146_v41, %v155_v37 }
 0x10a   :  { %v186_v46 = vpop.xlane.xlu1 %185  ;;  %v183_v47 = vpop.xlane.xlu0 %182 }
 0x10b   :  { %v170_v50 = vsel %vm169_vm3, %v160_v45, %v156_v44  ;;  %v194_v51 = vmul.f32 0.5, %v186_v46  ;;  %v193_v52 = vmul.f32 0.5, %v183_v47  ;;  %v171_v60 = vsel %vm169_vm3, %v168_v48, %v164_v53 }
 0x10c   :  { %v174_v56 = vadd.f32 %v170_v50, %v123_v49  ;;  %v175_v3 = vadd.f32 %v171_v60, %v124_v59 }
 0x10d   :  { %v208_v54 = vrot.slane %v194_v51, %v155_v37  ;;  %v204_v55 = vrot.slane %v193_v52, %v155_v37 }
 0x10e   :  { %v192_v57 = vpop.xlane.xlu1 %191  ;;  %v189_v58 = vpop.xlane.xlu0 %188 }
 0x10f   :  { %v217_v61 = vsel %vm169_vm3, %v208_v54, %v204_v55  ;;  %v196_v62 = vmul.f32 0.5, %v192_v57  ;;  %v195_v63 = vmul.f32 0.5, %v189_v58 }
 0x110   :  { %v221_v0 = vadd.f32 %v217_v61, %v174_v56 }
 0x111   :  { %v216_v1 = vrot.slane %v196_v62, %v155_v37  ;;  %v212_v2 = vrot.slane %v195_v63, %v155_v37 }
 0x112   :  { %v223_v4 = vmul.f32 -1.0, %v221_v0  ;;  %v262_v28 = vpop.xlane.xlu1 %261 }
 0x113   :  { %v218_v5 = vsel %vm169_vm3, %v216_v1, %v212_v2  ;;  %v263_v29 = vrot.slane %v262_v28, 4 }
 0x114   :  { %v224_v6 = vmul.f32 1.442695, %v223_v4  ;;  %v222_v7 = vadd.f32 %v218_v5, %v175_v3 }
 0x115   :  { %v264_v31 = vadd.f32 %v263_v29, %v262_v28 }
 0x116   :  { %330 = vpow2.f32 %v224_v6  ;;  %v226_v8 = vmul.f32 1.442695, %v222_v7 }
 0x117   :  { %v265_v32 = vrot.slane %v264_v31, 2 }
 0x118   :  { %332 = vpow2.f32 %v226_v8 }
 0x119   :  { %v266_v36 = vadd.f32 %v265_v32, %v264_v31 }
 0x11b   :  { %v267_v39 = vrot.slane %v266_v36, 1 }
 0x120   :  { %v331_v9 = vpop.eup %330 }
 0x121   :  { %v228_v10 = vadd.f32 1.0, %v331_v9 }
 0x122   :  { %v333_v11 = vpop.eup %332 }
 0x123   :  { %334 = vrcp.f32 %v228_v10  ;;  %v229_v12 = vadd.f32 1.0, %v333_v11 }
 0x125   :  { %336 = vrcp.f32 %v229_v12 }
 0x12d   :  { %v335_v13 = vpop.eup %334 }
 0x12e   :  { %v234_v14 = vadd.f32 1e-24, %v335_v13 }
 0x12f   :  { %v337_v15 = vpop.eup %336 }
 0x130   :  { %v235_v16 = vadd.f32 1e-24, %v337_v15  ;;  %338 = vlog2.f32 %v234_v14 }
 0x132   :  { %340 = vlog2.f32 %v235_v16 }
 0x13a   :  { %v339_v17 = vpop.eup %338 }
 0x13b   :  { %v237_v18 = vmul.f32 0.6931472, %v339_v17 }
 0x13c   :  { %v341_v19 = vpop.eup %340 }
 0x13d   :  { %v239_v20 = vmul.f32 0.6931472, %v341_v19  ;;  %v240_v21 = vsub.f32 0.0, %v237_v18 }
 0x13f   :  { %v241_v22 = vsub.f32 0.0, %v239_v20  ;;  %v242_v23 = vmul.f32 %v240_v21, %v656_v30 }
 0x141   :  { %v243_v24 = vmul.f32 %v241_v22, %v656_v30  ;;  %v245_v25 = vsel %vm244_vm2, %v242_v23, 0.0  ;;  %v268_v30 = vadd.f32 %v267_v39, %v266_v36 }
 0x143   :  { %v246_v26 = vsel %vm244_vm2, %v243_v24, 0.0 }
 0x144   :  { %v247_v27 = vadd.f32 %v246_v26, %v245_v25 }
 0x146   :  { %248 = vadd.xlane.f32.xlu0 %v247_v27 }
 0x1d3   :  { %v249_v33 = vpop.xlane.xlu0 %248 }
 0x1d4   :  { %v250_v34 = vrot.slane %v249_v33, 4 }
 0x1d6   :  { %v251_v35 = vadd.f32 %v250_v34, %v249_v33 }
 0x1d8   :  { %v252_v37 = vrot.slane %v251_v35, 2 }
 0x1da   :  { %v253_v38 = vadd.f32 %v252_v37, %v251_v35 }
 0x1dc   :  { %v254_v40 = vrot.slane %v253_v38, 1 }
 0x1de   :  { %v255_v41 = vadd.f32 %v254_v40, %v253_v38 }
 0x1e0   :  { %312 = vpush %v255_v41 }
 0x1e1   :  { %314 = vpush %v268_v30 }
 0x211   :  { %s313_s27 = spop %312 }
 0x212   :  { %v257_v42 = vstv %s313_s27  ;;  %s315_s28 = spop %314 }
 0x213   :  { %v270_v43 = vstv %s315_s28  ;;  %259 = vst.msk [vmem:[#allocation13] sm:$0x1] %vm258_vm4, %v257_v42 }
 0x214   :  { %485 = shalt.err (!%p482_p10)
}
 0x215   :  { %s486_s10 = scalar_lea.hbm %s708_s6, 16 }
 0x216   :  { %p487_p11 = scmp.ne.s32.totalorder %s708_s6, %s486_s10  ;;  %p490_p12 = scmp.lt.u32.totalorder %s486_s10, %s708_s6 }
 0x218   :  { %p492_p13 = pnand %p490_p12, %p487_p11 }
 0x21a   :  { %495 = shalt.err (!%p492_p13)
}
 0x21b   :  { %281 = dma.vmem_to_hbm [thread:$0]  %s279_s25, 16, %s708_s6, [#allocation4]   ;;  %271 = vst.msk [vmem:[#allocation14] sm:$0x1] %vm258_vm4, %v270_v43 }
 0x21c   :  { %s496_s15 = scalar_lea.vmem %s668_s18, 16  ;;  %s500_s16 = scalar_lea.vmem %s668_s18, 32 }
 0x21d   :  { %p497_p0 = scmp.ne.s32.totalorder %s668_s18, %s496_s15  ;;  %p501_p1 = scmp.lt.s32.totalorder %s668_s18, %s668_s18 }
 0x21e   :  { %p502_p2 = scmp.lt.s32.totalorder %s500_s16, %s496_s15 }
 0x220   :  { %p503_p3 = por %p502_p2, %p501_p1 }
 0x222   :  { %p504_p4 = pnand %p503_p3, %p497_p0 }
 0x224   :  { %507 = shalt.err (!%p504_p4)
}
 0x225   :  { %s508_s21 = scalar_lea.hbm %s709_s7, 16 }
 0x226   :  { %p509_p5 = scmp.ne.s32.totalorder %s709_s7, %s508_s21  ;;  %p512_p6 = scmp.lt.u32.totalorder %s508_s21, %s709_s7 }
 0x228   :  { %p514_p7 = pnand %p512_p6, %p509_p5 }
 0x22a   :  { %517 = shalt.err (!%p514_p7)
}
 0x22b   :  { %291 = dma.vmem_to_hbm [thread:$0]  %s668_s18, 16, %s709_s7, [#allocation15]  }
 0x22c   :  { %526 = dma.done.wait [#allocation4], 16  }
 0x22d   :  { %527 = vsyncadd [#allocation4], 4294967280 }
 0x22e   :  { %528 = dma.done.wait [#allocation15], 16  }
 0x22f   :  { %529 = vsyncadd [#allocation15], 4294967280 }
 0x230   :  { %298 = vsyncpa [#allocation3], 1 }
 0x231   :  { %299 = vsyncpa [#allocation6], 1 }
 0x232   :  { %300 = vsyncpa [#allocation9], 1 }
 0x233   :  { %301 = vsyncpa [#allocation12], 1 }
 0x234   :  { %302 = vsyncpa [#allocation4], 1 }
 0x235   :  { %303 = vsyncpa [#allocation15], 1 }

</bundles_post_ra>
